<compile_context>
chip_gen: v7x
topology: tpu7x:2x2x1
jax: 0.10.0
libtpu: 0.0.40
codegen_flags: <defaults>
</compile_context>

<pallas_src>
import numpy as np
import jax
import jax.numpy as jnp
from jax import lax
from jax.experimental import pallas as pl
from jax.experimental.pallas import tpu as pltpu


# ----------------------------------------------------------------------------
# Static (trace-time, numpy) helpers
# ----------------------------------------------------------------------------
def interp_matrix(out_size, in_size):
    """Bilinear interpolation matrix, align_corners=True (PyTorch semantics)."""
    A = np.zeros((out_size, in_size), np.float32)
    if in_size == 1:
        A[:, 0] = 1.0
        return A
    if out_size == 1:
        A[0, 0] = 1.0
        return A
    scale = (in_size - 1) / (out_size - 1)
    for i in range(out_size):
        s = i * scale
        i0 = min(int(np.floor(s)), in_size - 1)
        i1 = min(i0 + 1, in_size - 1)
        w1 = s - i0
        A[i, i0] += 1.0 - w1
        A[i, i1] += w1
    return A


def build_upsample_matrix(H, W, h, w):
    """((h+2)*(w+2), H*W): padded-grid conv output -> upsampled target grid.

    Rows corresponding to the padding ring are zero, so the (finite) garbage
    produced by the in-kernel tap slices at ring positions is dropped for free.
    """
    Ah = interp_matrix(H, h)
    Aw = interp_matrix(W, w)
    core = np.kron(Ah, Aw)                                    # (H*W, h*w)
    U = np.zeros(((h + 2) * (w + 2), H * W), np.float32)
    for y in range(h):
        r0 = (y + 1) * (w + 2) + 1
        U[r0:r0 + w, :] = core[:, y * w:(y + 1) * w].T
    return U


def build_tap_masks(H, W):
    """(9, 1, H*W) 0/1 masks: validity of tap (dy, dx) at each output pixel."""
    yy, xx = np.meshgrid(np.arange(H), np.arange(W), indexing="ij")
    m = np.zeros((9, 1, H * W), np.float32)
    for dy in range(3):
        for dx in range(3):
            valid = ((yy + dy - 1 >= 0) & (yy + dy - 1 < H) &
                     (xx + dx - 1 >= 0) & (xx + dx - 1 < W))
            m[dy * 3 + dx, 0] = valid.reshape(-1).astype(np.float32)
    return m


# ----------------------------------------------------------------------------
# Fused Pallas kernel
# ----------------------------------------------------------------------------
def _make_neck_kernel(L, c_low, H, W, scale_meta):
    T = H * W
    MF = W + 1  # lane margin for the final conv's tap slices

    def kernel(*refs):
        feat = refs[0:L]                 # (1, Cin_s, E_s) bf16, flattened+extended
        wconv = refs[L:2 * L]            # (9, c_low, Cin_s) bf16
        umat = refs[2 * L:3 * L - 1]     # ((h+2)(w+2), T) bf16
        mask = refs[3 * L - 1]           # (9, 1, T) f32
        wfin = refs[3 * L]               # (9, 1, c_low) bf16
        bsum = refs[3 * L + 1]           # (c_low, 1) f32  (sum of per-scale biases)
        bfin = refs[3 * L + 2]           # (1, 1) f32
        x_ref = refs[3 * L + 3]          # out: (1, c_low, T) f32
        y_ref = refs[3 * L + 4]          # out: (1, 1, T) f32
        xpad = refs[3 * L + 5]           # scratch: (c_low, T + 2*MF) bf16

        # ---- per-scale 3x3 conv (+ bilinear upsample) + accumulate ----------
        acc = None
        for s in range(L):
            h, w, m, is_last = scale_meta[s]
            row = w if is_last else w + 2              # flattened row pitch
            tp = h * w if is_last else (h + 2) * (w + 2)
            conv = None
            for dy in range(3):
                for dx in range(3):
                    t = dy * 3 + dx
                    off = (dy - 1) * row + (dx - 1)
                    tap = feat[s][0, :, pl.ds(m + off, tp)]           # (Cin_s, tp)
                    r = jnp.dot(wconv[s][t], tap,
                                preferred_element_type=jnp.float32)   # (c_low, tp)
                    if is_last:
                        r = r * mask[t]    # zero-padding taps at the image border
                    conv = r if conv is None else conv + r
            if is_last:
                contrib = conv                                         # (c_low, T)
            else:
                contrib = jnp.dot(conv.astype(jnp.bfloat16), umat[s][...],
                                  preferred_element_type=jnp.float32)  # (c_low, T)
            acc = contrib if acc is None else acc + contrib

        # align_corners bilinear rows sum to 1 -> all conv biases collapse into
        # one vector, added once here (free VPU work under the MXU).
        x_val = acc + bsum[...]                                        # (c_low, T)
        x_ref[0] = x_val

        # ---- fused final 3x3 conv + sigmoid (x never leaves VMEM) -----------
        xpad[...] = jnp.zeros((c_low, T + 2 * MF), jnp.bfloat16)
        xpad[:, pl.ds(MF, T)] = x_val.astype(jnp.bfloat16)
        yacc = None
        for dy in range(3):
            for dx in range(3):
                t = dy * 3 + dx
                off = (dy - 1) * W + (dx - 1)
                tap = xpad[:, pl.ds(MF + off, T)]                      # (c_low, T)
                r = jnp.dot(wfin[t], tap,
                            preferred_element_type=jnp.float32)        # (1, T)
                r = r * mask[t]
                yacc = r if yacc is None else yacc + r
        yacc = yacc + bfin[...]                                        # (1,T)+(1,1)
        y_ref[0] = pl.reciprocal(1.0 + jnp.exp(-yacc), approx=True)

    return kernel


# ----------------------------------------------------------------------------
# LightPEMASKNeck forward (Pallas)
# ----------------------------------------------------------------------------
def pemask_neck_forward(inputs, params, in_channels):
    scale_feats = inputs[::-1]
    L = len(in_channels)
    c_low = in_channels[-1]
    N, _, H, W = scale_feats[-1].shape
    T = H * W

    feats, wconvs, umats, scale_meta = [], [], [], []
    bias_sum = jnp.zeros((c_low, 1), jnp.float32)
    for s in range(L):
        w, b = params[f"conv{s}"]
        f = scale_feats[s]
        _, cin, h, ww = f.shape
        bias_sum = bias_sum + b.reshape(c_low, 1).astype(jnp.float32)
        wconvs.append(jnp.transpose(w, (2, 3, 0, 1))
                      .reshape(9, c_low, cin).astype(jnp.bfloat16))
        is_last = (s == L - 1)
        if is_last:
            m = ww + 1
            flat = f.reshape(N, cin, h * ww)
        else:
            m = ww + 3
            flat = jnp.pad(f, ((0, 0), (0, 0), (1, 1), (1, 1))).reshape(
                N, cin, (h + 2) * (ww + 2))
            umats.append(jnp.asarray(build_upsample_matrix(H, W, h, ww),
                                     jnp.bfloat16))
        feats.append(jnp.pad(flat, ((0, 0), (0, 0), (m, m))).astype(jnp.bfloat16))
        scale_meta.append((h, ww, m, is_last))

    masks = jnp.asarray(build_tap_masks(H, W))                      # (9, 1, T) f32
    wf, bf = params["convfinal"]
    wfin = jnp.transpose(wf, (2, 3, 0, 1)).reshape(9, 1, c_low).astype(jnp.bfloat16)
    bfin = bf.reshape(1, 1).astype(jnp.float32)

    in_specs = []
    for fe in feats:
        in_specs.append(pl.BlockSpec((1,) + fe.shape[1:], lambda n: (n, 0, 0)))
    for wc in wconvs:
        in_specs.append(pl.BlockSpec(wc.shape, lambda n: (0, 0, 0)))
    for um in umats:
        in_specs.append(pl.BlockSpec(um.shape, lambda n: (0, 0)))
    in_specs.append(pl.BlockSpec(masks.shape, lambda n: (0, 0, 0)))
    in_specs.append(pl.BlockSpec(wfin.shape, lambda n: (0, 0, 0)))
    in_specs.append(pl.BlockSpec(bias_sum.shape, lambda n: (0, 0)))
    in_specs.append(pl.BlockSpec(bfin.shape, lambda n: (0, 0)))

    out_specs = [
        pl.BlockSpec((1, c_low, T), lambda n: (n, 0, 0)),
        pl.BlockSpec((1, 1, T), lambda n: (n, 0, 0)),
    ]
    out_shape = [
        jax.ShapeDtypeStruct((N, c_low, T), jnp.float32),
        jax.ShapeDtypeStruct((N, 1, T), jnp.float32),
    ]

    grid_spec = pltpu.PrefetchScalarGridSpec(
        num_scalar_prefetch=0,
        grid=(N,),
        in_specs=in_specs,
        out_specs=out_specs,
        scratch_shapes=[pltpu.VMEM((c_low, T + 2 * (W + 1)), jnp.bfloat16)],
    )
    kernel = _make_neck_kernel(L, c_low, H, W, tuple(scale_meta))
    x_flat, y_flat = pl.pallas_call(
        kernel,
        grid_spec=grid_spec,
        out_shape=out_shape,
        compiler_params=pltpu.CompilerParams(dimension_semantics=("parallel",)),
    )(*feats, *wconvs, *umats, masks, wfin, bias_sum, bfin)

    # Order-preserving reshapes only (no transposes): blocks are already NCHW.
    x = x_flat.reshape(N, c_low, H, W)
    y = y_flat.reshape(N, 1, H, W)
    return y, x


# ----------------------------------------------------------------------------
# Pure-JAX reference (f32) for verification
# ----------------------------------------------------------------------------
def _ref_conv(x, w, b):
    out = lax.conv_general_dilated(
        x, w, window_strides=(1, 1), padding=((1, 1), (1, 1)),
        dimension_numbers=("NCHW", "OIHW", "NCHW"))
    return out + b[None, :, None, None]


def pemask_neck_reference(inputs, params, in_channels):
    scale_feats = inputs[::-1]
    x = jnp.zeros_like(scale_feats[-1])
    H, W = x.shape[2], x.shape[3]
    for i in range(len(in_channels)):
        w, b = params[f"conv{i}"]
        tmp = _ref_conv(scale_feats[i], w, b)
        if i < len(in_channels) - 1:
            ah = jnp.asarray(interp_matrix(H, tmp.shape[2]))
            aw = jnp.asarray(interp_matrix(W, tmp.shape[3]))
            tmp = jnp.einsum("Hh,nchw,Ww->ncHW", ah, tmp, aw)
        x = x + tmp
    wf, bf = params["convfinal"]
    return jax.nn.sigmoid(_ref_conv(x, wf, bf)), x


# ----------------------------------------------------------------------------
# Main
# ----------------------------------------------------------------------------
if __name__ == "__main__":
    in_channels = [32, 16, 8, 4]        # already sorted descending (module sorts)
    L = len(in_channels)
    c_low = in_channels[-1]
    N, base = 2, 16

    key = jax.random.PRNGKey(0)

    params = {}
    for i, cin in enumerate(in_channels):
        key, k1, k2 = jax.random.split(key, 3)
        params[f"conv{i}"] = (
            0.1 * jax.random.normal(k1, (c_low, cin, 3, 3), jnp.float32),
            0.1 * jax.random.normal(k2, (c_low,), jnp.float32),
        )
    key, k1, k2 = jax.random.split(key, 3)
    params["convfinal"] = (
        0.1 * jax.random.normal(k1, (1, c_low, 3, 3), jnp.float32),
        0.1 * jax.random.normal(k2, (1,), jnp.float32),
    )

    # inputs[j]: channels in_channels[L-1-j], spatial base / 2**j (finest first).
    inputs = []
    for j in range(L):
        ch = in_channels[L - 1 - j]
        s = base // (2 ** j)
        key, k = jax.random.split(key)
        inputs.append(jax.random.normal(k, (N, ch, s, s), jnp.float32))

    y, x_acc = pemask_neck_forward(inputs, params, in_channels)
    jax.block_until_ready((y, x_acc))

    y_gold, x_gold = pemask_neck_reference(inputs, params, in_channels)
    # bf16 MXU operands (f32 accumulation) -> tolerance relaxed vs pure f32.
    np.testing.assert_allclose(np.asarray(x_acc), np.asarray(x_gold),
                               rtol=3e-2, atol=3e-2)
    np.testing.assert_allclose(np.asarray(y), np.asarray(y_gold),
                               rtol=3e-2, atol=3e-2)
    assert y.shape == (N, 1, base, base) and x_acc.shape == (N, c_low, base, base)

    print("KERNEL_OK")
</pallas_src>

<mosaic_0001>
module attributes {stable_mosaic.version = 11 : i64} {
  func.func @kernel(%arg0: i32, %arg1: memref<1x32x26xbf16, #tpu.memory_space<vmem>>, %arg2: memref<1x16x50xbf16, #tpu.memory_space<vmem>>, %arg3: memref<1x8x122xbf16, #tpu.memory_space<vmem>>, %arg4: memref<1x4x290xbf16, #tpu.memory_space<vmem>>, %arg5: memref<9x4x32xbf16, #tpu.memory_space<vmem>>, %arg6: memref<9x4x16xbf16, #tpu.memory_space<vmem>>, %arg7: memref<9x4x8xbf16, #tpu.memory_space<vmem>>, %arg8: memref<9x4x4xbf16, #tpu.memory_space<vmem>>, %arg9: memref<16x256xbf16, #tpu.memory_space<vmem>>, %arg10: memref<36x256xbf16, #tpu.memory_space<vmem>>, %arg11: memref<100x256xbf16, #tpu.memory_space<vmem>>, %arg12: memref<9x1x256xf32, #tpu.memory_space<vmem>>, %arg13: memref<9x1x4xbf16, #tpu.memory_space<vmem>>, %arg14: memref<4x1xf32, #tpu.memory_space<vmem>>, %arg15: memref<1x1xf32, #tpu.memory_space<vmem>>, %arg16: memref<1x4x256xf32, #tpu.memory_space<vmem>>, %arg17: memref<1x1x256xf32, #tpu.memory_space<vmem>>, %arg18: memref<4x290xbf16, #tpu.memory_space<vmem>>) attributes {dimension_semantics = [#tpu.dimension_semantics<parallel>], iteration_bounds = array<i64: 2>, scalar_prefetch = 0 : i64, scratch_operands = 1 : i64, tpu.core_type = #tpu.core_type<tc>, window_params = [{transform_indices = @transform_0, window_bounds = array<i64: 1, 32, 26>}, {transform_indices = @transform_1, window_bounds = array<i64: 1, 16, 50>}, {transform_indices = @transform_2, window_bounds = array<i64: 1, 8, 122>}, {transform_indices = @transform_3, window_bounds = array<i64: 1, 4, 290>}, {pipeline_mode = #tpu.pipeline_mode<synchronous>, transform_indices = @transform_4, window_bounds = array<i64: 9, 4, 32>}, {pipeline_mode = #tpu.pipeline_mode<synchronous>, transform_indices = @transform_5, window_bounds = array<i64: 9, 4, 16>}, {pipeline_mode = #tpu.pipeline_mode<synchronous>, transform_indices = @transform_6, window_bounds = array<i64: 9, 4, 8>}, {pipeline_mode = #tpu.pipeline_mode<synchronous>, transform_indices = @transform_7, window_bounds = array<i64: 9, 4, 4>}, {pipeline_mode = #tpu.pipeline_mode<synchronous>, transform_indices = @transform_8, window_bounds = array<i64: 16, 256>}, {pipeline_mode = #tpu.pipeline_mode<synchronous>, transform_indices = @transform_9, window_bounds = array<i64: 36, 256>}, {pipeline_mode = #tpu.pipeline_mode<synchronous>, transform_indices = @transform_10, window_bounds = array<i64: 100, 256>}, {pipeline_mode = #tpu.pipeline_mode<synchronous>, transform_indices = @transform_11, window_bounds = array<i64: 9, 1, 256>}, {pipeline_mode = #tpu.pipeline_mode<synchronous>, transform_indices = @transform_12, window_bounds = array<i64: 9, 1, 4>}, {pipeline_mode = #tpu.pipeline_mode<synchronous>, transform_indices = @transform_13, window_bounds = array<i64: 4, 1>}, {pipeline_mode = #tpu.pipeline_mode<synchronous>, transform_indices = @transform_14, window_bounds = array<i64: 1, 1>}, {transform_indices = @transform_15, window_bounds = array<i64: 1, 4, 256>}, {transform_indices = @transform_16, window_bounds = array<i64: 1, 1, 256>}]} {
    %c0 = arith.constant 0 : index
    %c0_0 = arith.constant 0 : index
    %c0_1 = arith.constant 0 : index
    %0 = vector.load %arg1[%c0, %c0_0, %c0_1] : memref<1x32x26xbf16, #tpu.memory_space<vmem>>, vector<1x32x16xbf16>
    %1 = vector.shape_cast %0 : vector<1x32x16xbf16> to vector<32x16xbf16>
    %c0_2 = arith.constant 0 : index
    %c0_3 = arith.constant 0 : index
    %c0_4 = arith.constant 0 : index
    %2 = vector.load %arg5[%c0_2, %c0_3, %c0_4] : memref<9x4x32xbf16, #tpu.memory_space<vmem>>, vector<1x4x32xbf16>
    %3 = vector.shape_cast %2 : vector<1x4x32xbf16> to vector<4x32xbf16>
    %cst = arith.constant dense<0.000000e+00> : vector<4x16xf32>
    %4 = tpu.matmul %3, %1, %cst {dimension_numbers = #tpu.dot_dimension_numbers<[1], [0], [0], [1], [0, 0, 1, 1], [], []>} : vector<4x32xbf16>, vector<32x16xbf16>, vector<4x16xf32> -> vector<4x16xf32>
    %c0_5 = arith.constant 0 : index
    %c0_6 = arith.constant 0 : index
    %c1 = arith.constant 1 : index
    %5 = vector.load %arg1[%c0_5, %c0_6, %c1] : memref<1x32x26xbf16, #tpu.memory_space<vmem>>, vector<1x32x16xbf16>
    %6 = vector.shape_cast %5 : vector<1x32x16xbf16> to vector<32x16xbf16>
    %c1_7 = arith.constant 1 : index
    %c0_8 = arith.constant 0 : index
    %c0_9 = arith.constant 0 : index
    %7 = vector.load %arg5[%c1_7, %c0_8, %c0_9] : memref<9x4x32xbf16, #tpu.memory_space<vmem>>, vector<1x4x32xbf16>
    %8 = vector.shape_cast %7 : vector<1x4x32xbf16> to vector<4x32xbf16>
    %cst_10 = arith.constant dense<0.000000e+00> : vector<4x16xf32>
    %9 = tpu.matmul %8, %6, %cst_10 {dimension_numbers = #tpu.dot_dimension_numbers<[1], [0], [0], [1], [0, 0, 1, 1], [], []>} : vector<4x32xbf16>, vector<32x16xbf16>, vector<4x16xf32> -> vector<4x16xf32>
    %10 = arith.addf %4, %9 : vector<4x16xf32>
    %c0_11 = arith.constant 0 : index
    %c0_12 = arith.constant 0 : index
    %c2 = arith.constant 2 : index
    %11 = vector.load %arg1[%c0_11, %c0_12, %c2] : memref<1x32x26xbf16, #tpu.memory_space<vmem>>, vector<1x32x16xbf16>
    %12 = vector.shape_cast %11 : vector<1x32x16xbf16> to vector<32x16xbf16>
    %c2_13 = arith.constant 2 : index
    %c0_14 = arith.constant 0 : index
    %c0_15 = arith.constant 0 : index
    %13 = vector.load %arg5[%c2_13, %c0_14, %c0_15] : memref<9x4x32xbf16, #tpu.memory_space<vmem>>, vector<1x4x32xbf16>
    %14 = vector.shape_cast %13 : vector<1x4x32xbf16> to vector<4x32xbf16>
    %cst_16 = arith.constant dense<0.000000e+00> : vector<4x16xf32>
    %15 = tpu.matmul %14, %12, %cst_16 {dimension_numbers = #tpu.dot_dimension_numbers<[1], [0], [0], [1], [0, 0, 1, 1], [], []>} : vector<4x32xbf16>, vector<32x16xbf16>, vector<4x16xf32> -> vector<4x16xf32>
    %16 = arith.addf %10, %15 : vector<4x16xf32>
    %c0_17 = arith.constant 0 : index
    %c0_18 = arith.constant 0 : index
    %c4 = arith.constant 4 : index
    %17 = vector.load %arg1[%c0_17, %c0_18, %c4] : memref<1x32x26xbf16, #tpu.memory_space<vmem>>, vector<1x32x16xbf16>
    %18 = vector.shape_cast %17 : vector<1x32x16xbf16> to vector<32x16xbf16>
    %c3 = arith.constant 3 : index
    %c0_19 = arith.constant 0 : index
    %c0_20 = arith.constant 0 : index
    %19 = vector.load %arg5[%c3, %c0_19, %c0_20] : memref<9x4x32xbf16, #tpu.memory_space<vmem>>, vector<1x4x32xbf16>
    %20 = vector.shape_cast %19 : vector<1x4x32xbf16> to vector<4x32xbf16>
    %cst_21 = arith.constant dense<0.000000e+00> : vector<4x16xf32>
    %21 = tpu.matmul %20, %18, %cst_21 {dimension_numbers = #tpu.dot_dimension_numbers<[1], [0], [0], [1], [0, 0, 1, 1], [], []>} : vector<4x32xbf16>, vector<32x16xbf16>, vector<4x16xf32> -> vector<4x16xf32>
    %22 = arith.addf %16, %21 : vector<4x16xf32>
    %c0_22 = arith.constant 0 : index
    %c0_23 = arith.constant 0 : index
    %c5 = arith.constant 5 : index
    %23 = vector.load %arg1[%c0_22, %c0_23, %c5] : memref<1x32x26xbf16, #tpu.memory_space<vmem>>, vector<1x32x16xbf16>
    %24 = vector.shape_cast %23 : vector<1x32x16xbf16> to vector<32x16xbf16>
    %c4_24 = arith.constant 4 : index
    %c0_25 = arith.constant 0 : index
    %c0_26 = arith.constant 0 : index
    %25 = vector.load %arg5[%c4_24, %c0_25, %c0_26] : memref<9x4x32xbf16, #tpu.memory_space<vmem>>, vector<1x4x32xbf16>
    %26 = vector.shape_cast %25 : vector<1x4x32xbf16> to vector<4x32xbf16>
    %cst_27 = arith.constant dense<0.000000e+00> : vector<4x16xf32>
    %27 = tpu.matmul %26, %24, %cst_27 {dimension_numbers = #tpu.dot_dimension_numbers<[1], [0], [0], [1], [0, 0, 1, 1], [], []>} : vector<4x32xbf16>, vector<32x16xbf16>, vector<4x16xf32> -> vector<4x16xf32>
    %28 = arith.addf %22, %27 : vector<4x16xf32>
    %c0_28 = arith.constant 0 : index
    %c0_29 = arith.constant 0 : index
    %c6 = arith.constant 6 : index
    %29 = vector.load %arg1[%c0_28, %c0_29, %c6] : memref<1x32x26xbf16, #tpu.memory_space<vmem>>, vector<1x32x16xbf16>
    %30 = vector.shape_cast %29 : vector<1x32x16xbf16> to vector<32x16xbf16>
    %c5_30 = arith.constant 5 : index
    %c0_31 = arith.constant 0 : index
    %c0_32 = arith.constant 0 : index
    %31 = vector.load %arg5[%c5_30, %c0_31, %c0_32] : memref<9x4x32xbf16, #tpu.memory_space<vmem>>, vector<1x4x32xbf16>
    %32 = vector.shape_cast %31 : vector<1x4x32xbf16> to vector<4x32xbf16>
    %cst_33 = arith.constant dense<0.000000e+00> : vector<4x16xf32>
    %33 = tpu.matmul %32, %30, %cst_33 {dimension_numbers = #tpu.dot_dimension_numbers<[1], [0], [0], [1], [0, 0, 1, 1], [], []>} : vector<4x32xbf16>, vector<32x16xbf16>, vector<4x16xf32> -> vector<4x16xf32>
    %34 = arith.addf %28, %33 : vector<4x16xf32>
    %c0_34 = arith.constant 0 : index
    %c0_35 = arith.constant 0 : index
    %c8 = arith.constant 8 : index
    %35 = vector.load %arg1[%c0_34, %c0_35, %c8] : memref<1x32x26xbf16, #tpu.memory_space<vmem>>, vector<1x32x16xbf16>
    %36 = vector.shape_cast %35 : vector<1x32x16xbf16> to vector<32x16xbf16>
    %c6_36 = arith.constant 6 : index
    %c0_37 = arith.constant 0 : index
    %c0_38 = arith.constant 0 : index
    %37 = vector.load %arg5[%c6_36, %c0_37, %c0_38] : memref<9x4x32xbf16, #tpu.memory_space<vmem>>, vector<1x4x32xbf16>
    %38 = vector.shape_cast %37 : vector<1x4x32xbf16> to vector<4x32xbf16>
    %cst_39 = arith.constant dense<0.000000e+00> : vector<4x16xf32>
    %39 = tpu.matmul %38, %36, %cst_39 {dimension_numbers = #tpu.dot_dimension_numbers<[1], [0], [0], [1], [0, 0, 1, 1], [], []>} : vector<4x32xbf16>, vector<32x16xbf16>, vector<4x16xf32> -> vector<4x16xf32>
    %40 = arith.addf %34, %39 : vector<4x16xf32>
    %c0_40 = arith.constant 0 : index
    %c0_41 = arith.constant 0 : index
    %c9 = arith.constant 9 : index
    %41 = vector.load %arg1[%c0_40, %c0_41, %c9] : memref<1x32x26xbf16, #tpu.memory_space<vmem>>, vector<1x32x16xbf16>
    %42 = vector.shape_cast %41 : vector<1x32x16xbf16> to vector<32x16xbf16>
    %c7 = arith.constant 7 : index
    %c0_42 = arith.constant 0 : index
    %c0_43 = arith.constant 0 : index
    %43 = vector.load %arg5[%c7, %c0_42, %c0_43] : memref<9x4x32xbf16, #tpu.memory_space<vmem>>, vector<1x4x32xbf16>
    %44 = vector.shape_cast %43 : vector<1x4x32xbf16> to vector<4x32xbf16>
    %cst_44 = arith.constant dense<0.000000e+00> : vector<4x16xf32>
    %45 = tpu.matmul %44, %42, %cst_44 {dimension_numbers = #tpu.dot_dimension_numbers<[1], [0], [0], [1], [0, 0, 1, 1], [], []>} : vector<4x32xbf16>, vector<32x16xbf16>, vector<4x16xf32> -> vector<4x16xf32>
    %46 = arith.addf %40, %45 : vector<4x16xf32>
    %c0_45 = arith.constant 0 : index
    %c0_46 = arith.constant 0 : index
    %c10 = arith.constant 10 : index
    %47 = vector.load %arg1[%c0_45, %c0_46, %c10] : memref<1x32x26xbf16, #tpu.memory_space<vmem>>, vector<1x32x16xbf16>
    %48 = vector.shape_cast %47 : vector<1x32x16xbf16> to vector<32x16xbf16>
    %c8_47 = arith.constant 8 : index
    %c0_48 = arith.constant 0 : index
    %c0_49 = arith.constant 0 : index
    %49 = vector.load %arg5[%c8_47, %c0_48, %c0_49] : memref<9x4x32xbf16, #tpu.memory_space<vmem>>, vector<1x4x32xbf16>
    %50 = vector.shape_cast %49 : vector<1x4x32xbf16> to vector<4x32xbf16>
    %cst_50 = arith.constant dense<0.000000e+00> : vector<4x16xf32>
    %51 = tpu.matmul %50, %48, %cst_50 {dimension_numbers = #tpu.dot_dimension_numbers<[1], [0], [0], [1], [0, 0, 1, 1], [], []>} : vector<4x32xbf16>, vector<32x16xbf16>, vector<4x16xf32> -> vector<4x16xf32>
    %52 = arith.addf %46, %51 : vector<4x16xf32>
    %53 = arith.truncf %52 : vector<4x16xf32> to vector<4x16xbf16>
    %c0_51 = arith.constant 0 : index
    %c0_52 = arith.constant 0 : index
    %54 = vector.load %arg9[%c0_51, %c0_52] : memref<16x256xbf16, #tpu.memory_space<vmem>>, vector<16x256xbf16>
    %cst_53 = arith.constant dense<0.000000e+00> : vector<4x256xf32>
    %55 = tpu.matmul %53, %54, %cst_53 {dimension_numbers = #tpu.dot_dimension_numbers<[1], [0], [0], [1], [0, 0, 1, 1], [], []>} : vector<4x16xbf16>, vector<16x256xbf16>, vector<4x256xf32> -> vector<4x256xf32>
    %c0_54 = arith.constant 0 : index
    %c0_55 = arith.constant 0 : index
    %c0_56 = arith.constant 0 : index
    %56 = vector.load %arg2[%c0_54, %c0_55, %c0_56] : memref<1x16x50xbf16, #tpu.memory_space<vmem>>, vector<1x16x36xbf16>
    %57 = vector.shape_cast %56 : vector<1x16x36xbf16> to vector<16x36xbf16>
    %c0_57 = arith.constant 0 : index
    %c0_58 = arith.constant 0 : index
    %c0_59 = arith.constant 0 : index
    %58 = vector.load %arg6[%c0_57, %c0_58, %c0_59] : memref<9x4x16xbf16, #tpu.memory_space<vmem>>, vector<1x4x16xbf16>
    %59 = vector.shape_cast %58 : vector<1x4x16xbf16> to vector<4x16xbf16>
    %cst_60 = arith.constant dense<0.000000e+00> : vector<4x36xf32>
    %60 = tpu.matmul %59, %57, %cst_60 {dimension_numbers = #tpu.dot_dimension_numbers<[1], [0], [0], [1], [0, 0, 1, 1], [], []>} : vector<4x16xbf16>, vector<16x36xbf16>, vector<4x36xf32> -> vector<4x36xf32>
    %c0_61 = arith.constant 0 : index
    %c0_62 = arith.constant 0 : index
    %c1_63 = arith.constant 1 : index
    %61 = vector.load %arg2[%c0_61, %c0_62, %c1_63] : memref<1x16x50xbf16, #tpu.memory_space<vmem>>, vector<1x16x36xbf16>
    %62 = vector.shape_cast %61 : vector<1x16x36xbf16> to vector<16x36xbf16>
    %c1_64 = arith.constant 1 : index
    %c0_65 = arith.constant 0 : index
    %c0_66 = arith.constant 0 : index
    %63 = vector.load %arg6[%c1_64, %c0_65, %c0_66] : memref<9x4x16xbf16, #tpu.memory_space<vmem>>, vector<1x4x16xbf16>
    %64 = vector.shape_cast %63 : vector<1x4x16xbf16> to vector<4x16xbf16>
    %cst_67 = arith.constant dense<0.000000e+00> : vector<4x36xf32>
    %65 = tpu.matmul %64, %62, %cst_67 {dimension_numbers = #tpu.dot_dimension_numbers<[1], [0], [0], [1], [0, 0, 1, 1], [], []>} : vector<4x16xbf16>, vector<16x36xbf16>, vector<4x36xf32> -> vector<4x36xf32>
    %66 = arith.addf %60, %65 : vector<4x36xf32>
    %c0_68 = arith.constant 0 : index
    %c0_69 = arith.constant 0 : index
    %c2_70 = arith.constant 2 : index
    %67 = vector.load %arg2[%c0_68, %c0_69, %c2_70] : memref<1x16x50xbf16, #tpu.memory_space<vmem>>, vector<1x16x36xbf16>
    %68 = vector.shape_cast %67 : vector<1x16x36xbf16> to vector<16x36xbf16>
    %c2_71 = arith.constant 2 : index
    %c0_72 = arith.constant 0 : index
    %c0_73 = arith.constant 0 : index
    %69 = vector.load %arg6[%c2_71, %c0_72, %c0_73] : memref<9x4x16xbf16, #tpu.memory_space<vmem>>, vector<1x4x16xbf16>
    %70 = vector.shape_cast %69 : vector<1x4x16xbf16> to vector<4x16xbf16>
    %cst_74 = arith.constant dense<0.000000e+00> : vector<4x36xf32>
    %71 = tpu.matmul %70, %68, %cst_74 {dimension_numbers = #tpu.dot_dimension_numbers<[1], [0], [0], [1], [0, 0, 1, 1], [], []>} : vector<4x16xbf16>, vector<16x36xbf16>, vector<4x36xf32> -> vector<4x36xf32>
    %72 = arith.addf %66, %71 : vector<4x36xf32>
    %c0_75 = arith.constant 0 : index
    %c0_76 = arith.constant 0 : index
    %c6_77 = arith.constant 6 : index
    %73 = vector.load %arg2[%c0_75, %c0_76, %c6_77] : memref<1x16x50xbf16, #tpu.memory_space<vmem>>, vector<1x16x36xbf16>
    %74 = vector.shape_cast %73 : vector<1x16x36xbf16> to vector<16x36xbf16>
    %c3_78 = arith.constant 3 : index
    %c0_79 = arith.constant 0 : index
    %c0_80 = arith.constant 0 : index
    %75 = vector.load %arg6[%c3_78, %c0_79, %c0_80] : memref<9x4x16xbf16, #tpu.memory_space<vmem>>, vector<1x4x16xbf16>
    %76 = vector.shape_cast %75 : vector<1x4x16xbf16> to vector<4x16xbf16>
    %cst_81 = arith.constant dense<0.000000e+00> : vector<4x36xf32>
    %77 = tpu.matmul %76, %74, %cst_81 {dimension_numbers = #tpu.dot_dimension_numbers<[1], [0], [0], [1], [0, 0, 1, 1], [], []>} : vector<4x16xbf16>, vector<16x36xbf16>, vector<4x36xf32> -> vector<4x36xf32>
    %78 = arith.addf %72, %77 : vector<4x36xf32>
    %c0_82 = arith.constant 0 : index
    %c0_83 = arith.constant 0 : index
    %c7_84 = arith.constant 7 : index
    %79 = vector.load %arg2[%c0_82, %c0_83, %c7_84] : memref<1x16x50xbf16, #tpu.memory_space<vmem>>, vector<1x16x36xbf16>
    %80 = vector.shape_cast %79 : vector<1x16x36xbf16> to vector<16x36xbf16>
    %c4_85 = arith.constant 4 : index
    %c0_86 = arith.constant 0 : index
    %c0_87 = arith.constant 0 : index
    %81 = vector.load %arg6[%c4_85, %c0_86, %c0_87] : memref<9x4x16xbf16, #tpu.memory_space<vmem>>, vector<1x4x16xbf16>
    %82 = vector.shape_cast %81 : vector<1x4x16xbf16> to vector<4x16xbf16>
    %cst_88 = arith.constant dense<0.000000e+00> : vector<4x36xf32>
    %83 = tpu.matmul %82, %80, %cst_88 {dimension_numbers = #tpu.dot_dimension_numbers<[1], [0], [0], [1], [0, 0, 1, 1], [], []>} : vector<4x16xbf16>, vector<16x36xbf16>, vector<4x36xf32> -> vector<4x36xf32>
    %84 = arith.addf %78, %83 : vector<4x36xf32>
    %c0_89 = arith.constant 0 : index
    %c0_90 = arith.constant 0 : index
    %c8_91 = arith.constant 8 : index
    %85 = vector.load %arg2[%c0_89, %c0_90, %c8_91] : memref<1x16x50xbf16, #tpu.memory_space<vmem>>, vector<1x16x36xbf16>
    %86 = vector.shape_cast %85 : vector<1x16x36xbf16> to vector<16x36xbf16>
    %c5_92 = arith.constant 5 : index
    %c0_93 = arith.constant 0 : index
    %c0_94 = arith.constant 0 : index
    %87 = vector.load %arg6[%c5_92, %c0_93, %c0_94] : memref<9x4x16xbf16, #tpu.memory_space<vmem>>, vector<1x4x16xbf16>
    %88 = vector.shape_cast %87 : vector<1x4x16xbf16> to vector<4x16xbf16>
    %cst_95 = arith.constant dense<0.000000e+00> : vector<4x36xf32>
    %89 = tpu.matmul %88, %86, %cst_95 {dimension_numbers = #tpu.dot_dimension_numbers<[1], [0], [0], [1], [0, 0, 1, 1], [], []>} : vector<4x16xbf16>, vector<16x36xbf16>, vector<4x36xf32> -> vector<4x36xf32>
    %90 = arith.addf %84, %89 : vector<4x36xf32>
    %c0_96 = arith.constant 0 : index
    %c0_97 = arith.constant 0 : index
    %c12 = arith.constant 12 : index
    %91 = vector.load %arg2[%c0_96, %c0_97, %c12] : memref<1x16x50xbf16, #tpu.memory_space<vmem>>, vector<1x16x36xbf16>
    %92 = vector.shape_cast %91 : vector<1x16x36xbf16> to vector<16x36xbf16>
    %c6_98 = arith.constant 6 : index
    %c0_99 = arith.constant 0 : index
    %c0_100 = arith.constant 0 : index
    %93 = vector.load %arg6[%c6_98, %c0_99, %c0_100] : memref<9x4x16xbf16, #tpu.memory_space<vmem>>, vector<1x4x16xbf16>
    %94 = vector.shape_cast %93 : vector<1x4x16xbf16> to vector<4x16xbf16>
    %cst_101 = arith.constant dense<0.000000e+00> : vector<4x36xf32>
    %95 = tpu.matmul %94, %92, %cst_101 {dimension_numbers = #tpu.dot_dimension_numbers<[1], [0], [0], [1], [0, 0, 1, 1], [], []>} : vector<4x16xbf16>, vector<16x36xbf16>, vector<4x36xf32> -> vector<4x36xf32>
    %96 = arith.addf %90, %95 : vector<4x36xf32>
    %c0_102 = arith.constant 0 : index
    %c0_103 = arith.constant 0 : index
    %c13 = arith.constant 13 : index
    %97 = vector.load %arg2[%c0_102, %c0_103, %c13] : memref<1x16x50xbf16, #tpu.memory_space<vmem>>, vector<1x16x36xbf16>
    %98 = vector.shape_cast %97 : vector<1x16x36xbf16> to vector<16x36xbf16>
    %c7_104 = arith.constant 7 : index
    %c0_105 = arith.constant 0 : index
    %c0_106 = arith.constant 0 : index
    %99 = vector.load %arg6[%c7_104, %c0_105, %c0_106] : memref<9x4x16xbf16, #tpu.memory_space<vmem>>, vector<1x4x16xbf16>
    %100 = vector.shape_cast %99 : vector<1x4x16xbf16> to vector<4x16xbf16>
    %cst_107 = arith.constant dense<0.000000e+00> : vector<4x36xf32>
    %101 = tpu.matmul %100, %98, %cst_107 {dimension_numbers = #tpu.dot_dimension_numbers<[1], [0], [0], [1], [0, 0, 1, 1], [], []>} : vector<4x16xbf16>, vector<16x36xbf16>, vector<4x36xf32> -> vector<4x36xf32>
    %102 = arith.addf %96, %101 : vector<4x36xf32>
    %c0_108 = arith.constant 0 : index
    %c0_109 = arith.constant 0 : index
    %c14 = arith.constant 14 : index
    %103 = vector.load %arg2[%c0_108, %c0_109, %c14] : memref<1x16x50xbf16, #tpu.memory_space<vmem>>, vector<1x16x36xbf16>
    %104 = vector.shape_cast %103 : vector<1x16x36xbf16> to vector<16x36xbf16>
    %c8_110 = arith.constant 8 : index
    %c0_111 = arith.constant 0 : index
    %c0_112 = arith.constant 0 : index
    %105 = vector.load %arg6[%c8_110, %c0_111, %c0_112] : memref<9x4x16xbf16, #tpu.memory_space<vmem>>, vector<1x4x16xbf16>
    %106 = vector.shape_cast %105 : vector<1x4x16xbf16> to vector<4x16xbf16>
    %cst_113 = arith.constant dense<0.000000e+00> : vector<4x36xf32>
    %107 = tpu.matmul %106, %104, %cst_113 {dimension_numbers = #tpu.dot_dimension_numbers<[1], [0], [0], [1], [0, 0, 1, 1], [], []>} : vector<4x16xbf16>, vector<16x36xbf16>, vector<4x36xf32> -> vector<4x36xf32>
    %108 = arith.addf %102, %107 : vector<4x36xf32>
    %109 = arith.truncf %108 : vector<4x36xf32> to vector<4x36xbf16>
    %c0_114 = arith.constant 0 : index
    %c0_115 = arith.constant 0 : index
    %110 = vector.load %arg10[%c0_114, %c0_115] : memref<36x256xbf16, #tpu.memory_space<vmem>>, vector<36x256xbf16>
    %cst_116 = arith.constant dense<0.000000e+00> : vector<4x256xf32>
    %111 = tpu.matmul %109, %110, %cst_116 {dimension_numbers = #tpu.dot_dimension_numbers<[1], [0], [0], [1], [0, 0, 1, 1], [], []>} : vector<4x36xbf16>, vector<36x256xbf16>, vector<4x256xf32> -> vector<4x256xf32>
    %112 = arith.addf %55, %111 : vector<4x256xf32>
    %c0_117 = arith.constant 0 : index
    %c0_118 = arith.constant 0 : index
    %c0_119 = arith.constant 0 : index
    %113 = vector.load %arg3[%c0_117, %c0_118, %c0_119] : memref<1x8x122xbf16, #tpu.memory_space<vmem>>, vector<1x8x100xbf16>
    %114 = vector.shape_cast %113 : vector<1x8x100xbf16> to vector<8x100xbf16>
    %c0_120 = arith.constant 0 : index
    %c0_121 = arith.constant 0 : index
    %c0_122 = arith.constant 0 : index
    %115 = vector.load %arg7[%c0_120, %c0_121, %c0_122] : memref<9x4x8xbf16, #tpu.memory_space<vmem>>, vector<1x4x8xbf16>
    %116 = vector.shape_cast %115 : vector<1x4x8xbf16> to vector<4x8xbf16>
    %cst_123 = arith.constant dense<0.000000e+00> : vector<4x100xf32>
    %117 = tpu.matmul %116, %114, %cst_123 {dimension_numbers = #tpu.dot_dimension_numbers<[1], [0], [0], [1], [0, 0, 1, 1], [], []>} : vector<4x8xbf16>, vector<8x100xbf16>, vector<4x100xf32> -> vector<4x100xf32>
    %c0_124 = arith.constant 0 : index
    %c0_125 = arith.constant 0 : index
    %c1_126 = arith.constant 1 : index
    %118 = vector.load %arg3[%c0_124, %c0_125, %c1_126] : memref<1x8x122xbf16, #tpu.memory_space<vmem>>, vector<1x8x100xbf16>
    %119 = vector.shape_cast %118 : vector<1x8x100xbf16> to vector<8x100xbf16>
    %c1_127 = arith.constant 1 : index
    %c0_128 = arith.constant 0 : index
    %c0_129 = arith.constant 0 : index
    %120 = vector.load %arg7[%c1_127, %c0_128, %c0_129] : memref<9x4x8xbf16, #tpu.memory_space<vmem>>, vector<1x4x8xbf16>
    %121 = vector.shape_cast %120 : vector<1x4x8xbf16> to vector<4x8xbf16>
    %cst_130 = arith.constant dense<0.000000e+00> : vector<4x100xf32>
    %122 = tpu.matmul %121, %119, %cst_130 {dimension_numbers = #tpu.dot_dimension_numbers<[1], [0], [0], [1], [0, 0, 1, 1], [], []>} : vector<4x8xbf16>, vector<8x100xbf16>, vector<4x100xf32> -> vector<4x100xf32>
    %123 = arith.addf %117, %122 : vector<4x100xf32>
    %c0_131 = arith.constant 0 : index
    %c0_132 = arith.constant 0 : index
    %c2_133 = arith.constant 2 : index
    %124 = vector.load %arg3[%c0_131, %c0_132, %c2_133] : memref<1x8x122xbf16, #tpu.memory_space<vmem>>, vector<1x8x100xbf16>
    %125 = vector.shape_cast %124 : vector<1x8x100xbf16> to vector<8x100xbf16>
    %c2_134 = arith.constant 2 : index
    %c0_135 = arith.constant 0 : index
    %c0_136 = arith.constant 0 : index
    %126 = vector.load %arg7[%c2_134, %c0_135, %c0_136] : memref<9x4x8xbf16, #tpu.memory_space<vmem>>, vector<1x4x8xbf16>
    %127 = vector.shape_cast %126 : vector<1x4x8xbf16> to vector<4x8xbf16>
    %cst_137 = arith.constant dense<0.000000e+00> : vector<4x100xf32>
    %128 = tpu.matmul %127, %125, %cst_137 {dimension_numbers = #tpu.dot_dimension_numbers<[1], [0], [0], [1], [0, 0, 1, 1], [], []>} : vector<4x8xbf16>, vector<8x100xbf16>, vector<4x100xf32> -> vector<4x100xf32>
    %129 = arith.addf %123, %128 : vector<4x100xf32>
    %c0_138 = arith.constant 0 : index
    %c0_139 = arith.constant 0 : index
    %c10_140 = arith.constant 10 : index
    %130 = vector.load %arg3[%c0_138, %c0_139, %c10_140] : memref<1x8x122xbf16, #tpu.memory_space<vmem>>, vector<1x8x100xbf16>
    %131 = vector.shape_cast %130 : vector<1x8x100xbf16> to vector<8x100xbf16>
    %c3_141 = arith.constant 3 : index
    %c0_142 = arith.constant 0 : index
    %c0_143 = arith.constant 0 : index
    %132 = vector.load %arg7[%c3_141, %c0_142, %c0_143] : memref<9x4x8xbf16, #tpu.memory_space<vmem>>, vector<1x4x8xbf16>
    %133 = vector.shape_cast %132 : vector<1x4x8xbf16> to vector<4x8xbf16>
    %cst_144 = arith.constant dense<0.000000e+00> : vector<4x100xf32>
    %134 = tpu.matmul %133, %131, %cst_144 {dimension_numbers = #tpu.dot_dimension_numbers<[1], [0], [0], [1], [0, 0, 1, 1], [], []>} : vector<4x8xbf16>, vector<8x100xbf16>, vector<4x100xf32> -> vector<4x100xf32>
    %135 = arith.addf %129, %134 : vector<4x100xf32>
    %c0_145 = arith.constant 0 : index
    %c0_146 = arith.constant 0 : index
    %c11 = arith.constant 11 : index
    %136 = vector.load %arg3[%c0_145, %c0_146, %c11] : memref<1x8x122xbf16, #tpu.memory_space<vmem>>, vector<1x8x100xbf16>
    %137 = vector.shape_cast %136 : vector<1x8x100xbf16> to vector<8x100xbf16>
    %c4_147 = arith.constant 4 : index
    %c0_148 = arith.constant 0 : index
    %c0_149 = arith.constant 0 : index
    %138 = vector.load %arg7[%c4_147, %c0_148, %c0_149] : memref<9x4x8xbf16, #tpu.memory_space<vmem>>, vector<1x4x8xbf16>
    %139 = vector.shape_cast %138 : vector<1x4x8xbf16> to vector<4x8xbf16>
    %cst_150 = arith.constant dense<0.000000e+00> : vector<4x100xf32>
    %140 = tpu.matmul %139, %137, %cst_150 {dimension_numbers = #tpu.dot_dimension_numbers<[1], [0], [0], [1], [0, 0, 1, 1], [], []>} : vector<4x8xbf16>, vector<8x100xbf16>, vector<4x100xf32> -> vector<4x100xf32>
    %141 = arith.addf %135, %140 : vector<4x100xf32>
    %c0_151 = arith.constant 0 : index
    %c0_152 = arith.constant 0 : index
    %c12_153 = arith.constant 12 : index
    %142 = vector.load %arg3[%c0_151, %c0_152, %c12_153] : memref<1x8x122xbf16, #tpu.memory_space<vmem>>, vector<1x8x100xbf16>
    %143 = vector.shape_cast %142 : vector<1x8x100xbf16> to vector<8x100xbf16>
    %c5_154 = arith.constant 5 : index
    %c0_155 = arith.constant 0 : index
    %c0_156 = arith.constant 0 : index
    %144 = vector.load %arg7[%c5_154, %c0_155, %c0_156] : memref<9x4x8xbf16, #tpu.memory_space<vmem>>, vector<1x4x8xbf16>
    %145 = vector.shape_cast %144 : vector<1x4x8xbf16> to vector<4x8xbf16>
    %cst_157 = arith.constant dense<0.000000e+00> : vector<4x100xf32>
    %146 = tpu.matmul %145, %143, %cst_157 {dimension_numbers = #tpu.dot_dimension_numbers<[1], [0], [0], [1], [0, 0, 1, 1], [], []>} : vector<4x8xbf16>, vector<8x100xbf16>, vector<4x100xf32> -> vector<4x100xf32>
    %147 = arith.addf %141, %146 : vector<4x100xf32>
    %c0_158 = arith.constant 0 : index
    %c0_159 = arith.constant 0 : index
    %c20 = arith.constant 20 : index
    %148 = vector.load %arg3[%c0_158, %c0_159, %c20] : memref<1x8x122xbf16, #tpu.memory_space<vmem>>, vector<1x8x100xbf16>
    %149 = vector.shape_cast %148 : vector<1x8x100xbf16> to vector<8x100xbf16>
    %c6_160 = arith.constant 6 : index
    %c0_161 = arith.constant 0 : index
    %c0_162 = arith.constant 0 : index
    %150 = vector.load %arg7[%c6_160, %c0_161, %c0_162] : memref<9x4x8xbf16, #tpu.memory_space<vmem>>, vector<1x4x8xbf16>
    %151 = vector.shape_cast %150 : vector<1x4x8xbf16> to vector<4x8xbf16>
    %cst_163 = arith.constant dense<0.000000e+00> : vector<4x100xf32>
    %152 = tpu.matmul %151, %149, %cst_163 {dimension_numbers = #tpu.dot_dimension_numbers<[1], [0], [0], [1], [0, 0, 1, 1], [], []>} : vector<4x8xbf16>, vector<8x100xbf16>, vector<4x100xf32> -> vector<4x100xf32>
    %153 = arith.addf %147, %152 : vector<4x100xf32>
    %c0_164 = arith.constant 0 : index
    %c0_165 = arith.constant 0 : index
    %c21 = arith.constant 21 : index
    %154 = vector.load %arg3[%c0_164, %c0_165, %c21] : memref<1x8x122xbf16, #tpu.memory_space<vmem>>, vector<1x8x100xbf16>
    %155 = vector.shape_cast %154 : vector<1x8x100xbf16> to vector<8x100xbf16>
    %c7_166 = arith.constant 7 : index
    %c0_167 = arith.constant 0 : index
    %c0_168 = arith.constant 0 : index
    %156 = vector.load %arg7[%c7_166, %c0_167, %c0_168] : memref<9x4x8xbf16, #tpu.memory_space<vmem>>, vector<1x4x8xbf16>
    %157 = vector.shape_cast %156 : vector<1x4x8xbf16> to vector<4x8xbf16>
    %cst_169 = arith.constant dense<0.000000e+00> : vector<4x100xf32>
    %158 = tpu.matmul %157, %155, %cst_169 {dimension_numbers = #tpu.dot_dimension_numbers<[1], [0], [0], [1], [0, 0, 1, 1], [], []>} : vector<4x8xbf16>, vector<8x100xbf16>, vector<4x100xf32> -> vector<4x100xf32>
    %159 = arith.addf %153, %158 : vector<4x100xf32>
    %c0_170 = arith.constant 0 : index
    %c0_171 = arith.constant 0 : index
    %c22 = arith.constant 22 : index
    %160 = vector.load %arg3[%c0_170, %c0_171, %c22] : memref<1x8x122xbf16, #tpu.memory_space<vmem>>, vector<1x8x100xbf16>
    %161 = vector.shape_cast %160 : vector<1x8x100xbf16> to vector<8x100xbf16>
    %c8_172 = arith.constant 8 : index
    %c0_173 = arith.constant 0 : index
    %c0_174 = arith.constant 0 : index
    %162 = vector.load %arg7[%c8_172, %c0_173, %c0_174] : memref<9x4x8xbf16, #tpu.memory_space<vmem>>, vector<1x4x8xbf16>
    %163 = vector.shape_cast %162 : vector<1x4x8xbf16> to vector<4x8xbf16>
    %cst_175 = arith.constant dense<0.000000e+00> : vector<4x100xf32>
    %164 = tpu.matmul %163, %161, %cst_175 {dimension_numbers = #tpu.dot_dimension_numbers<[1], [0], [0], [1], [0, 0, 1, 1], [], []>} : vector<4x8xbf16>, vector<8x100xbf16>, vector<4x100xf32> -> vector<4x100xf32>
    %165 = arith.addf %159, %164 : vector<4x100xf32>
    %166 = arith.truncf %165 : vector<4x100xf32> to vector<4x100xbf16>
    %c0_176 = arith.constant 0 : index
    %c0_177 = arith.constant 0 : index
    %167 = vector.load %arg11[%c0_176, %c0_177] : memref<100x256xbf16, #tpu.memory_space<vmem>>, vector<100x256xbf16>
    %cst_178 = arith.constant dense<0.000000e+00> : vector<4x256xf32>
    %168 = tpu.matmul %166, %167, %cst_178 {dimension_numbers = #tpu.dot_dimension_numbers<[1], [0], [0], [1], [0, 0, 1, 1], [], []>} : vector<4x100xbf16>, vector<100x256xbf16>, vector<4x256xf32> -> vector<4x256xf32>
    %169 = arith.addf %112, %168 : vector<4x256xf32>
    %c0_179 = arith.constant 0 : index
    %c0_180 = arith.constant 0 : index
    %c0_181 = arith.constant 0 : index
    %170 = vector.load %arg4[%c0_179, %c0_180, %c0_181] : memref<1x4x290xbf16, #tpu.memory_space<vmem>>, vector<1x4x256xbf16>
    %171 = vector.shape_cast %170 : vector<1x4x256xbf16> to vector<4x256xbf16>
    %c0_182 = arith.constant 0 : index
    %c0_183 = arith.constant 0 : index
    %c0_184 = arith.constant 0 : index
    %172 = vector.load %arg8[%c0_182, %c0_183, %c0_184] : memref<9x4x4xbf16, #tpu.memory_space<vmem>>, vector<1x4x4xbf16>
    %173 = vector.shape_cast %172 : vector<1x4x4xbf16> to vector<4x4xbf16>
    %cst_185 = arith.constant dense<0.000000e+00> : vector<4x256xf32>
    %174 = tpu.matmul %173, %171, %cst_185 {dimension_numbers = #tpu.dot_dimension_numbers<[1], [0], [0], [1], [0, 0, 1, 1], [], []>} : vector<4x4xbf16>, vector<4x256xbf16>, vector<4x256xf32> -> vector<4x256xf32>
    %c0_186 = arith.constant 0 : index
    %c0_187 = arith.constant 0 : index
    %c0_188 = arith.constant 0 : index
    %175 = vector.load %arg12[%c0_186, %c0_187, %c0_188] : memref<9x1x256xf32, #tpu.memory_space<vmem>>, vector<1x1x256xf32>
    %176 = vector.shape_cast %175 : vector<1x1x256xf32> to vector<1x256xf32>
    %177 = vector.broadcast %176 : vector<1x256xf32> to vector<4x256xf32>
    %178 = arith.mulf %174, %177 : vector<4x256xf32>
    %c0_189 = arith.constant 0 : index
    %c0_190 = arith.constant 0 : index
    %c1_191 = arith.constant 1 : index
    %179 = vector.load %arg4[%c0_189, %c0_190, %c1_191] : memref<1x4x290xbf16, #tpu.memory_space<vmem>>, vector<1x4x256xbf16>
    %180 = vector.shape_cast %179 : vector<1x4x256xbf16> to vector<4x256xbf16>
    %c1_192 = arith.constant 1 : index
    %c0_193 = arith.constant 0 : index
    %c0_194 = arith.constant 0 : index
    %181 = vector.load %arg8[%c1_192, %c0_193, %c0_194] : memref<9x4x4xbf16, #tpu.memory_space<vmem>>, vector<1x4x4xbf16>
    %182 = vector.shape_cast %181 : vector<1x4x4xbf16> to vector<4x4xbf16>
    %cst_195 = arith.constant dense<0.000000e+00> : vector<4x256xf32>
    %183 = tpu.matmul %182, %180, %cst_195 {dimension_numbers = #tpu.dot_dimension_numbers<[1], [0], [0], [1], [0, 0, 1, 1], [], []>} : vector<4x4xbf16>, vector<4x256xbf16>, vector<4x256xf32> -> vector<4x256xf32>
    %c1_196 = arith.constant 1 : index
    %c0_197 = arith.constant 0 : index
    %c0_198 = arith.constant 0 : index
    %184 = vector.load %arg12[%c1_196, %c0_197, %c0_198] : memref<9x1x256xf32, #tpu.memory_space<vmem>>, vector<1x1x256xf32>
    %185 = vector.shape_cast %184 : vector<1x1x256xf32> to vector<1x256xf32>
    %186 = vector.broadcast %185 : vector<1x256xf32> to vector<4x256xf32>
    %187 = arith.mulf %183, %186 : vector<4x256xf32>
    %188 = arith.addf %178, %187 : vector<4x256xf32>
    %c0_199 = arith.constant 0 : index
    %c0_200 = arith.constant 0 : index
    %c2_201 = arith.constant 2 : index
    %189 = vector.load %arg4[%c0_199, %c0_200, %c2_201] : memref<1x4x290xbf16, #tpu.memory_space<vmem>>, vector<1x4x256xbf16>
    %190 = vector.shape_cast %189 : vector<1x4x256xbf16> to vector<4x256xbf16>
    %c2_202 = arith.constant 2 : index
    %c0_203 = arith.constant 0 : index
    %c0_204 = arith.constant 0 : index
    %191 = vector.load %arg8[%c2_202, %c0_203, %c0_204] : memref<9x4x4xbf16, #tpu.memory_space<vmem>>, vector<1x4x4xbf16>
    %192 = vector.shape_cast %191 : vector<1x4x4xbf16> to vector<4x4xbf16>
    %cst_205 = arith.constant dense<0.000000e+00> : vector<4x256xf32>
    %193 = tpu.matmul %192, %190, %cst_205 {dimension_numbers = #tpu.dot_dimension_numbers<[1], [0], [0], [1], [0, 0, 1, 1], [], []>} : vector<4x4xbf16>, vector<4x256xbf16>, vector<4x256xf32> -> vector<4x256xf32>
    %c2_206 = arith.constant 2 : index
    %c0_207 = arith.constant 0 : index
    %c0_208 = arith.constant 0 : index
    %194 = vector.load %arg12[%c2_206, %c0_207, %c0_208] : memref<9x1x256xf32, #tpu.memory_space<vmem>>, vector<1x1x256xf32>
    %195 = vector.shape_cast %194 : vector<1x1x256xf32> to vector<1x256xf32>
    %196 = vector.broadcast %195 : vector<1x256xf32> to vector<4x256xf32>
    %197 = arith.mulf %193, %196 : vector<4x256xf32>
    %198 = arith.addf %188, %197 : vector<4x256xf32>
    %c0_209 = arith.constant 0 : index
    %c0_210 = arith.constant 0 : index
    %c16 = arith.constant 16 : index
    %199 = vector.load %arg4[%c0_209, %c0_210, %c16] : memref<1x4x290xbf16, #tpu.memory_space<vmem>>, vector<1x4x256xbf16>
    %200 = vector.shape_cast %199 : vector<1x4x256xbf16> to vector<4x256xbf16>
    %c3_211 = arith.constant 3 : index
    %c0_212 = arith.constant 0 : index
    %c0_213 = arith.constant 0 : index
    %201 = vector.load %arg8[%c3_211, %c0_212, %c0_213] : memref<9x4x4xbf16, #tpu.memory_space<vmem>>, vector<1x4x4xbf16>
    %202 = vector.shape_cast %201 : vector<1x4x4xbf16> to vector<4x4xbf16>
    %cst_214 = arith.constant dense<0.000000e+00> : vector<4x256xf32>
    %203 = tpu.matmul %202, %200, %cst_214 {dimension_numbers = #tpu.dot_dimension_numbers<[1], [0], [0], [1], [0, 0, 1, 1], [], []>} : vector<4x4xbf16>, vector<4x256xbf16>, vector<4x256xf32> -> vector<4x256xf32>
    %c3_215 = arith.constant 3 : index
    %c0_216 = arith.constant 0 : index
    %c0_217 = arith.constant 0 : index
    %204 = vector.load %arg12[%c3_215, %c0_216, %c0_217] : memref<9x1x256xf32, #tpu.memory_space<vmem>>, vector<1x1x256xf32>
    %205 = vector.shape_cast %204 : vector<1x1x256xf32> to vector<1x256xf32>
    %206 = vector.broadcast %205 : vector<1x256xf32> to vector<4x256xf32>
    %207 = arith.mulf %203, %206 : vector<4x256xf32>
    %208 = arith.addf %198, %207 : vector<4x256xf32>
    %c0_218 = arith.constant 0 : index
    %c0_219 = arith.constant 0 : index
    %c17 = arith.constant 17 : index
    %209 = vector.load %arg4[%c0_218, %c0_219, %c17] : memref<1x4x290xbf16, #tpu.memory_space<vmem>>, vector<1x4x256xbf16>
    %210 = vector.shape_cast %209 : vector<1x4x256xbf16> to vector<4x256xbf16>
    %c4_220 = arith.constant 4 : index
    %c0_221 = arith.constant 0 : index
    %c0_222 = arith.constant 0 : index
    %211 = vector.load %arg8[%c4_220, %c0_221, %c0_222] : memref<9x4x4xbf16, #tpu.memory_space<vmem>>, vector<1x4x4xbf16>
    %212 = vector.shape_cast %211 : vector<1x4x4xbf16> to vector<4x4xbf16>
    %cst_223 = arith.constant dense<0.000000e+00> : vector<4x256xf32>
    %213 = tpu.matmul %212, %210, %cst_223 {dimension_numbers = #tpu.dot_dimension_numbers<[1], [0], [0], [1], [0, 0, 1, 1], [], []>} : vector<4x4xbf16>, vector<4x256xbf16>, vector<4x256xf32> -> vector<4x256xf32>
    %c4_224 = arith.constant 4 : index
    %c0_225 = arith.constant 0 : index
    %c0_226 = arith.constant 0 : index
    %214 = vector.load %arg12[%c4_224, %c0_225, %c0_226] : memref<9x1x256xf32, #tpu.memory_space<vmem>>, vector<1x1x256xf32>
    %215 = vector.shape_cast %214 : vector<1x1x256xf32> to vector<1x256xf32>
    %216 = vector.broadcast %215 : vector<1x256xf32> to vector<4x256xf32>
    %217 = arith.mulf %213, %216 : vector<4x256xf32>
    %218 = arith.addf %208, %217 : vector<4x256xf32>
    %c0_227 = arith.constant 0 : index
    %c0_228 = arith.constant 0 : index
    %c18 = arith.constant 18 : index
    %219 = vector.load %arg4[%c0_227, %c0_228, %c18] : memref<1x4x290xbf16, #tpu.memory_space<vmem>>, vector<1x4x256xbf16>
    %220 = vector.shape_cast %219 : vector<1x4x256xbf16> to vector<4x256xbf16>
    %c5_229 = arith.constant 5 : index
    %c0_230 = arith.constant 0 : index
    %c0_231 = arith.constant 0 : index
    %221 = vector.load %arg8[%c5_229, %c0_230, %c0_231] : memref<9x4x4xbf16, #tpu.memory_space<vmem>>, vector<1x4x4xbf16>
    %222 = vector.shape_cast %221 : vector<1x4x4xbf16> to vector<4x4xbf16>
    %cst_232 = arith.constant dense<0.000000e+00> : vector<4x256xf32>
    %223 = tpu.matmul %222, %220, %cst_232 {dimension_numbers = #tpu.dot_dimension_numbers<[1], [0], [0], [1], [0, 0, 1, 1], [], []>} : vector<4x4xbf16>, vector<4x256xbf16>, vector<4x256xf32> -> vector<4x256xf32>
    %c5_233 = arith.constant 5 : index
    %c0_234 = arith.constant 0 : index
    %c0_235 = arith.constant 0 : index
    %224 = vector.load %arg12[%c5_233, %c0_234, %c0_235] : memref<9x1x256xf32, #tpu.memory_space<vmem>>, vector<1x1x256xf32>
    %225 = vector.shape_cast %224 : vector<1x1x256xf32> to vector<1x256xf32>
    %226 = vector.broadcast %225 : vector<1x256xf32> to vector<4x256xf32>
    %227 = arith.mulf %223, %226 : vector<4x256xf32>
    %228 = arith.addf %218, %227 : vector<4x256xf32>
    %c0_236 = arith.constant 0 : index
    %c0_237 = arith.constant 0 : index
    %c32 = arith.constant 32 : index
    %229 = vector.load %arg4[%c0_236, %c0_237, %c32] : memref<1x4x290xbf16, #tpu.memory_space<vmem>>, vector<1x4x256xbf16>
    %230 = vector.shape_cast %229 : vector<1x4x256xbf16> to vector<4x256xbf16>
    %c6_238 = arith.constant 6 : index
    %c0_239 = arith.constant 0 : index
    %c0_240 = arith.constant 0 : index
    %231 = vector.load %arg8[%c6_238, %c0_239, %c0_240] : memref<9x4x4xbf16, #tpu.memory_space<vmem>>, vector<1x4x4xbf16>
    %232 = vector.shape_cast %231 : vector<1x4x4xbf16> to vector<4x4xbf16>
    %cst_241 = arith.constant dense<0.000000e+00> : vector<4x256xf32>
    %233 = tpu.matmul %232, %230, %cst_241 {dimension_numbers = #tpu.dot_dimension_numbers<[1], [0], [0], [1], [0, 0, 1, 1], [], []>} : vector<4x4xbf16>, vector<4x256xbf16>, vector<4x256xf32> -> vector<4x256xf32>
    %c6_242 = arith.constant 6 : index
    %c0_243 = arith.constant 0 : index
    %c0_244 = arith.constant 0 : index
    %234 = vector.load %arg12[%c6_242, %c0_243, %c0_244] : memref<9x1x256xf32, #tpu.memory_space<vmem>>, vector<1x1x256xf32>
    %235 = vector.shape_cast %234 : vector<1x1x256xf32> to vector<1x256xf32>
    %236 = vector.broadcast %235 : vector<1x256xf32> to vector<4x256xf32>
    %237 = arith.mulf %233, %236 : vector<4x256xf32>
    %238 = arith.addf %228, %237 : vector<4x256xf32>
    %c0_245 = arith.constant 0 : index
    %c0_246 = arith.constant 0 : index
    %c33 = arith.constant 33 : index
    %239 = vector.load %arg4[%c0_245, %c0_246, %c33] : memref<1x4x290xbf16, #tpu.memory_space<vmem>>, vector<1x4x256xbf16>
    %240 = vector.shape_cast %239 : vector<1x4x256xbf16> to vector<4x256xbf16>
    %c7_247 = arith.constant 7 : index
    %c0_248 = arith.constant 0 : index
    %c0_249 = arith.constant 0 : index
    %241 = vector.load %arg8[%c7_247, %c0_248, %c0_249] : memref<9x4x4xbf16, #tpu.memory_space<vmem>>, vector<1x4x4xbf16>
    %242 = vector.shape_cast %241 : vector<1x4x4xbf16> to vector<4x4xbf16>
    %cst_250 = arith.constant dense<0.000000e+00> : vector<4x256xf32>
    %243 = tpu.matmul %242, %240, %cst_250 {dimension_numbers = #tpu.dot_dimension_numbers<[1], [0], [0], [1], [0, 0, 1, 1], [], []>} : vector<4x4xbf16>, vector<4x256xbf16>, vector<4x256xf32> -> vector<4x256xf32>
    %c7_251 = arith.constant 7 : index
    %c0_252 = arith.constant 0 : index
    %c0_253 = arith.constant 0 : index
    %244 = vector.load %arg12[%c7_251, %c0_252, %c0_253] : memref<9x1x256xf32, #tpu.memory_space<vmem>>, vector<1x1x256xf32>
    %245 = vector.shape_cast %244 : vector<1x1x256xf32> to vector<1x256xf32>
    %246 = vector.broadcast %245 : vector<1x256xf32> to vector<4x256xf32>
    %247 = arith.mulf %243, %246 : vector<4x256xf32>
    %248 = arith.addf %238, %247 : vector<4x256xf32>
    %c0_254 = arith.constant 0 : index
    %c0_255 = arith.constant 0 : index
    %c34 = arith.constant 34 : index
    %249 = vector.load %arg4[%c0_254, %c0_255, %c34] : memref<1x4x290xbf16, #tpu.memory_space<vmem>>, vector<1x4x256xbf16>
    %250 = vector.shape_cast %249 : vector<1x4x256xbf16> to vector<4x256xbf16>
    %c8_256 = arith.constant 8 : index
    %c0_257 = arith.constant 0 : index
    %c0_258 = arith.constant 0 : index
    %251 = vector.load %arg8[%c8_256, %c0_257, %c0_258] : memref<9x4x4xbf16, #tpu.memory_space<vmem>>, vector<1x4x4xbf16>
    %252 = vector.shape_cast %251 : vector<1x4x4xbf16> to vector<4x4xbf16>
    %cst_259 = arith.constant dense<0.000000e+00> : vector<4x256xf32>
    %253 = tpu.matmul %252, %250, %cst_259 {dimension_numbers = #tpu.dot_dimension_numbers<[1], [0], [0], [1], [0, 0, 1, 1], [], []>} : vector<4x4xbf16>, vector<4x256xbf16>, vector<4x256xf32> -> vector<4x256xf32>
    %c8_260 = arith.constant 8 : index
    %c0_261 = arith.constant 0 : index
    %c0_262 = arith.constant 0 : index
    %254 = vector.load %arg12[%c8_260, %c0_261, %c0_262] : memref<9x1x256xf32, #tpu.memory_space<vmem>>, vector<1x1x256xf32>
    %255 = vector.shape_cast %254 : vector<1x1x256xf32> to vector<1x256xf32>
    %256 = vector.broadcast %255 : vector<1x256xf32> to vector<4x256xf32>
    %257 = arith.mulf %253, %256 : vector<4x256xf32>
    %258 = arith.addf %248, %257 : vector<4x256xf32>
    %259 = arith.addf %169, %258 : vector<4x256xf32>
    %c0_263 = arith.constant 0 : index
    %c0_264 = arith.constant 0 : index
    %260 = vector.load %arg14[%c0_263, %c0_264] : memref<4x1xf32, #tpu.memory_space<vmem>>, vector<4x1xf32>
    %261 = vector.broadcast %260 : vector<4x1xf32> to vector<4x256xf32>
    %262 = arith.addf %259, %261 : vector<4x256xf32>
    %c0_265 = arith.constant 0 : index
    %c0_266 = arith.constant 0 : index
    %c0_267 = arith.constant 0 : index
    %263 = vector.load %arg16[%c0_265, %c0_266, %c0_267] : memref<1x4x256xf32, #tpu.memory_space<vmem>>, vector<1x4x256xf32>
    %264 = vector.shape_cast %263 : vector<1x4x256xf32> to vector<4x256xf32>
    %265 = vector.shape_cast %262 : vector<4x256xf32> to vector<1x4x256xf32>
    tpu.vector_store %arg16[%c0_265, %c0_266, %c0_267], %265 {strides = array<i32>} : memref<1x4x256xf32, #tpu.memory_space<vmem>>, vector<1x4x256xf32>,
    %cst_268 = arith.constant 0.000000e+00 : bf16
    %266 = vector.broadcast %cst_268 : bf16 to vector<4x290xbf16>
    %c0_269 = arith.constant 0 : index
    %c0_270 = arith.constant 0 : index
    %267 = vector.load %arg18[%c0_269, %c0_270] : memref<4x290xbf16, #tpu.memory_space<vmem>>, vector<4x290xbf16>
    tpu.vector_store %arg18[%c0_269, %c0_270], %266 {strides = array<i32>} : memref<4x290xbf16, #tpu.memory_space<vmem>>, vector<4x290xbf16>,
    %268 = arith.truncf %262 : vector<4x256xf32> to vector<4x256xbf16>
    %c0_271 = arith.constant 0 : index
    %c17_272 = arith.constant 17 : index
    %269 = vector.load %arg18[%c0_271, %c17_272] : memref<4x290xbf16, #tpu.memory_space<vmem>>, vector<4x256xbf16>
    tpu.vector_store %arg18[%c0_271, %c17_272], %268 {strides = array<i32>} : memref<4x290xbf16, #tpu.memory_space<vmem>>, vector<4x256xbf16>,
    %c0_273 = arith.constant 0 : index
    %c0_274 = arith.constant 0 : index
    %270 = vector.load %arg18[%c0_273, %c0_274] : memref<4x290xbf16, #tpu.memory_space<vmem>>, vector<4x256xbf16>
    %c0_275 = arith.constant 0 : index
    %c0_276 = arith.constant 0 : index
    %c0_277 = arith.constant 0 : index
    %271 = vector.load %arg13[%c0_275, %c0_276, %c0_277] : memref<9x1x4xbf16, #tpu.memory_space<vmem>>, vector<1x1x4xbf16>
    %272 = vector.shape_cast %271 : vector<1x1x4xbf16> to vector<1x4xbf16>
    %cst_278 = arith.constant dense<0.000000e+00> : vector<1x256xf32>
    %273 = tpu.matmul %272, %270, %cst_278 {dimension_numbers = #tpu.dot_dimension_numbers<[1], [0], [0], [1], [0, 0, 1, 1], [], []>} : vector<1x4xbf16>, vector<4x256xbf16>, vector<1x256xf32> -> vector<1x256xf32>
    %c0_279 = arith.constant 0 : index
    %c0_280 = arith.constant 0 : index
    %c0_281 = arith.constant 0 : index
    %274 = vector.load %arg12[%c0_279, %c0_280, %c0_281] : memref<9x1x256xf32, #tpu.memory_space<vmem>>, vector<1x1x256xf32>
    %275 = vector.shape_cast %274 : vector<1x1x256xf32> to vector<1x256xf32>
    %276 = arith.mulf %273, %275 : vector<1x256xf32>
    %c0_282 = arith.constant 0 : index
    %c1_283 = arith.constant 1 : index
    %277 = vector.load %arg18[%c0_282, %c1_283] : memref<4x290xbf16, #tpu.memory_space<vmem>>, vector<4x256xbf16>
    %c1_284 = arith.constant 1 : index
    %c0_285 = arith.constant 0 : index
    %c0_286 = arith.constant 0 : index
    %278 = vector.load %arg13[%c1_284, %c0_285, %c0_286] : memref<9x1x4xbf16, #tpu.memory_space<vmem>>, vector<1x1x4xbf16>
    %279 = vector.shape_cast %278 : vector<1x1x4xbf16> to vector<1x4xbf16>
    %cst_287 = arith.constant dense<0.000000e+00> : vector<1x256xf32>
    %280 = tpu.matmul %279, %277, %cst_287 {dimension_numbers = #tpu.dot_dimension_numbers<[1], [0], [0], [1], [0, 0, 1, 1], [], []>} : vector<1x4xbf16>, vector<4x256xbf16>, vector<1x256xf32> -> vector<1x256xf32>
    %c1_288 = arith.constant 1 : index
    %c0_289 = arith.constant 0 : index
    %c0_290 = arith.constant 0 : index
    %281 = vector.load %arg12[%c1_288, %c0_289, %c0_290] : memref<9x1x256xf32, #tpu.memory_space<vmem>>, vector<1x1x256xf32>
    %282 = vector.shape_cast %281 : vector<1x1x256xf32> to vector<1x256xf32>
    %283 = arith.mulf %280, %282 : vector<1x256xf32>
    %284 = arith.addf %276, %283 : vector<1x256xf32>
    %c0_291 = arith.constant 0 : index
    %c2_292 = arith.constant 2 : index
    %285 = vector.load %arg18[%c0_291, %c2_292] : memref<4x290xbf16, #tpu.memory_space<vmem>>, vector<4x256xbf16>
    %c2_293 = arith.constant 2 : index
    %c0_294 = arith.constant 0 : index
    %c0_295 = arith.constant 0 : index
    %286 = vector.load %arg13[%c2_293, %c0_294, %c0_295] : memref<9x1x4xbf16, #tpu.memory_space<vmem>>, vector<1x1x4xbf16>
    %287 = vector.shape_cast %286 : vector<1x1x4xbf16> to vector<1x4xbf16>
    %cst_296 = arith.constant dense<0.000000e+00> : vector<1x256xf32>
    %288 = tpu.matmul %287, %285, %cst_296 {dimension_numbers = #tpu.dot_dimension_numbers<[1], [0], [0], [1], [0, 0, 1, 1], [], []>} : vector<1x4xbf16>, vector<4x256xbf16>, vector<1x256xf32> -> vector<1x256xf32>
    %c2_297 = arith.constant 2 : index
    %c0_298 = arith.constant 0 : index
    %c0_299 = arith.constant 0 : index
    %289 = vector.load %arg12[%c2_297, %c0_298, %c0_299] : memref<9x1x256xf32, #tpu.memory_space<vmem>>, vector<1x1x256xf32>
    %290 = vector.shape_cast %289 : vector<1x1x256xf32> to vector<1x256xf32>
    %291 = arith.mulf %288, %290 : vector<1x256xf32>
    %292 = arith.addf %284, %291 : vector<1x256xf32>
    %c0_300 = arith.constant 0 : index
    %c16_301 = arith.constant 16 : index
    %293 = vector.load %arg18[%c0_300, %c16_301] : memref<4x290xbf16, #tpu.memory_space<vmem>>, vector<4x256xbf16>
    %c3_302 = arith.constant 3 : index
    %c0_303 = arith.constant 0 : index
    %c0_304 = arith.constant 0 : index
    %294 = vector.load %arg13[%c3_302, %c0_303, %c0_304] : memref<9x1x4xbf16, #tpu.memory_space<vmem>>, vector<1x1x4xbf16>
    %295 = vector.shape_cast %294 : vector<1x1x4xbf16> to vector<1x4xbf16>
    %cst_305 = arith.constant dense<0.000000e+00> : vector<1x256xf32>
    %296 = tpu.matmul %295, %293, %cst_305 {dimension_numbers = #tpu.dot_dimension_numbers<[1], [0], [0], [1], [0, 0, 1, 1], [], []>} : vector<1x4xbf16>, vector<4x256xbf16>, vector<1x256xf32> -> vector<1x256xf32>
    %c3_306 = arith.constant 3 : index
    %c0_307 = arith.constant 0 : index
    %c0_308 = arith.constant 0 : index
    %297 = vector.load %arg12[%c3_306, %c0_307, %c0_308] : memref<9x1x256xf32, #tpu.memory_space<vmem>>, vector<1x1x256xf32>
    %298 = vector.shape_cast %297 : vector<1x1x256xf32> to vector<1x256xf32>
    %299 = arith.mulf %296, %298 : vector<1x256xf32>
    %300 = arith.addf %292, %299 : vector<1x256xf32>
    %c0_309 = arith.constant 0 : index
    %c17_310 = arith.constant 17 : index
    %301 = vector.load %arg18[%c0_309, %c17_310] : memref<4x290xbf16, #tpu.memory_space<vmem>>, vector<4x256xbf16>
    %c4_311 = arith.constant 4 : index
    %c0_312 = arith.constant 0 : index
    %c0_313 = arith.constant 0 : index
    %302 = vector.load %arg13[%c4_311, %c0_312, %c0_313] : memref<9x1x4xbf16, #tpu.memory_space<vmem>>, vector<1x1x4xbf16>
    %303 = vector.shape_cast %302 : vector<1x1x4xbf16> to vector<1x4xbf16>
    %cst_314 = arith.constant dense<0.000000e+00> : vector<1x256xf32>
    %304 = tpu.matmul %303, %301, %cst_314 {dimension_numbers = #tpu.dot_dimension_numbers<[1], [0], [0], [1], [0, 0, 1, 1], [], []>} : vector<1x4xbf16>, vector<4x256xbf16>, vector<1x256xf32> -> vector<1x256xf32>
    %c4_315 = arith.constant 4 : index
    %c0_316 = arith.constant 0 : index
    %c0_317 = arith.constant 0 : index
    %305 = vector.load %arg12[%c4_315, %c0_316, %c0_317] : memref<9x1x256xf32, #tpu.memory_space<vmem>>, vector<1x1x256xf32>
    %306 = vector.shape_cast %305 : vector<1x1x256xf32> to vector<1x256xf32>
    %307 = arith.mulf %304, %306 : vector<1x256xf32>
    %308 = arith.addf %300, %307 : vector<1x256xf32>
    %c0_318 = arith.constant 0 : index
    %c18_319 = arith.constant 18 : index
    %309 = vector.load %arg18[%c0_318, %c18_319] : memref<4x290xbf16, #tpu.memory_space<vmem>>, vector<4x256xbf16>
    %c5_320 = arith.constant 5 : index
    %c0_321 = arith.constant 0 : index
    %c0_322 = arith.constant 0 : index
    %310 = vector.load %arg13[%c5_320, %c0_321, %c0_322] : memref<9x1x4xbf16, #tpu.memory_space<vmem>>, vector<1x1x4xbf16>
    %311 = vector.shape_cast %310 : vector<1x1x4xbf16> to vector<1x4xbf16>
    %cst_323 = arith.constant dense<0.000000e+00> : vector<1x256xf32>
    %312 = tpu.matmul %311, %309, %cst_323 {dimension_numbers = #tpu.dot_dimension_numbers<[1], [0], [0], [1], [0, 0, 1, 1], [], []>} : vector<1x4xbf16>, vector<4x256xbf16>, vector<1x256xf32> -> vector<1x256xf32>
    %c5_324 = arith.constant 5 : index
    %c0_325 = arith.constant 0 : index
    %c0_326 = arith.constant 0 : index
    %313 = vector.load %arg12[%c5_324, %c0_325, %c0_326] : memref<9x1x256xf32, #tpu.memory_space<vmem>>, vector<1x1x256xf32>
    %314 = vector.shape_cast %313 : vector<1x1x256xf32> to vector<1x256xf32>
    %315 = arith.mulf %312, %314 : vector<1x256xf32>
    %316 = arith.addf %308, %315 : vector<1x256xf32>
    %c0_327 = arith.constant 0 : index
    %c32_328 = arith.constant 32 : index
    %317 = vector.load %arg18[%c0_327, %c32_328] : memref<4x290xbf16, #tpu.memory_space<vmem>>, vector<4x256xbf16>
    %c6_329 = arith.constant 6 : index
    %c0_330 = arith.constant 0 : index
    %c0_331 = arith.constant 0 : index
    %318 = vector.load %arg13[%c6_329, %c0_330, %c0_331] : memref<9x1x4xbf16, #tpu.memory_space<vmem>>, vector<1x1x4xbf16>
    %319 = vector.shape_cast %318 : vector<1x1x4xbf16> to vector<1x4xbf16>
    %cst_332 = arith.constant dense<0.000000e+00> : vector<1x256xf32>
    %320 = tpu.matmul %319, %317, %cst_332 {dimension_numbers = #tpu.dot_dimension_numbers<[1], [0], [0], [1], [0, 0, 1, 1], [], []>} : vector<1x4xbf16>, vector<4x256xbf16>, vector<1x256xf32> -> vector<1x256xf32>
    %c6_333 = arith.constant 6 : index
    %c0_334 = arith.constant 0 : index
    %c0_335 = arith.constant 0 : index
    %321 = vector.load %arg12[%c6_333, %c0_334, %c0_335] : memref<9x1x256xf32, #tpu.memory_space<vmem>>, vector<1x1x256xf32>
    %322 = vector.shape_cast %321 : vector<1x1x256xf32> to vector<1x256xf32>
    %323 = arith.mulf %320, %322 : vector<1x256xf32>
    %324 = arith.addf %316, %323 : vector<1x256xf32>
    %c0_336 = arith.constant 0 : index
    %c33_337 = arith.constant 33 : index
    %325 = vector.load %arg18[%c0_336, %c33_337] : memref<4x290xbf16, #tpu.memory_space<vmem>>, vector<4x256xbf16>
    %c7_338 = arith.constant 7 : index
    %c0_339 = arith.constant 0 : index
    %c0_340 = arith.constant 0 : index
    %326 = vector.load %arg13[%c7_338, %c0_339, %c0_340] : memref<9x1x4xbf16, #tpu.memory_space<vmem>>, vector<1x1x4xbf16>
    %327 = vector.shape_cast %326 : vector<1x1x4xbf16> to vector<1x4xbf16>
    %cst_341 = arith.constant dense<0.000000e+00> : vector<1x256xf32>
    %328 = tpu.matmul %327, %325, %cst_341 {dimension_numbers = #tpu.dot_dimension_numbers<[1], [0], [0], [1], [0, 0, 1, 1], [], []>} : vector<1x4xbf16>, vector<4x256xbf16>, vector<1x256xf32> -> vector<1x256xf32>
    %c7_342 = arith.constant 7 : index
    %c0_343 = arith.constant 0 : index
    %c0_344 = arith.constant 0 : index
    %329 = vector.load %arg12[%c7_342, %c0_343, %c0_344] : memref<9x1x256xf32, #tpu.memory_space<vmem>>, vector<1x1x256xf32>
    %330 = vector.shape_cast %329 : vector<1x1x256xf32> to vector<1x256xf32>
    %331 = arith.mulf %328, %330 : vector<1x256xf32>
    %332 = arith.addf %324, %331 : vector<1x256xf32>
    %c0_345 = arith.constant 0 : index
    %c34_346 = arith.constant 34 : index
    %333 = vector.load %arg18[%c0_345, %c34_346] : memref<4x290xbf16, #tpu.memory_space<vmem>>, vector<4x256xbf16>
    %c8_347 = arith.constant 8 : index
    %c0_348 = arith.constant 0 : index
    %c0_349 = arith.constant 0 : index
    %334 = vector.load %arg13[%c8_347, %c0_348, %c0_349] : memref<9x1x4xbf16, #tpu.memory_space<vmem>>, vector<1x1x4xbf16>
    %335 = vector.shape_cast %334 : vector<1x1x4xbf16> to vector<1x4xbf16>
    %cst_350 = arith.constant dense<0.000000e+00> : vector<1x256xf32>
    %336 = tpu.matmul %335, %333, %cst_350 {dimension_numbers = #tpu.dot_dimension_numbers<[1], [0], [0], [1], [0, 0, 1, 1], [], []>} : vector<1x4xbf16>, vector<4x256xbf16>, vector<1x256xf32> -> vector<1x256xf32>
    %c8_351 = arith.constant 8 : index
    %c0_352 = arith.constant 0 : index
    %c0_353 = arith.constant 0 : index
    %337 = vector.load %arg12[%c8_351, %c0_352, %c0_353] : memref<9x1x256xf32, #tpu.memory_space<vmem>>, vector<1x1x256xf32>
    %338 = vector.shape_cast %337 : vector<1x1x256xf32> to vector<1x256xf32>
    %339 = arith.mulf %336, %338 : vector<1x256xf32>
    %340 = arith.addf %332, %339 : vector<1x256xf32>
    %c0_354 = arith.constant 0 : index
    %c0_355 = arith.constant 0 : index
    %341 = vector.load %arg15[%c0_354, %c0_355] : memref<1x1xf32, #tpu.memory_space<vmem>>, vector<1x1xf32>
    %342 = vector.broadcast %341 : vector<1x1xf32> to vector<1x256xf32>
    %343 = arith.addf %340, %342 : vector<1x256xf32>
    %cst_356 = arith.constant 0.000000e+00 : f32
    %344 = vector.broadcast %cst_356 : f32 to vector<1x256xf32>
    %345 = arith.subf %344, %343 : vector<1x256xf32>
    %346 = math.exp %345 : vector<1x256xf32>
    %cst_357 = arith.constant 1.000000e+00 : f32
    %347 = vector.broadcast %cst_357 : f32 to vector<1x256xf32>
    %348 = arith.addf %347, %346 : vector<1x256xf32>
    %349 = tpu.reciprocal %348 {approx = true} : vector<1x256xf32> -> vector<1x256xf32>
    %c0_358 = arith.constant 0 : index
    %c0_359 = arith.constant 0 : index
    %c0_360 = arith.constant 0 : index
    %350 = vector.load %arg17[%c0_358, %c0_359, %c0_360] : memref<1x1x256xf32, #tpu.memory_space<vmem>>, vector<1x1x256xf32>
    %351 = vector.shape_cast %350 : vector<1x1x256xf32> to vector<1x256xf32>
    %352 = vector.shape_cast %349 : vector<1x256xf32> to vector<1x1x256xf32>
    tpu.vector_store %arg17[%c0_358, %c0_359, %c0_360], %352 {strides = array<i32>} : memref<1x1x256xf32, #tpu.memory_space<vmem>>, vector<1x1x256xf32>,
    return
  }
  func.func @transform_0(%arg0: i32) -> (i32, i32, i32) {
    %c0_i32 = arith.constant 0 : i32
    %c0_i32_0 = arith.constant 0 : i32
    %c0_i32_1 = arith.constant 0 : i32
    return %arg0, %c0_i32, %c0_i32_0 : i32, i32, i32
  }
  func.func @transform_1(%arg0: i32) -> (i32, i32, i32) {
    %c0_i32 = arith.constant 0 : i32
    %c0_i32_0 = arith.constant 0 : i32
    %c0_i32_1 = arith.constant 0 : i32
    return %arg0, %c0_i32, %c0_i32_0 : i32, i32, i32
  }
  func.func @transform_2(%arg0: i32) -> (i32, i32, i32) {
    %c0_i32 = arith.constant 0 : i32
    %c0_i32_0 = arith.constant 0 : i32
    %c0_i32_1 = arith.constant 0 : i32
    return %arg0, %c0_i32, %c0_i32_0 : i32, i32, i32
  }
  func.func @transform_3(%arg0: i32) -> (i32, i32, i32) {
    %c0_i32 = arith.constant 0 : i32
    %c0_i32_0 = arith.constant 0 : i32
    %c0_i32_1 = arith.constant 0 : i32
    return %arg0, %c0_i32, %c0_i32_0 : i32, i32, i32
  }
  func.func @transform_4(%arg0: i32) -> (i32, i32, i32) {
    %c0_i32 = arith.constant 0 : i32
    %c0_i32_0 = arith.constant 0 : i32
    %c0_i32_1 = arith.constant 0 : i32
    %c0_i32_2 = arith.constant 0 : i32
    return %c0_i32, %c0_i32_0, %c0_i32_1 : i32, i32, i32
  }
  func.func @transform_5(%arg0: i32) -> (i32, i32, i32) {
    %c0_i32 = arith.constant 0 : i32
    %c0_i32_0 = arith.constant 0 : i32
    %c0_i32_1 = arith.constant 0 : i32
    %c0_i32_2 = arith.constant 0 : i32
    return %c0_i32, %c0_i32_0, %c0_i32_1 : i32, i32, i32
  }
  func.func @transform_6(%arg0: i32) -> (i32, i32, i32) {
    %c0_i32 = arith.constant 0 : i32
    %c0_i32_0 = arith.constant 0 : i32
    %c0_i32_1 = arith.constant 0 : i32
    %c0_i32_2 = arith.constant 0 : i32
    return %c0_i32, %c0_i32_0, %c0_i32_1 : i32, i32, i32
  }
  func.func @transform_7(%arg0: i32) -> (i32, i32, i32) {
    %c0_i32 = arith.constant 0 : i32
    %c0_i32_0 = arith.constant 0 : i32
    %c0_i32_1 = arith.constant 0 : i32
    %c0_i32_2 = arith.constant 0 : i32
    return %c0_i32, %c0_i32_0, %c0_i32_1 : i32, i32, i32
  }
  func.func @transform_8(%arg0: i32) -> (i32, i32) {
    %c0_i32 = arith.constant 0 : i32
    %c0_i32_0 = arith.constant 0 : i32
    %c0_i32_1 = arith.constant 0 : i32
    return %c0_i32, %c0_i32_0 : i32, i32
  }
  func.func @transform_9(%arg0: i32) -> (i32, i32) {
    %c0_i32 = arith.constant 0 : i32
    %c0_i32_0 = arith.constant 0 : i32
    %c0_i32_1 = arith.constant 0 : i32
    return %c0_i32, %c0_i32_0 : i32, i32
  }
  func.func @transform_10(%arg0: i32) -> (i32, i32) {
    %c0_i32 = arith.constant 0 : i32
    %c0_i32_0 = arith.constant 0 : i32
    %c0_i32_1 = arith.constant 0 : i32
    return %c0_i32, %c0_i32_0 : i32, i32
  }
  func.func @transform_11(%arg0: i32) -> (i32, i32, i32) {
    %c0_i32 = arith.constant 0 : i32
    %c0_i32_0 = arith.constant 0 : i32
    %c0_i32_1 = arith.constant 0 : i32
    %c0_i32_2 = arith.constant 0 : i32
    return %c0_i32, %c0_i32_0, %c0_i32_1 : i32, i32, i32
  }
  func.func @transform_12(%arg0: i32) -> (i32, i32, i32) {
    %c0_i32 = arith.constant 0 : i32
    %c0_i32_0 = arith.constant 0 : i32
    %c0_i32_1 = arith.constant 0 : i32
    %c0_i32_2 = arith.constant 0 : i32
    return %c0_i32, %c0_i32_0, %c0_i32_1 : i32, i32, i32
  }
  func.func @transform_13(%arg0: i32) -> (i32, i32) {
    %c0_i32 = arith.constant 0 : i32
    %c0_i32_0 = arith.constant 0 : i32
    %c0_i32_1 = arith.constant 0 : i32
    return %c0_i32, %c0_i32_0 : i32, i32
  }
  func.func @transform_14(%arg0: i32) -> (i32, i32) {
    %c0_i32 = arith.constant 0 : i32
    %c0_i32_0 = arith.constant 0 : i32
    %c0_i32_1 = arith.constant 0 : i32
    return %c0_i32, %c0_i32_0 : i32, i32
  }
  func.func @transform_15(%arg0: i32) -> (i32, i32, i32) {
    %c0_i32 = arith.constant 0 : i32
    %c0_i32_0 = arith.constant 0 : i32
    %c0_i32_1 = arith.constant 0 : i32
    return %arg0, %c0_i32, %c0_i32_0 : i32, i32, i32
  }
  func.func @transform_16(%arg0: i32) -> (i32, i32, i32) {
    %c0_i32 = arith.constant 0 : i32
    %c0_i32_0 = arith.constant 0 : i32
    %c0_i32_1 = arith.constant 0 : i32
    return %arg0, %c0_i32, %c0_i32_0 : i32, i32, i32
  }
}

</mosaic_0001>

<bundles_post_ra>
// kernel: tpu_custom_call.1
= control target key start
LH: loop header
LB: loop body
LE: loop exit
PB: predicated region body
PF: predicated region fallthrough
CT: control target
= control target key end

     0   :  { %s6377_s0 = inlined_call_operand.vmem [shape: bf16[2,32,26], index: 0, kind: input, shape index: {}]   ;;  %s6378_s1 = inlined_call_operand.hbm [shape: bf16[2,16,50], index: 1, kind: input, shape index: {}]   ;;  %s6379_s2 = inlined_call_operand.hbm [shape: bf16[2,8,122], index: 2, kind: input, shape index: {}]   ;;  %s6380_s3 = inlined_call_operand.vmem [shape: bf16[2,4,290], index: 3, kind: input, shape index: {}]   ;;  %s6381_s4 = inlined_call_operand.vmem [shape: bf16[9,4,32], index: 4, kind: input, shape index: {}]   ;;  %s6382_s5 = inlined_call_operand.hbm [shape: bf16[9,4,16], index: 5, kind: input, shape index: {}]   ;;  %s6383_s6 = inlined_call_operand.vmem [shape: bf16[9,4,8], index: 6, kind: input, shape index: {}]   ;;  %s6384_s7 = inlined_call_operand.vmem [shape: bf16[9,4,4], index: 7, kind: input, shape index: {}]   ;;  %s6385_s8 = inlined_call_operand.hbm [shape: bf16[16,256], index: 8, kind: input, shape index: {}]   ;;  %s6386_s9 = inlined_call_operand.vmem [shape: bf16[36,256], index: 9, kind: input, shape index: {}]   ;;  %s6387_s10 = inlined_call_operand.vmem [shape: bf16[100,256], index: 10, kind: input, shape index: {}]   ;;  %s6388_s11 = inlined_call_operand.hbm [shape: f32[9,1,256], index: 11, kind: input, shape index: {}]   ;;  %s6389_s12 = inlined_call_operand.vmem [shape: bf16[9,1,4], index: 12, kind: input, shape index: {}]   ;;  %s6390_s13 = inlined_call_operand.vmem [shape: f32[4,1], index: 13, kind: input, shape index: {}]   ;;  %s6391_s14 = inlined_call_operand.<no memory space> [shape: f32[1,1], index: 14, kind: input, shape index: {}]   ;;  %s6392_s15 = inlined_call_operand.hbm [shape: f32[2,4,256], index: 15, kind: output, shape index: {0}]   ;;  %s6393_s16 = inlined_call_operand.hbm [shape: f32[2,1,256], index: 16, kind: output, shape index: {1}]  }
   0x1   :  { %6413 = sst [smem:[#allocation24_spill]] %s6377_s0  ;;  %v22_v0 = vstv %s6391_s14 }
   0x2   :  { %6414 = sst [smem:[#allocation25_spill]] %s6378_s1  ;;  %23 = vst [vmem:[#allocation3] sm:$0x1] %v22_v0 }
   0x3   :  { %6415 = sst [smem:[#allocation26_spill]] %s6382_s5 }
   0x4   :  { %6416 = sst [smem:[#allocation27_spill]] %s6384_s7 }
   0x5   :  { %6417 = sst [smem:[#allocation28_spill]] %s6385_s8 }
   0x6   :  { %6418 = sst [smem:[#allocation29_spill]] %s6387_s10 }
   0x7   :  { %6419 = sst [smem:[#allocation30_spill]] %s6388_s11 }
   0x8   :  { %6420 = sst [smem:[#allocation31_spill]] %s6389_s12 }
   0x9   :  { %6421 = sst [smem:[#allocation32_spill]] %s6390_s13 }
   0xa   :  { %6422 = sst [smem:[#allocation33_spill]] %s6392_s15 }
   0xb   :  { %6423 = sst [smem:[#allocation34_spill]] %s6393_s16 }
   0xc   :  { %24 = vsyncpa [#allocation5], 0 }
   0xd   :  { %26 = vsyncpa [#allocation5 + $0x1], 0 }
   0xe   :  { %27 = vsyncpa [#allocation8], 0 }
   0xf   :  { %29 = vsyncpa [#allocation8 + $0x1], 0 }
  0x10   :  { %30 = vsyncpa [#allocation11], 0 }
  0x11   :  { %31 = vsyncpa [#allocation6], 0 }
  0x12   :  { %33 = vsyncpa [#allocation6 + $0x1], 0 }
  0x13   :  { %34 = vsyncpa [#allocation15], 0 }
  0x14   :  { %36 = vsyncpa [#allocation15 + $0x1], 0  ;;  %s5366_s23 = smov 0   ;;  %s5368_s24 = smov 0  }
  0x15   :  { %s5370_s25 = smov 0   ;;  %s5372_s26 = smov 0  }
  0x16 LB: > { %6424 = sst [smem:[#allocation22_spill]] %s5223_s23  ;;  %s5387_s14 = sadd.s32 4294967295, %s5235_s26   ;;  %s5235_s26 = sphi %s5372_s26, %s6464_s26   ;;  %s5231_s25 = sphi %s5370_s25, %s6463_s25   ;;  %s5227_s24 = sphi %s5368_s24, %s6462_s24   ;;  %s5223_s23 = sphi %s5366_s23, %s6461_s23  }
  0x17   : > { %s4296_s27 = sadd.s32 4294967294, %s5235_s26   ;;  %p88_p0 = scmp.ne.s32.totalorder %s5227_s24, %s5223_s23 }
  0x18   : > { %p6397_p1 = scmp.eq.s32.totalorder %s5387_s14, 0  ;;  %p401_p3 = scmp.eq.s32.totalorder %s4296_s27, 1 }
  0x19   : > { %p4297_p5 = scmp.ge.s32.totalorder %s5235_s26, 1  ;;  %p434_p7 = scmp.lt.s32.totalorder %s5235_s26, 3 }
  0x1a   : > { %p5396_p4 = por %p6397_p1, %p88_p0  ;;  %p5401_p6 = por %p401_p3, %p88_p0 }
  0x1b   : > { %p5406_p8 = pnand %p4297_p5, %p434_p7  ;;  %s5237_s0 = smov [#allocation9]  }
  0x1c   : > { %s6425_s28 = scalar_select %p5396_p4, 1, 0 }
  0x1d   : > { %s6426_s29 = scalar_select %p5401_p6, 1, 0 }
  0x1e   : > { %s6428_s30 = scalar_select %p5406_p8, 1, 0 }
  0x1f   : > { %6427 = sst [smem:[#allocation23_spill]] %s6426_s29  ;;  %s449_s17 = sshll.u32 %s5237_s0, 4  ;;  %s5410_s17 = int_to_ptr.vmem [resolvable:$true] %s449_s17 }
  0x20   : > { %p4819_p9 = pneg %p5406_p8  ;;  %s5238_s19 = smov [#allocation10]  }
  0x21   : > { %s468_s20 = sshll.u32 %s5238_s19, 4  ;;  %s6430_s5 = sld [smem:[#allocation26_spill]]  ;;  %s5421_s20 = int_to_ptr.vmem [resolvable:$true] %s468_s20 }
  0x22   : > { %p5417_p11 = pnand %p4819_p9, %p6397_p1 }
  0x24   : > { %p5431_p13 = pneg %p5417_p11 }
  0x27   : > { %s4981_s27 = scalar_lea.hbm %s6430_s5, 288 }
  0x28   : > { %p4982_p12 = scmp.ne.s32.totalorder %s6430_s5, %s4981_s27  ;;  %p4988_p5 = scmp.lt.u32.totalorder %s4981_s27, %s6430_s5 }
  0x2a   : > { %p4984_p0 = pnand %p5431_p13, %p4982_p12 }
  0x2c   : > { %p4985_p3 = pneg %p4984_p0 }
  0x2e   : > { %p4990_p7 = pnand %p4988_p5, %p4985_p3 }
  0x30   : > { %4993 = shalt.err (!%p4990_p7)
}
  0x31   : > { %s4994_s29 = scalar_lea.vmem %s5410_s17, 288  ;;  %p5002_p2 = scmp.lt.s32.totalorder %s5410_s17, %s5410_s17 }
  0x32   : > { %p4995_p9 = scmp.ne.s32.totalorder %s5410_s17, %s4994_s29  ;;  %p5003_p6 = scmp.lt.s32.totalorder %s4994_s29, %s4994_s29 }
  0x34   : > { %p4997_p10 = pnand %p4995_p9, %p5431_p13  ;;  %p5004_p12 = por %p5003_p6, %p5002_p2 }
  0x36   : > { %p4998_p1 = pneg %p4997_p10 }
  0x38   : > { %p5005_p0 = pnand %p5004_p12, %p4998_p1 }
  0x3a   : > { %5008 = shalt.err (!%p5005_p0)
}
  0x3b   : > { %s6401_s21 = smov 32   ;;  %s6402_s16 = smov 2  }
  0x3c   : > { %4822 = dma.hbm_to_vmem [thread:$0]  (!%p5417_p11), %s6430_s5, 288, %s5410_s17, [#allocation8], %s6401_s21, %s6401_s21, %s6402_s16  }
  0x3d   : > { %s6432_s8 = sld [smem:[#allocation28_spill]] }
  0x43   : > { %s5009_s29 = scalar_lea.hbm %s6432_s8, 256 }
  0x44   : > { %p5010_p1 = scmp.ne.s32.totalorder %s6432_s8, %s5009_s29  ;;  %p5016_p10 = scmp.lt.u32.totalorder %s5009_s29, %s6432_s8 }
  0x46   : > { %p5012_p2 = pnand %p5010_p1, %p5431_p13 }
  0x48   : > { %p5013_p6 = pneg %p5012_p2 }
  0x4a   : > { %p5018_p3 = pnand %p5016_p10, %p5013_p6 }
  0x4c   : > { %5021 = shalt.err (!%p5018_p3)
}
  0x4d   : > { %s5022_s17 = scalar_lea.vmem %s5421_s20, 256  ;;  %p5030_p12 = scmp.lt.s32.totalorder %s5421_s20, %s5421_s20 }
  0x4e   : > { %p5023_p5 = scmp.ne.s32.totalorder %s5421_s20, %s5022_s17  ;;  %p5031_p0 = scmp.lt.s32.totalorder %s5022_s17, %s5022_s17 }
  0x50   : > { %p5025_p7 = pnand %p5023_p5, %p5431_p13  ;;  %p5032_p1 = por %p5031_p0, %p5030_p12 }
  0x52   : > { %p5026_p9 = pneg %p5025_p7 }
  0x54   : > { %p5033_p2 = pnand %p5032_p1, %p5026_p9 }
  0x56   : > { %5036 = shalt.err (!%p5033_p2)
}
  0x57   : > { %s5241_s12 = smov 128   ;;  %s5242_s7 = smov 8  }
  0x58   : > { %4825 = dma.hbm_to_vmem [thread:$0]  (!%p5417_p11), %s6432_s8, 256, %s5421_s20, [#allocation11], %s5241_s12, %s5241_s12, %s5242_s7  }
  0x59   : > { %s5243_s22 = smov [#allocation12]   ;;  %s5479_s0 = sadd.s32 1, %s5235_s26  }
  0x5a   : > { %s487_s27 = sshll.u32 %s5243_s22, 4  ;;  %s6433_s11 = sld [smem:[#allocation30_spill]]  ;;  %s488_s27 = int_to_ptr.vmem [resolvable:$true] %s487_s27 }
  0x60   : > { %s5037_s17 = scalar_lea.hbm %s6433_s11, 288 }
  0x61   : > { %p5038_p6 = scmp.ne.s32.totalorder %s6433_s11, %s5037_s17  ;;  %p5044_p5 = scmp.lt.u32.totalorder %s5037_s17, %s6433_s11 }
  0x63   : > { %p5040_p10 = pnand %p5038_p6, %p5431_p13 }
  0x65   : > { %p5041_p3 = pneg %p5040_p10 }
  0x67   : > { %p5046_p7 = pnand %p5044_p5, %p5041_p3 }
  0x69   : > { %5049 = shalt.err (!%p5046_p7)
}
  0x6a   : > { %s5050_s20 = scalar_lea.vmem %s488_s27, 288  ;;  %p5058_p1 = scmp.lt.s32.totalorder %s488_s27, %s488_s27 }
  0x6b   : > { %p5051_p9 = scmp.ne.s32.totalorder %s488_s27, %s5050_s20  ;;  %p5059_p2 = scmp.lt.s32.totalorder %s5050_s20, %s5050_s20 }
  0x6d   : > { %p5053_p12 = pnand %p5051_p9, %p5431_p13  ;;  %p5060_p4 = por %p5059_p2, %p5058_p1 }
  0x6f   : > { %p5054_p0 = pneg %p5053_p12 }
  0x71   : > { %p5061_p8 = pnand %p5060_p4, %p5054_p0 }
  0x73   : > { %5064 = shalt.err (!%p5061_p8)
}
  0x74   : > { %s6434_s21 = smov 2   ;;  %s6435_s16 = smov 32  }
  0x75   : > { %4828 = dma.hbm_to_vmem [thread:$0]  (!%p5417_p11), %s6433_s11, 288, %s488_s27, [#allocation11], %s6435_s16, %s6435_s16, %s6434_s21  }
  0x76   : > { %s72_s23 = ssub.s32 %s5235_s26, %s5479_s0  ;;  %s75_s18 = sadd.s32 1, %s5231_s25 }
  0x77   : > { %p73_p4 = scmp.eq.s32.totalorder %s72_s23, 0  ;;  %p82_p8 = scmp.ne.s32.totalorder %s5231_s25, %s5227_s24 }
  0x78   : > { %p83_p13 = scmp.eq.s32.totalorder %s5235_s26, 0  ;;  %p4846_p6 = scmp.lt.s32.totalorder %s5235_s26, 2 }
  0x79   : > { %s5510_s12 = scalar_select %p73_p4, %s5231_s25, %s75_s18  }
  0x7a   : > { %p84_p10 = por %p83_p13, %p82_p8  ;;  %p6436_p3 = scmp.eq.s32.totalorder %s5387_s14, 1 }
  0x7b   : > { %s5519_s13 = sand.u32 1, %s5231_s25   ;;  %s4455_s15 = sshll.u32 %s5235_s26, 7 }
  0x7c   : > { %p5514_p5 = por %p6436_p3, %p82_p8  ;;  %s4302_s22 = sshll.u32 %s5519_s13, 3 }
  0x7d   : > { %s6438_s1 = sld [smem:[#allocation25_spill]]  ;;  %s522_s17 = scalar_lea.vmem [#allocation4], %s4302_s22 }
  0x7e   : > { %s6437_s7 = scalar_select %p5514_p5, 1, 0 }
  0x7f   : > { %s529_s20 = sshll.u32 %s522_s17, 4  ;;  %p5528_p11 = pnand %p4846_p6, %p84_p10  ;;  %s5532_s20 = int_to_ptr.vmem [resolvable:$true] %s529_s20 }
  0x80   : > { %s519_s16 = scalar_lea.sflag [#allocation5], %s5519_s13 }
  0x81   : > { %p5067_p9 = pneg %p5528_p11 }
  0x83   : > { %s5526_s29 = scalar_lea.hbm %s6438_s1, %s4455_s15  ;;  %s5070_s18 = scalar_lea.hbm %s6438_s1, 256 }
  0x84   : > { %s5065_s5 = scalar_lea.hbm %s5526_s29, 128  ;;  %p5071_p1 = scmp.lt.u32.totalorder %s5526_s29, %s6438_s1 }
  0x85   : > { %p5066_p7 = scmp.ne.s32.totalorder %s5526_s29, %s5065_s5  ;;  %p5072_p2 = scmp.lt.u32.totalorder %s5070_s18, %s5065_s5 }
  0x86   : > { %p5074_p8 = scmp.lt.u32.totalorder %s5065_s5, %s5526_s29 }
  0x87   : > { %p5068_p12 = pnand %p5067_p9, %p5066_p7  ;;  %p5073_p4 = por %p5072_p2, %p5071_p1 }
  0x89   : > { %p5069_p0 = pneg %p5068_p12  ;;  %p5075_p13 = por %p5074_p8, %p5073_p4 }
  0x8b   : > { %p5076_p6 = pnand %p5075_p13, %p5069_p0 }
  0x8d   : > { %5079 = shalt.err (!%p5076_p6)
}
  0x8e   : > { %s5080_s27 = scalar_lea.vmem %s5532_s20, 128  ;;  %s5244_s19 = smov [#allocation4]  }
  0x8f   : > { %p5081_p10 = scmp.ne.s32.totalorder %s5532_s20, %s5080_s27  ;;  %s5085_s17 = sshll.u32 %s5244_s19, 4  ;;  %s5086_s17 = int_to_ptr.vmem [resolvable:$false] %s5085_s17 }
  0x90   : > { %s5087_s10 = scalar_lea.vmem %s5086_s17, 256  ;;  %p5088_p12 = scmp.lt.s32.totalorder %s5532_s20, %s5086_s17 }
  0x91   : > { %p5083_p3 = pnand %p5081_p10, %p5067_p9  ;;  %p5089_p1 = scmp.lt.s32.totalorder %s5087_s10, %s5080_s27 }
  0x93   : > { %p5084_p7 = pneg %p5083_p3  ;;  %p5090_p2 = por %p5089_p1, %p5088_p12 }
  0x95   : > { %p5091_p4 = pnand %p5090_p2, %p5084_p7 }
  0x97   : > { %5094 = shalt.err (!%p5091_p4)
}
  0x98   : > { %s5245_s5 = smov 64   ;;  %s5246_s23 = smov 4  }
  0x99   : > { %4832 = dma.hbm_to_vmem [thread:$0]  (!%p5528_p11), %s5526_s29, 128, %s5532_s20, %s519_s16, %s5245_s5, %s5245_s5, %s5246_s23  }
  0x9a   : > { %s539_s18 = sand.u32 1, %s5235_s26   ;;  %s4305_s15 = sshll.u32 %s5519_s13, 2 }
  0x9b   : > { %s4306_s22 = sshll.u32 %s5235_s26, 6  ;;  %s543_s27 = scalar_lea.vmem [#allocation7], %s4305_s15 }
  0x9c   : > { %s550_s19 = sshll.u32 %s543_s27, 4  ;;  %s5568_s1 = scalar_lea.hbm %s6379_s2, %s4306_s22  ;;  %s551_s19 = int_to_ptr.vmem [resolvable:$true] %s550_s19 }
  0x9d   : > { %s540_s8 = scalar_lea.sflag [#allocation8], %s539_s18  ;;  %s5095_s11 = scalar_lea.hbm %s5568_s1, 64 }
  0x9e   : > { %p5096_p0 = scmp.ne.s32.totalorder %s5568_s1, %s5095_s11  ;;  %s5100_s20 = scalar_lea.hbm %s6379_s2, 128 }
  0x9f   : > { %p5101_p6 = scmp.lt.u32.totalorder %s5568_s1, %s6379_s2  ;;  %p5102_p10 = scmp.lt.u32.totalorder %s5100_s20, %s5095_s11 }
  0xa0   : > { %p5098_p8 = pnand %p5096_p0, %p5067_p9  ;;  %p5104_p7 = scmp.lt.u32.totalorder %s5095_s11, %s5568_s1 }
  0xa1   : > { %p5103_p3 = por %p5102_p10, %p5101_p6 }
  0xa2   : > { %p5099_p13 = pneg %p5098_p8 }
  0xa3   : > { %p5105_p12 = por %p5104_p7, %p5103_p3 }
  0xa5   : > { %p5106_p1 = pnand %p5105_p12, %p5099_p13 }
  0xa7   : > { %5109 = shalt.err (!%p5106_p1)
}
  0xa8   : > { %s5110_s23 = scalar_lea.vmem %s551_s19, 64  ;;  %s5247_s18 = smov [#allocation7]  }
  0xa9   : > { %p5111_p2 = scmp.ne.s32.totalorder %s551_s19, %s5110_s23  ;;  %s5115_s15 = sshll.u32 %s5247_s18, 4  ;;  %s5116_s15 = int_to_ptr.vmem [resolvable:$false] %s5115_s15 }
  0xaa   : > { %s5117_s22 = scalar_lea.vmem %s5116_s15, 128  ;;  %p5118_p8 = scmp.lt.s32.totalorder %s551_s19, %s5116_s15 }
  0xab   : > { %p5113_p4 = pnand %p5111_p2, %p5067_p9  ;;  %p5119_p5 = scmp.lt.s32.totalorder %s5117_s22, %s5110_s23 }
  0xad   : > { %p5114_p0 = pneg %p5113_p4  ;;  %p5120_p6 = por %p5119_p5, %p5118_p8 }
  0xaf   : > { %p5121_p10 = pnand %p5120_p6, %p5114_p0 }
  0xb1   : > { %5124 = shalt.err (!%p5121_p10)
}
  0xb2   : > { %4835 = dma.hbm_to_vmem [thread:$0]  (!%p5528_p11), %s5568_s1, 64, %s551_s19, %s540_s8  }
  0xb3   : > { %p6440_p13 = scmp.ne.s32.totalorder %s6428_s30, 0 }
  0xb4   : > { %s5592_s11 = sand.u32 (!%p6440_p13), 1, %s5227_s24   ;;  %p6441_p5 = scmp.ne.s32.totalorder (!%p6440_p13), %s6425_s28, 0 }
  0xb5   : > { %567 = sbr.rel (%p6440_p13) target bundleno = 1800 (0x708), region = 80  ;;  %s4308_s27 = sshll.u32 (!%p6440_p13), %s5592_s11, 3 }
  0xb6   : > { %s570_s17 = scalar_lea.sflag (!%p6440_p13), [#allocation5], %s5592_s11  ;;  %s5598_s10 = scalar_lea.vmem (!%p6440_p13), [#allocation4], %s4308_s27 }
  0xbc   : > { %5198 = dma.done.wait (%p6441_p5), %s570_s17, 128  }
  0xbd   : > { %5200 = vsyncadd (%p6441_p5), %s570_s17, 4294967168  ;;  %s578_s1 = sand.u32 1, %s5387_s14   ;;  %s4309_s8 = sshll.u32 %s5592_s11, 2 }
  0xbe   : > { %s579_s30 = scalar_lea.sflag [#allocation8], %s578_s1  ;;  %s5606_s21 = scalar_lea.vmem [#allocation7], %s4309_s8 }
  0xbf   : > { %5202 = dma.done.wait (%p6441_p5), %s579_s30, 64  }
  0xc0   : > { %5204 = vsyncadd (%p6441_p5), %s579_s30, 4294967232  ;;  %p6442_p11 = scmp.eq.s32.totalorder %s5387_s14, 0 }
  0xc2   : > { %5206 = dma.done.wait (%p6442_p11), [#allocation8], 288   ;;  %p6443_p9 = pmov %p6442_p11 }
  0xc4   : > { %5208 = vsyncadd (%p6443_p9), [#allocation8], 4294967008  ;;  %p6444_p3 = pmov %p6443_p9 }
  0xc6   : > { %5210 = dma.done.wait (%p6444_p3), [#allocation11], 544   ;;  %p6445_p7 = pmov %p6444_p3 }
  0xc7   : > { %p663_p12 = scmp.lt.s32.totalorder %s5387_s14, 1  ;;  %v5248_v1 = vmov 0.0   ;;  %vm5249_vm0 = vmmov 0   ;;  %s6446_s20 = sld [smem:[#allocation24_spill]]  ;;  %v5648_v4 = vld [vmem:[%s5598_s10] sm:$0xff]   ;;  %vm697_vm1 = vcmask 261120   ;;  %v2390_v61 = vlaneseq }
  0xc8   : > { %5212 = vsyncadd (%p6445_p7), [#allocation11], 4294966752  ;;  %4522 = vmatprep.subr.bf16.mxu0 %v5248_v1  ;;  %4526 = vmatprep.mubr.msk.bf16.mxu0 %vm5249_vm0, %v5248_v1  ;;  %s5250_s5 = smov 127   ;;  %s5251_s23 = smov 126   ;;  %v5652_v5 = vld [vmem:[%s5606_s21] sm:$0xf] }
  0xc9   : > { %s5625_s28 = scalar_select %p663_p12, %s5387_s14, 1  ;;  %4594 = vmatprep.subr.bf16.mxu1 %v5248_v1  ;;  %4596 = vmatprep.mubr.msk.bf16.mxu1 %vm5249_vm0, %v5248_v1  ;;  %v4359_v6 = vcombine.low %v5652_v5, %v5652_v5  ;;  %v4318_v11 = vld [vmem:[%s6381_s4 + $0x2] sm:$0x3]  ;;  %v678_v17 = vld [vmem:[%s6381_s4] sm:$0x3]  ;;  %vm1166_vm2 = vcmask 130048  }
  0xca   : > { %s5252_s18 = smov 124   ;;  %s5253_s15 = smov 123   ;;  %v4323_v23 = vld [vmem:[%s6381_s4 + $0x4] sm:$0x3]  ;;  %v1157_v25 = vld [vmem:[#allocation9 + $0x2] sm:$0x3] }
  0xcb   : > { %s4456_s19 = sshll.u32 %s5625_s28, 4  ;;  %s5254_s22 = smov 122   ;;  %v4325_v28 = vld [vmem:[%s6381_s4 + $0x6] sm:$0x3]  ;;  %v1155_v29 = vld [vmem:[#allocation9] sm:$0x3] }
  0xcc   : > { %s5255_s17 = smov 120   ;;  %s5256_s1 = smov 119   ;;  %v4327_v31 = vld [vmem:[%s6381_s4 + $0x8] sm:$0x3]  ;;  %v1255_v32 = vld [vmem:[#allocation9 + $0x4] sm:$0x3] }
  0xcd   : > { %s667_s16 = scalar_lea.vmem %s6446_s20, %s4456_s19  ;;  %s5257_s8 = smov 118   ;;  %v4329_v35 = vld [vmem:[%s6381_s4 + $0xa] sm:$0x3]  ;;  %v1304_v36 = vld [vmem:[#allocation9 + $0x6] sm:$0x3]  ;;  %v5266_v52 = vmov 0  }
  0xce   : > { %v4922_v2 = vld [vmem:[%s667_s16] sm:$0xff]   ;;  %v5634_v3 = vld [vmem:[%s667_s16 + $0x8] sm:$0xff]   ;;  %s5258_s30 = smov 121   ;;  %s5259_s10 = smov 116   ;;  %v4335_v45 = vld [vmem:[%s6381_s4 + $0x10] sm:$0x3]  ;;  %4920 = vset.pattern.permute.xlu0 %v5266_v52  ;;  %4921 = vset.pattern.permute.xlu1 %v5266_v52 }
  0xcf   : > { %691 = vrot.lane.b32.xlu0 %v4922_v2, %s5250_s5  ;;  %788 = vrot.lane.b32.xlu1 %v4922_v2, %s5251_s23  ;;  %s5260_s21 = smov 115   ;;  %s5261_s19 = smov 114   ;;  %v4331_v38 = vld [vmem:[%s6381_s4 + $0xc] sm:$0x3]  ;;  %v1353_v39 = vld [vmem:[#allocation9 + $0x8] sm:$0x3] }
  0xd0   : > { %s5262_s20 = smov 117   ;;  %s5263_s16 = smov 107   ;;  %v4333_v41 = vld [vmem:[%s6381_s4 + $0xe] sm:$0x3]  ;;  %v1402_v42 = vld [vmem:[#allocation9 + $0xa] sm:$0x3] }
  0xd1   : > { %v4928_v44 = vld [vmem:[#allocation10 + $0x4] ss:$8 sps:$4 sm:$0xff]   ;;  %v4926_v46 = vld [vmem:[#allocation10] ss:$8 sps:$4 sm:$0xff]   ;;  %v1451_v47 = vld [vmem:[#allocation9 + $0xc] sm:$0x3] }
  0xd2   : > { %v1500_v49 = vld [vmem:[#allocation9 + $0xe] sm:$0x3]  ;;  %v1549_v51 = vld [vmem:[#allocation9 + $0x10] sm:$0x3]  ;;  %v4929_v53 = vld [vmem:[%s6386_s9] ss:$8 sps:$4 sm:$0xff]  }
  0xd3   : > { %693 = vrot.lane.b32.xlu0 %v5634_v3, %s5250_s5  ;;  %790 = vrot.lane.b32.xlu1 %v5634_v3, %s5251_s23  ;;  %v4931_v54 = vld [vmem:[%s6386_s9 + $0x4] ss:$8 sps:$4 sm:$0xff]   ;;  %v4934_v55 = vld [vmem:[%s6386_s9 + $0x14] ss:$8 sps:$4 sm:$0xff]   ;;  %vm1632_vm3 = vcmask 1041408   ;;  %v5812_v0 = vshrl.u32 %v2390_v61, 7 }
  0xd4   : > { %v4932_v56 = vld [vmem:[%s6386_s9 + $0x10] ss:$8 sps:$4 sm:$0xff]   ;;  %v1602_v57 = vld [vmem:[%s6386_s9 + $0x20] sm:$0x33]  ;;  %v5267_v62 = vmov 1983009808  }
  0xd5   : > { %v4352_v58 = vcombine.high %v1602_v57, %v1602_v57  ;;  %v4351_v59 = vcombine.low %v1602_v57, %v1602_v57  ;;  %v2408_v63 = vunpack.c.l.s4 %v5267_v62  ;;  %vm1747_vm4 = vcmask 1043456   ;;  %s5271_s13 = smov 96   ;;  %p6455_p2 = scmp.ne.s32.totalorder %s6437_s7, 0 }
  0xd6   : > { %vm1743_vm5 = vcmask 64512   ;;  %vm1628_vm6 = vcmask 293888   ;;  %vm2428_vm7 = vcmask 1039360   ;;  %vm2524_vm8 = vcmask 1031168  }
  0xd7   : > { %840 = vrot.lane.b32.xlu0 %v4922_v2, %s5252_s18  ;;  %842 = vrot.lane.b32.xlu1 %v5634_v3, %s5252_s18  ;;  %s5264_s18 = smov 108   ;;  %v1634_v60 = vsel %vm1632_vm3, %v4351_v59, 0  ;;  %vm2620_vm9 = vcmask 916480   ;;  %vm2716_vm10 = vcmask 908288   ;;  %vm2812_vm11 = vcmask 900096  }
  0xd8   : > { %vm2908_vm12 = vcmask 785408   ;;  %vm3004_vm13 = vcmask 777216   ;;  %vm2337_vm14 = vcmask 31744   ;;  %vm3100_vm15 = vcmask 769024  }
  0xdb   : > { %892 = vrot.lane.b32.xlu0 %v4922_v2, %s5253_s15  ;;  %894 = vrot.lane.b32.xlu1 %v5634_v3, %s5253_s15  ;;  %s6450_s15 = sld [smem:[#allocation31_spill]] }
  0xdf   : > { %944 = vrot.lane.b32.xlu0 %v4922_v2, %s5254_s22  ;;  %946 = vrot.lane.b32.xlu1 %v5634_v3, %s5254_s22 }
  0xe3   : > { %996 = vrot.lane.b32.xlu0 %v4922_v2, %s5255_s17  ;;  %998 = vrot.lane.b32.xlu1 %v5634_v3, %s5255_s17 }
  0xe7   : > { %1048 = vrot.lane.b32.xlu0 %v4922_v2, %s5256_s1  ;;  %1050 = vrot.lane.b32.xlu1 %v5634_v3, %s5256_s1  ;;  %s6407_s1 = smov 95  }
  0xeb   : > { %1100 = vrot.lane.b32.xlu0 %v4922_v2, %s5257_s8  ;;  %1102 = vrot.lane.b32.xlu1 %v5634_v3, %s5257_s8 }
  0xef   : > { %1163 = vrot.lane.b32.xlu0 %v5648_v4, %s5250_s5  ;;  %1256 = vrot.lane.b32.xlu1 %v5648_v4, %s5251_s23 }
  0xf3   : > { %1305 = vrot.lane.b32.xlu1 %v5648_v4, %s5254_s22  ;;  %1741 = vrot.lane.b32.xlu0 %v4359_v6, %s5250_s5  ;;  %s6451_s22 = smov 110  }
  0xf7   : > { %1354 = vrot.lane.b32.xlu0 %v5648_v4, %s5258_s30  ;;  %1839 = vrot.lane.b32.xlu1 %v4359_v6, %s5251_s23  ;;  %s5269_s30 = smov 111  }
  0xfb   : > { %1403 = vrot.lane.b32.xlu0 %v5648_v4, %s5255_s17  ;;  %1890 = vrot.lane.b32.xlu1 %v4359_v6, %s5257_s8  ;;  %s5265_s17 = smov 106   ;;  %s5268_s8 = smov 112  }
  0xff   : > { %1452 = vrot.lane.b32.xlu0 %v5648_v4, %s5259_s10  ;;  %1941 = vrot.lane.b32.xlu1 %v4359_v6, %s5262_s20  ;;  %s5275_s20 = smov [#allocation13]  }
 0x103   : > { %1501 = vrot.lane.b32.xlu0 %v5648_v4, %s5260_s21  ;;  %1992 = vrot.lane.b32.xlu1 %v4359_v6, %s5259_s10  ;;  %s6453_s10 = smov 95   ;;  %s6454_s21 = sld [smem:[#allocation33_spill]] }
 0x107   : > { %1550 = vrot.lane.b32.xlu0 %v5648_v4, %s5261_s19  ;;  %2043 = vrot.lane.b32.xlu1 %v4359_v6, %s5264_s18  ;;  %s4798_s18 = smul.u32 6, %s5625_s28  ;;  %s6411_s19 = smov 110  }
 0x108   : > { %s6449_s28 = sld [smem:[#allocation32_spill]] }
 0x10b   : > { %2094 = vrot.lane.b32.xlu0 %v4359_v6, %s5263_s16  ;;  %2145 = vrot.lane.b32.xlu1 %v4359_v6, %s5265_s17  ;;  %s5809_s17 = scalar_lea.vmem %s6380_s3, %s4798_s18  ;;  %s6447_s16 = sld [smem:[#allocation29_spill]] }
 0x10c   : > { %s6409_s18 = smov 94  }
 0x141   : > { %v692_v7 = vpop.permute.xlu0 %691  ;;  %v789_v8 = vpop.permute.xlu1 %788 }
 0x142   : > { %4523 = vmatpush3.bf16.msra.mxu0 %v692_v7 }
 0x143   : > { %4524 = vmatprep.subr.bf16.mxu0 %v5248_v1 }
 0x145   : > { %v694_v9 = vpop.permute.xlu0 %693  ;;  %v791_v10 = vpop.permute.xlu1 %790 }
 0x146   : > { %4525 = vmatpush3.bf16.msra.mxu0 %v694_v9 }
 0x147   : > { %4530 = vmatprep.subr.bf16.mxu0 %v5248_v1 }
 0x149   : > { %4527 = vmatmul.mubr.msk.bf16.vlgmr.msra.gmra.mrb[0].mxu0 %vm697_vm1, %v4318_v11  ;;  %v841_v12 = vpop.permute.xlu0 %840  ;;  %v843_v13 = vpop.permute.xlu1 %842 }
 0x14a   : > { %4531 = vmatpush3.bf16.msra.mxu0 %v4922_v2  ;;  %4534 = vmatprep.mubr.msk.bf16.mxu0 %vm5249_vm0, %v5248_v1  ;;  %v2409_v2 = vunpack.c.0.s8 %v2408_v63  ;;  %v2882_v63 = vld [vmem:[%s5809_s17] sm:$0x3f] }
 0x14b   : > { %4532 = vmatprep.subr.bf16.mxu0 %v5248_v1 }
 0x14d   : > { %v893_v14 = vpop.permute.xlu0 %892  ;;  %v895_v16 = vpop.permute.xlu1 %894 }
 0x14e   : > { %4533 = vmatpush3.bf16.msra.mxu0 %v5634_v3  ;;  %v2402_v3 = vld [vmem:[%s5809_s17] sm:$0x3f] }
 0x14f   : > { %4538 = vmatprep.subr.bf16.mxu0 %v5248_v1  ;;  %v2406_v6 = vcombine.high %v2402_v3, %v2402_v3 }
 0x151   : > { %v945_v15 = vpop.permute.xlu0 %944  ;;  %v947_v19 = vpop.permute.xlu1 %946 }
 0x155   : > { %4535 = vmatmul.mubr.msk.bf16.vlgmr.msra.gmra.mrb[0].mxu0 %vm697_vm1, %v678_v17  ;;  %v997_v18 = vpop.permute.xlu0 %996  ;;  %v999_v22 = vpop.permute.xlu1 %998  ;;  %v1795_v17 = vsel %vm1747_vm4, %v5652_v5, 0 }
 0x156   : > { %4539 = vmatpush3.bf16.msra.mxu0 %v789_v8  ;;  %4542 = vmatprep.mubr.msk.bf16.mxu0 %vm5249_vm0, %v5248_v1 }
 0x157   : > { %4540 = vmatprep.subr.bf16.mxu0 %v5248_v1 }
 0x159   : > { %v5686_v20 = vpop.permute.xlu0 %1048  ;;  %v1051_v26 = vpop.permute.xlu1 %1050 }
 0x15a   : > { %4541 = vmatpush3.bf16.msra.mxu0 %v791_v10 }
 0x15b   : > { %4546 = vmatprep.subr.bf16.mxu0 %v5248_v1 }
 0x15d   : > { %v5689_v21 = vpop.permute.xlu0 %1100  ;;  %v5705_v27 = vpop.permute.xlu1 %1102 }
 0x161   : > { %4543 = vmatmul.mubr.msk.bf16.vlgmr.msra.gmra.mrb[0].mxu0 %vm697_vm1, %v4323_v23  ;;  %v1164_v24 = vpop.permute.xlu0 %1163  ;;  %v1257_v30 = vpop.permute.xlu1 %1256 }
 0x162   : > { %4595 = vmatpush3.bf16.msra.mxu1 %v1164_v24  ;;  %4547 = vmatpush3.bf16.msra.mxu0 %v841_v12 }
 0x163   : > { %4548 = vmatprep.subr.bf16.mxu0 %v5248_v1  ;;  %4550 = vmatprep.mubr.msk.bf16.mxu0 %vm5249_vm0, %v5248_v1 }
 0x164   : > { %4600 = vmatprep.subr.bf16.mxu1 %v5248_v1 }
 0x165   : > { %4597 = vmatmul.mubr.msk.bf16.vlgmr.msra.gmra.mrb[0].mxu1 %vm1166_vm2, %v1157_v25  ;;  %v1306_v33 = vpop.permute.xlu1 %1305  ;;  %v5731_v34 = vpop.permute.xlu0 %1741 }
 0x166   : > { %4549 = vmatpush3.bf16.msra.mxu0 %v843_v13  ;;  %4601 = vmatpush3.bf16.msra.mxu1 %v5648_v4  ;;  %v5816_v4 = vsub.s32 %v2409_v2, %v5812_v0  ;;  %v1749_v11 = vsel %vm1747_vm4, %v5731_v34, 0 }
 0x167   : > { %4602 = vmatprep.mubr.msk.bf16.mxu1 %vm5249_vm0, %v5248_v1  ;;  %4554 = vmatprep.subr.bf16.mxu0 %v5248_v1 }
 0x168   : > { %4606 = vmatprep.subr.bf16.mxu1 %v5248_v1  ;;  %v2413_v7 = vrot.slane %v2402_v3, %v5816_v4  ;;  %v2420_v9 = vrot.slane %v2406_v6, %v5816_v4  ;;  %v2893_v3 = vrot.slane %v2882_v63, %v5816_v4 }
 0x169   : > { %v1355_v37 = vpop.permute.xlu0 %1354 }
 0x16a   : > { %2422 = vrot.lane.b32.xlu0 %v2413_v7, %s5250_s5  ;;  %v2421_v8 = vcombine.high %v2413_v7, %v2413_v7  ;;  %v2886_v7 = vcombine.high %v2882_v63, %v2882_v63 }
 0x16c   : > { %2424 = vrot.lane.b32.xlu1 %v2421_v8, %s5250_s5  ;;  %v2900_v8 = vrot.slane %v2886_v7, %v5816_v4 }
 0x16d   : > { %4551 = vmatmul.mubr.msk.bf16.vlgmr.msra.gmra.mrb[0].mxu0 %vm697_vm1, %v4325_v28  ;;  %v1404_v40 = vpop.permute.xlu0 %1403 }
 0x16e   : > { %4555 = vmatpush3.bf16.msra.mxu0 %v893_v14  ;;  %4558 = vmatprep.mubr.msk.bf16.mxu0 %vm5249_vm0, %v5248_v1 }
 0x16f   : > { %4556 = vmatprep.subr.bf16.mxu0 %v5248_v1  ;;  %2426 = vrot.lane.b32.xlu0 %v2420_v9, %s5250_s5  ;;  %v2901_v9 = vcombine.high %v2893_v3, %v2893_v3 }
 0x171   : > { %4603 = vmatmul.mubr.msk.bf16.vlgmr.msra.gmra.mrb[0].mxu1 %vm1166_vm2, %v1155_v29  ;;  %v1453_v43 = vpop.permute.xlu0 %1452  ;;  %v4364_v29 = vld [vmem:[%s6383_s6 + $0x6] sm:$0x3] }
 0x172   : > { %4557 = vmatpush3.bf16.msra.mxu0 %v895_v16  ;;  %4607 = vmatpush3.bf16.msra.mxu1 %v1257_v30  ;;  %v4358_v16 = vld [vmem:[%s6383_s6 + $0x2] sm:$0x3] }
 0x173   : > { %4608 = vmatprep.mubr.msk.bf16.mxu1 %vm5249_vm0, %v5248_v1  ;;  %4562 = vmatprep.subr.bf16.mxu0 %v5248_v1 }
 0x174   : > { %4612 = vmatprep.subr.bf16.mxu1 %v5248_v1 }
 0x175   : > { %v1502_v48 = vpop.permute.xlu0 %1501 }
 0x179   : > { %4559 = vmatmul.mubr.msk.bf16.vlgmr.msra.gmra.mrb[0].mxu0 %vm697_vm1, %v4327_v31  ;;  %v1551_v50 = vpop.permute.xlu0 %1550 }
 0x17a   : > { %4563 = vmatpush3.bf16.msra.mxu0 %v945_v15  ;;  %4566 = vmatprep.mubr.msk.bf16.mxu0 %vm5249_vm0, %v5248_v1 }
 0x17b   : > { %4564 = vmatprep.subr.bf16.mxu0 %v5248_v1 }
 0x17d   : > { %4609 = vmatmul.mubr.msk.bf16.vlgmr.msra.gmra.mrb[0].mxu1 %vm1166_vm2, %v1255_v32  ;;  %v4366_v32 = vld [vmem:[%s6383_s6 + $0x8] sm:$0x3] }
 0x17e   : > { %4565 = vmatpush3.bf16.msra.mxu0 %v947_v19  ;;  %4613 = vmatpush3.bf16.msra.mxu1 %v1306_v33  ;;  %v1735_v19 = vld [vmem:[%s6383_s6] sm:$0x3] }
 0x17f   : > { %4614 = vmatprep.mubr.msk.bf16.mxu1 %vm5249_vm0, %v5248_v1  ;;  %4570 = vmatprep.subr.bf16.mxu0 %v5248_v1 }
 0x180   : > { %4618 = vmatprep.subr.bf16.mxu1 %v5248_v1 }
 0x185   : > { %4567 = vmatmul.mubr.msk.bf16.vlgmr.msra.gmra.mrb[0].mxu0 %vm697_vm1, %v4329_v35  ;;  %v4368_v35 = vld [vmem:[%s6383_s6 + $0xa] sm:$0x3] }
 0x186   : > { %4571 = vmatpush3.bf16.msra.mxu0 %v997_v18  ;;  %4574 = vmatprep.mubr.msk.bf16.mxu0 %vm5249_vm0, %v5248_v1  ;;  %v1840_v18 = vpop.permute.xlu1 %1839 }
 0x187   : > { %4572 = vmatprep.subr.bf16.mxu0 %v5248_v1 }
 0x189   : > { %4615 = vmatmul.mubr.msk.bf16.vlgmr.msra.gmra.mrb[0].mxu1 %vm1166_vm2, %v1304_v36 }
 0x18a   : > { %4573 = vmatpush3.bf16.msra.mxu0 %v999_v22  ;;  %4619 = vmatpush3.bf16.msra.mxu1 %v1355_v37  ;;  %v1891_v23 = vpop.permute.xlu1 %1890  ;;  %v2095_v37 = vpop.permute.xlu0 %2094 }
 0x18b   : > { %4620 = vmatprep.mubr.msk.bf16.mxu1 %vm5249_vm0, %v5248_v1  ;;  %4578 = vmatprep.subr.bf16.mxu0 %v5248_v1 }
 0x18c   : > { %4624 = vmatprep.subr.bf16.mxu1 %v5248_v1 }
 0x18e   : > { %v1942_v28 = vpop.permute.xlu1 %1941 }
 0x18f   : > { %v1947_v30 = vsel %vm1747_vm4, %v1942_v28, 0  ;;  %v4957_v28 = vld [vmem:[%s6447_s16 + $0x40] ss:$8 sps:$4 sm:$0xff]  }
 0x191   : > { %4575 = vmatmul.mubr.msk.bf16.vlgmr.msra.gmra.mrb[0].mxu0 %vm697_vm1, %v4331_v38  ;;  %v4370_v38 = vld [vmem:[%s6383_s6 + $0xc] sm:$0x3] }
 0x192   : > { %4579 = vmatpush3.bf16.msra.mxu0 %v5686_v20  ;;  %4582 = vmatprep.mubr.msk.bf16.mxu0 %vm5249_vm0, %v5248_v1  ;;  %v1845_v20 = vsel %vm1747_vm4, %v1840_v18, 0  ;;  %v1993_v31 = vpop.permute.xlu1 %1992 }
 0x193   : > { %4580 = vmatprep.subr.bf16.mxu0 %v5248_v1  ;;  %v1998_v33 = vsel %vm1747_vm4, %v1993_v31, 0  ;;  %v4960_v31 = vld [vmem:[%s6447_s16 + $0x50] ss:$8 sps:$4 sm:$0xff]  }
 0x195   : > { %4621 = vmatmul.mubr.msk.bf16.vlgmr.msra.gmra.mrb[0].mxu1 %vm1166_vm2, %v1353_v39  ;;  %v2100_v39 = vsel %vm1747_vm4, %v2095_v37, 0  ;;  %v5983_v37 = vld.sshfl [vmem:[%s5809_s17] sm:$0x33 pattern:$0x76325410] }
 0x196   : > { %4581 = vmatpush3.bf16.msra.mxu0 %v1051_v26  ;;  %4625 = vmatpush3.bf16.msra.mxu1 %v1404_v40  ;;  %v4362_v26 = vld [vmem:[%s6383_s6 + $0x4] sm:$0x3]  ;;  %v2044_v34 = vpop.permute.xlu1 %2043 }
 0x197   : > { %4626 = vmatprep.mubr.msk.bf16.mxu1 %vm5249_vm0, %v5248_v1  ;;  %4586 = vmatprep.subr.bf16.mxu0 %v5248_v1  ;;  %v2049_v36 = vsel %vm1747_vm4, %v2044_v34, 0  ;;  %v2498_v40 = vld [vmem:[%s5809_s17] sm:$0x3f] }
 0x198   : > { %4630 = vmatprep.subr.bf16.mxu1 %v5248_v1 }
 0x19d   : > { %4583 = vmatmul.mubr.msk.bf16.vlgmr.msra.gmra.mrb[0].mxu0 %vm697_vm1, %v4333_v41  ;;  %v2509_v41 = vrot.slane %v2498_v40, %v5816_v4 }
 0x19e   : > { %4587 = vmatpush3.bf16.msra.mxu0 %v5689_v21  ;;  %4590 = vmatprep.mubr.msk.bf16.mxu0 %vm5249_vm0, %v5248_v1 }
 0x19f   : > { %4588 = vmatprep.subr.bf16.mxu0 %v5248_v1  ;;  %2518 = vrot.lane.b32.xlu1 %v2509_v41, %s5251_s23 }
 0x1a1   : > { %4627 = vmatmul.mubr.msk.bf16.vlgmr.msra.gmra.mrb[0].mxu1 %vm1166_vm2, %v1402_v42  ;;  %v2502_v42 = vcombine.high %v2498_v40, %v2498_v40 }
 0x1a2   : > { %4589 = vmatpush3.bf16.msra.mxu0 %v5705_v27  ;;  %4631 = vmatpush3.bf16.msra.mxu1 %v1453_v43  ;;  %v1896_v27 = vsel %vm1747_vm4, %v1891_v23, 0  ;;  %v4951_v23 = vld [vmem:[%s6447_s16 + $0x20] ss:$8 sps:$4 sm:$0xff]  }
 0x1a3   : > { %4632 = vmatprep.mubr.msk.bf16.mxu1 %vm5249_vm0, %v5248_v1  ;;  %4636 = vmatprep.subr.bf16.mxu1 %v5248_v1  ;;  %v2516_v43 = vrot.slane %v2502_v42, %v5816_v4 }
 0x1a4   : > { %1693 = vmatprep.subr.bf16.mxu0 %v4928_v44  ;;  %v2517_v44 = vcombine.high %v2509_v41, %v2509_v41 }
 0x1a5   : > { %2522 = vrot.lane.b32.xlu1 %v2516_v43, %s5251_s23 }
 0x1a6   : > { %2520 = vrot.lane.b32.xlu0 %v2517_v44, %s5251_s23 }
 0x1a9   : > { %4591 = vmatmul.mubr.msk.bf16.vlgmr.msra.gmra.mrb[0].mxu0 %vm697_vm1, %v4335_v45  ;;  %v2594_v45 = vld [vmem:[%s5809_s17] sm:$0x3f]  ;;  %vm3185_vm1 = vcmask 1043458  }
 0x1aa   : > { %1694 = vmatpush1.bf16.msra.mxu0 %v4926_v46  ;;  %1725 = vmatprep.mubr.bf16.mxu0 %v5266_v52  ;;  %v2146_v46 = vpop.permute.xlu1 %2145 }
 0x1ab   : > { %4648 = vmatprep.subr.bf16.mxu0 %v5248_v1 }
 0x1ad   : > { %4633 = vmatmul.mubr.msk.bf16.vlgmr.msra.gmra.mrb[0].mxu1 %vm1166_vm2, %v1451_v47  ;;  %v2605_v47 = vrot.slane %v2594_v45, %v5816_v4 }
 0x1ae   : > { %4637 = vmatpush3.bf16.msra.mxu1 %v1502_v48  ;;  %4638 = vmatprep.mubr.msk.bf16.mxu1 %vm5249_vm0, %v5248_v1  ;;  %v4372_v48 = vld [vmem:[%s6383_s6 + $0xe] sm:$0x3] }
 0x1af   : > { %4642 = vmatprep.subr.bf16.mxu1 %v5248_v1  ;;  %2614 = vrot.lane.b32.xlu0 %v2605_v47, %s5268_s8 }
 0x1b9   : > { %4639 = vmatmul.mubr.msk.bf16.vlgmr.msra.gmra.mrb[0].mxu1 %vm1166_vm2, %v1500_v49  ;;  %v2613_v49 = vcombine.high %v2605_v47, %v2605_v47 }
 0x1ba   : > { %4643 = vmatpush3.bf16.msra.mxu1 %v1551_v50  ;;  %4644 = vmatprep.mubr.msk.bf16.mxu1 %vm5249_vm0, %v5248_v1  ;;  %v2690_v50 = vld [vmem:[%s5809_s17] sm:$0x3f] }
 0x1bb   : > { %1639 = vmatprep.subr.bf16.mxu1 %v4931_v54  ;;  %2616 = vrot.lane.b32.xlu1 %v2613_v49, %s5268_s8  ;;  %v2701_v54 = vrot.slane %v2690_v50, %v5816_v4 }
 0x1bf   : > { %2710 = vrot.lane.b32.xlu1 %v2701_v54, %s5269_s30 }
 0x1c5   : > { %4645 = vmatmul.mubr.msk.bf16.vlgmr.msra.gmra.mrb[0].mxu1 %vm1166_vm2, %v1549_v51  ;;  %v2151_v51 = vsel %vm1747_vm4, %v2146_v46, 0  ;;  %vm3186_vm4 = vmor %vm3185_vm1, %vm1632_vm3 }
 0x1c6   : > { %1671 = vmatprep.mubr.bf16.mxu1 %v5266_v52  ;;  %1640 = vmatpush1.bf16.msra.mxu1 %v4929_v53  ;;  %v2598_v53 = vcombine.high %v2594_v45, %v2594_v45 }
 0x1c7   : > { %1641 = vmatprep.subr.bf16.mxu1 %v4934_v55  ;;  %v2694_v55 = vcombine.high %v2690_v50, %v2690_v50 }
 0x1c8   : > { %v2612_v57 = vrot.slane %v2598_v53, %v5816_v4 }
 0x1ca   : > { %1642 = vmatpush1.bf16.msra.mxu1 %v4932_v56  ;;  %v2786_v56 = vld [vmem:[%s5809_s17] sm:$0x3f]  ;;  %2618 = vrot.lane.b32.xlu0 %v2612_v57, %s5268_s8 }
 0x1cb   : > { %4353 = vmatprep.subr.msk.bf16.mxu1 %vm1632_vm3, %v4352_v58  ;;  %v2708_v58 = vrot.slane %v2694_v55, %v5816_v4  ;;  %v2797_v59 = vrot.slane %v2786_v56, %v5816_v4  ;;  %v2790_v2 = vcombine.high %v2786_v56, %v2786_v56 }
 0x1cd   : > { %2714 = vrot.lane.b32.xlu1 %v2708_v58, %s5269_s30  ;;  %v2805_v62 = vcombine.high %v2797_v59, %v2797_v59  ;;  %v2804_v6 = vrot.slane %v2790_v2, %v5816_v4 }
 0x1ce   : > { %1644 = vmatpush1.bf16.msra.mxu1 %v1634_v60  ;;  %v2709_v60 = vcombine.high %v2701_v54, %v2701_v54 }
 0x1d0   : > { %2712 = vrot.lane.b32.xlu0 %v2709_v60, %s5269_s30 }
 0x1d1   : > { %2808 = vrot.lane.b32.xlu1 %v2805_v62, %s6411_s19 }
 0x1d4   : > { %2806 = vrot.lane.b32.xlu0 %v2797_v59, %s6411_s19 }
 0x1d5   : > { %2902 = vrot.lane.b32.xlu1 %v2893_v3, %s5271_s13 }
 0x1d8   : > { %2810 = vrot.lane.b32.xlu0 %v2804_v6, %s6411_s19  ;;  %s6158_s19 = scalar_lea.vmem [#allocation13], %s4308_s27 }
 0x1d9   : > { %2906 = vrot.lane.b32.xlu1 %v2900_v8, %s5271_s13 }
 0x1dc   : > { %2904 = vrot.lane.b32.xlu0 %v2901_v9, %s5271_s13 }
 0x27c   : > { %v1143_v10 = vpop.f32.mrb[0].mxu0 }
 0x27d   : > { %v1150_v12 = vpack.c.bf16 %v1143_v10, %v1143_v10  ;;  %v4592_v13 = vpop.f32.mrb[1].mxu0  ;;  %v2978_v10 = vld [vmem:[%s5809_s17] sm:$0x3f] }
 0x27e   : > { %v1146_v14 = vpop.f32.mrb[2].mxu0  ;;  %v4945_v13 = vld [vmem:[%s6447_s16] ss:$8 sps:$4 sm:$0xff]  }
 0x27f   : > { %v4593_v15 = vpop.f32.mrb[3].mxu0  ;;  %4357 = vmatmul.mubr.msk.bf16.vlgmr.msra.gmra.mrb[4].mxu0 %vm1166_vm2, %v1150_v12  ;;  %v3074_v12 = vld [vmem:[%s5809_s17] sm:$0x3f]  ;;  %vm3187_vm2 = vcmask 275460   ;;  %s4105_s17 = sshll.u32 %s6158_s19, 4  ;;  %s4106_s17 = int_to_ptr.vmem [resolvable:$true] %s4105_s17 }
 0x280   : > { %4649 = vmatpush3.bf16.msra.mxu0 %v1749_v11  ;;  %4650 = vmatprep.mubr.msk.bf16.mxu0 %vm5249_vm0, %v5248_v1  ;;  %v2989_v11 = vrot.slane %v2978_v10, %v5816_v4  ;;  %v2982_v15 = vcombine.high %v2978_v10, %v2978_v10  ;;  %v3085_v18 = vrot.slane %v3074_v12, %v5816_v4  ;;  %s5125_s27 = scalar_lea.vmem %s4106_s17, 128 }
 0x281   : > { %4654 = vmatprep.subr.bf16.mxu0 %v5248_v1  ;;  %p5126_p1 = scmp.ne.s32.totalorder %s4106_s17, %s5125_s27 }
 0x282   : > { %v2997_v14 = vcombine.high %v2989_v11, %v2989_v11  ;;  %2998 = vrot.lane.b32.xlu0 %v2989_v11, %s6407_s1 }
 0x283   : > { %p5127_p4 = pnand %p5126_p1, %p6455_p2 }
 0x284   : > { %3000 = vrot.lane.b32.xlu1 %v2997_v14, %s6407_s1 }
 0x285   : > { %p5128_p0 = pneg %p5127_p4 }
 0x287   : > { %4651 = vmatmul.mubr.msk.bf16.vlgmr.msra.gmra.mrb[8].mxu0 %vm1743_vm5, %v4358_v16  ;;  %v4947_v16 = vld [vmem:[%s6447_s16 + $0x4] ss:$8 sps:$4 sm:$0xff]  }
 0x288   : > { %4655 = vmatpush3.bf16.msra.mxu0 %v1795_v17  ;;  %4656 = vmatprep.mubr.msk.bf16.mxu0 %vm5249_vm0, %v5248_v1  ;;  %v4950_v17 = vld [vmem:[%s6447_s16 + $0x14] ss:$8 sps:$4 sm:$0xff]  }
 0x289   : > { %4660 = vmatprep.subr.bf16.mxu0 %v5248_v1  ;;  %2283 = vmatprep.subr.bf16.mxu1 %v4947_v16 }
 0x28a   : > { %3094 = vrot.lane.b32.xlu1 %v3085_v18, %s6409_s18 }
 0x293   : > { %4657 = vmatmul.mubr.msk.bf16.vlgmr.msra.gmra.mrb[8].mxu0 %vm1743_vm5, %v1735_v19  ;;  %v3078_v19 = vcombine.high %v3074_v12, %v3074_v12 }
 0x294   : > { %4661 = vmatpush3.bf16.msra.mxu0 %v1845_v20  ;;  %4662 = vmatprep.mubr.msk.bf16.mxu0 %vm5249_vm0, %v5248_v1  ;;  %v4948_v20 = vld [vmem:[%s6447_s16 + $0x10] ss:$8 sps:$4 sm:$0xff]  }
 0x295   : > { %4666 = vmatprep.subr.bf16.mxu0 %v5248_v1 }
 0x298   : > { %v1590_v5 = vpop.f32.mrb[0].mxu1 }
 0x299   : > { %v1597_v21 = vpack.c.bf16 %v1590_v5, %v1590_v5  ;;  %v4646_v22 = vpop.f32.mrb[1].mxu1  ;;  %v2996_v5 = vrot.slane %v2982_v15, %v5816_v4 }
 0x29a   : > { %v1593_v24 = vpop.f32.mrb[2].mxu1  ;;  %v3092_v22 = vrot.slane %v3078_v19, %v5816_v4 }
 0x29b   : > { %4354 = vmatmul.mubr.msk.bf16.vlgmr.msra.gmra.mrb[4].mxu1 %vm1628_vm6, %v1597_v21  ;;  %v4647_v25 = vpop.f32.mrb[3].mxu1  ;;  %v4953_v21 = vld [vmem:[%s6447_s16 + $0x24] ss:$8 sps:$4 sm:$0xff]   ;;  %3002 = vrot.lane.b32.xlu0 %v2996_v5, %s6407_s1  ;;  %v3093_v24 = vcombine.high %v3085_v18, %v3085_v18  ;;  %s6448_s1 = sld [smem:[#allocation27_spill]]  ;;  %vm3208_vm6 = vcmask 1041544  }
 0x29c   : > { %2315 = vmatprep.mubr.bf16.mxu1 %v5266_v52  ;;  %2284 = vmatpush1.bf16.msra.mxu1 %v4945_v13  ;;  %v4956_v25 = vld [vmem:[%s6447_s16 + $0x34] ss:$8 sps:$4 sm:$0xff]  }
 0x29d   : > { %2285 = vmatprep.subr.bf16.mxu1 %v4950_v17  ;;  %3098 = vrot.lane.b32.xlu1 %v3092_v22, %s6409_s18 }
 0x29f   : > { %4663 = vmatmul.mubr.msk.bf16.vlgmr.msra.gmra.mrb[8].mxu0 %vm1743_vm5, %v4362_v26  ;;  %v4954_v26 = vld [vmem:[%s6447_s16 + $0x30] ss:$8 sps:$4 sm:$0xff]   ;;  %3096 = vrot.lane.b32.xlu0 %v3093_v24, %s6409_s18  ;;  %s5274_s18 = smov 17  }
 0x2a0   : > { %4667 = vmatpush3.bf16.msra.mxu0 %v1896_v27  ;;  %4668 = vmatprep.mubr.msk.bf16.mxu0 %vm5249_vm0, %v5248_v1  ;;  %v4959_v27 = vld [vmem:[%s6447_s16 + $0x44] ss:$8 sps:$4 sm:$0xff]  }
 0x2a1   : > { %4672 = vmatprep.subr.bf16.mxu0 %v5248_v1  ;;  %2286 = vmatpush1.bf16.msra.mxu1 %v4948_v20  ;;  %v4410_v15 = vld [vmem:[%s6448_s1 + $0xc] sm:$0x3] }
 0x2a2   : > { %2287 = vmatprep.subr.bf16.mxu1 %v4953_v21 }
 0x2a5   : > { %2288 = vmatpush1.bf16.msra.mxu1 %v4951_v23 }
 0x2a6   : > { %2289 = vmatprep.subr.bf16.mxu1 %v4956_v25 }
 0x2a9   : > { %2290 = vmatpush1.bf16.msra.mxu1 %v4954_v26 }
 0x2aa   : > { %2291 = vmatprep.subr.bf16.mxu1 %v4959_v27 }
 0x2ab   : > { %4669 = vmatmul.mubr.msk.bf16.vlgmr.msra.gmra.mrb[8].mxu0 %vm1743_vm5, %v4364_v29  ;;  %v4962_v29 = vld [vmem:[%s6447_s16 + $0x54] ss:$8 sps:$4 sm:$0xff]  }
 0x2ac   : > { %4673 = vmatpush3.bf16.msra.mxu0 %v1947_v30  ;;  %4674 = vmatprep.mubr.msk.bf16.mxu0 %vm5249_vm0, %v5248_v1  ;;  %v2207_v30 = vld [vmem:[%s6447_s16 + $0x60] sm:$0x33] }
 0x2ad   : > { %4678 = vmatprep.subr.bf16.mxu0 %v5248_v1  ;;  %2292 = vmatpush1.bf16.msra.mxu1 %v4957_v28 }
 0x2ae   : > { %2293 = vmatprep.subr.bf16.mxu1 %v4962_v29 }
 0x2b1   : > { %2294 = vmatpush1.bf16.msra.mxu1 %v4960_v31  ;;  %v3172_v31 = vld [vmem:[%s6449_s28] sm:$0xf]  ;;  %s6452_s28 = smov 94  }
 0x2b2   : > { %3175 = vperm.xlu0 %4920, %v3172_v31  }
 0x2b7   : > { %4675 = vmatmul.mubr.msk.bf16.vlgmr.msra.gmra.mrb[8].mxu0 %vm1743_vm5, %v4366_v32  ;;  %v4389_v32 = vcombine.high %v2207_v30, %v2207_v30 }
 0x2b8   : > { %4679 = vmatpush3.bf16.msra.mxu0 %v1998_v33  ;;  %4680 = vmatprep.mubr.msk.bf16.mxu0 %vm5249_vm0, %v5248_v1  ;;  %v4388_v33 = vcombine.low %v2207_v30, %v2207_v30  ;;  %v4416_v30 = vld [vmem:[%s6448_s1 + $0x10] sm:$0x3] }
 0x2b9   : > { %4684 = vmatprep.subr.bf16.mxu0 %v5248_v1  ;;  %4390 = vmatprep.subr.msk.bf16.mxu1 %vm1632_vm3, %v4389_v32 }
 0x2ba   : > { %v2278_v34 = vsel %vm1632_vm3, %v4388_v33, 0 }
 0x2bb   : > { %2296 = vmatpush1.bf16.msra.mxu1 %v2278_v34 }
 0x2c3   : > { %4681 = vmatmul.mubr.msk.bf16.vlgmr.msra.gmra.mrb[8].mxu0 %vm1743_vm5, %v4368_v35  ;;  %v2423_v35 = vpop.permute.xlu0 %2422 }
 0x2c4   : > { %4685 = vmatpush3.bf16.msra.mxu0 %v2049_v36  ;;  %4686 = vmatprep.mubr.msk.bf16.mxu0 %vm5249_vm0, %v5248_v1  ;;  %v2425_v36 = vpop.permute.xlu1 %2424 }
 0x2c5   : > { %4690 = vmatprep.subr.bf16.mxu0 %v5248_v1 }
 0x2c7   : > { %v2427_v40 = vpop.permute.xlu0 %2426 }
 0x2c8   : > { %v5992_v41 = vsel %vm2428_vm7, %v2425_v36, %v2427_v40  ;;  %v2519_v42 = vpop.permute.xlu1 %2518  ;;  %v2327_v40 = vld [vmem:[%s6448_s1] sm:$0x3] }
 0x2cb   : > { %v2521_v44 = vpop.permute.xlu0 %2520 }
 0x2cc   : > { %v2523_v43 = vpop.permute.xlu1 %2522  ;;  %v5995_v45 = vsel %vm2524_vm8, %v2519_v42, %v2521_v44 }
 0x2cd   : > { %v5998_v46 = vsel %vm2524_vm8, %v2521_v44, %v2523_v43  ;;  %v4401_v44 = vld [vmem:[%s6448_s1 + $0x6] sm:$0x3] }
 0x2cf   : > { %4687 = vmatmul.mubr.msk.bf16.vlgmr.msra.gmra.mrb[8].mxu0 %vm1743_vm5, %v4370_v38  ;;  %v5986_v38 = vsel %vm2428_vm7, %v2423_v35, %v2425_v36  ;;  %v2342_v35 = vsel %vm1632_vm3, %v5983_v37, 0 }
 0x2d0   : > { %4691 = vmatpush3.bf16.msra.mxu0 %v2100_v39  ;;  %4692 = vmatprep.mubr.msk.bf16.mxu0 %vm5249_vm0, %v5248_v1  ;;  %v2336_v39 = vcombine.high %v5983_v37, %v5983_v37  ;;  %v2617_v47 = vpop.permute.xlu1 %2616  ;;  %v2435_v42 = vsel %vm1632_vm3, %v5986_v38, 0  ;;  %v4395_v37 = vld [vmem:[%s6448_s1 + $0x2] sm:$0x3]  ;;  %v4398_v38 = vld [vmem:[%s6448_s1 + $0x4] sm:$0x3] }
 0x2d1   : > { %4696 = vmatprep.subr.bf16.mxu0 %v5248_v1 }
 0x2d2   : > { %4393 = vmatprep.subr.msk.bf16.mxu1 %vm1632_vm3, %v2336_v39 }
 0x2d4   : > { %v2711_v50 = vpop.permute.xlu1 %2710 }
 0x2d8   : > { %v2715_v58 = vpop.permute.xlu1 %2714 }
 0x2db   : > { %4693 = vmatmul.mubr.msk.bf16.vlgmr.msra.gmra.mrb[8].mxu0 %vm1743_vm5, %v4372_v48  ;;  %v2615_v48 = vpop.permute.xlu0 %2614 }
 0x2dc   : > { %4697 = vmatpush3.bf16.msra.mxu0 %v2151_v51  ;;  %4698 = vmatprep.mubr.msk.bf16.mxu0 %vm5249_vm0, %v5248_v1  ;;  %v4374_v1 = vld [vmem:[%s6383_s6 + $0x10] sm:$0x3]  ;;  %v6001_v49 = vsel %vm2620_vm9, %v2615_v48, %v2617_v47  ;;  %vm2273_vm0 = vcmask 818176   ;;  %v4407_v48 = vld [vmem:[%s6448_s1 + $0xa] sm:$0x3] }
 0x2dd   : > { %v2627_v43 = vsel %vm1632_vm3, %v6001_v49, 0 }
 0x2df   : > { %v2619_v54 = vpop.permute.xlu0 %2618 }
 0x2e0   : > { %v6004_v56 = vsel %vm2620_vm9, %v2617_v47, %v2619_v54 }
 0x2e3   : > { %v2713_v59 = vpop.permute.xlu0 %2712 }
 0x2e4   : > { %v6007_v60 = vsel %vm2716_vm10, %v2711_v50, %v2713_v59  ;;  %v6010_v62 = vsel %vm2716_vm10, %v2713_v59, %v2715_v58  ;;  %v4413_v50 = vld [vmem:[%s6448_s1 + $0xe] sm:$0x3] }
 0x2e7   : > { %4699 = vmatmul.mubr.msk.bf16.vlgmr.msra.gmra.mrb[8].mxu0 %vm1743_vm5, %v4374_v1  ;;  %v2809_v1 = vpop.permute.xlu1 %2808  ;;  %v2807_v63 = vpop.permute.xlu0 %2806  ;;  %vm3188_vm5 = vmor %vm3187_vm2, %vm3186_vm4  ;;  %vm3210_vm2 = vcmask 136196   ;;  %vm3205_vm4 = vcmask 138240  }
 0x2e8   : > { %2952 = vmatprep.mubr.bf16.mxu0 %v5266_v52  ;;  %v6013_v2 = vsel %vm2812_vm11, %v2807_v63, %v2809_v1  ;;  %3189 = vst.msk [vmem:[#allocation2] sm:$0x3f] %vm3188_vm5, %v5266_v52 }
 0x2e9   : > { %v2819_v47 = vsel %vm1632_vm3, %v6013_v2, 0 }
 0x2eb   : > { %v2903_v3 = vpop.permute.xlu1 %2902  ;;  %v2811_v6 = vpop.permute.xlu0 %2810 }
 0x2ec   : > { %v6016_v7 = vsel %vm2812_vm11, %v2809_v1, %v2811_v6 }
 0x2ef   : > { %v2907_v8 = vpop.permute.xlu1 %2906  ;;  %v2905_v9 = vpop.permute.xlu0 %2904 }
 0x2f0   : > { %v2909_v10 = vsel %vm2908_vm12, %v2903_v3, %v2905_v9  ;;  %v2910_v11 = vsel %vm2908_vm12, %v2905_v9, %v2907_v8  ;;  %v2388_v9 = vld [vmem:[#allocation12] sm:$0x3] }
 0x2f1   : > { %v2915_v12 = vsel %vm1632_vm3, %v2909_v10, 0  ;;  %4411 = vmatprep.subr.msk.bf16.mxu0 %vm1632_vm3, %v2910_v11  ;;  %v6129_v10 = vsub.s32 1, %v5812_v0 }
 0x2f2   : > { %2921 = vmatpush1.bf16.msra.mxu0 %v2915_v12  ;;  %v2482_v12 = vld [vmem:[#allocation12 + $0x2] sm:$0x3] }
 0x2f4   : > { %v2999_v14 = vpop.permute.xlu0 %2998 }
 0x2f5   : > { %4412 = vmatmul.mubr.msk.bf16.vlgmr.msra.gmra.mrb[12].mxu0 %vm2337_vm14, %v4410_v15 }
 0x2f6   : > { %v3001_v13 = vpop.permute.xlu1 %3000  ;;  %3144 = vmatprep.mubr.bf16.mxu0 %v5266_v52 }
 0x2f7   : > { %v6026_v16 = vsel %vm3004_vm13, %v2999_v14, %v3001_v13 }
 0x2f8   : > { %v3011_v49 = vsel %vm1632_vm3, %v6026_v16, 0  ;;  %v2397_v16 = vrot.slane %v2388_v9, %v6129_v10 }
 0x2fc   : > { %v3095_v17 = vpop.permute.xlu1 %3094 }
 0x30d   : > { %v3003_v18 = vpop.permute.xlu0 %3002 }
 0x30e   : > { %v3006_v19 = vsel %vm3004_vm13, %v3001_v13, %v3003_v18 }
 0x30f   : > { %v3099_v20 = vpop.permute.xlu1 %3098 }
 0x311   : > { %v3097_v23 = vpop.permute.xlu0 %3096 }
 0x312   : > { %v3101_v25 = vsel %vm3100_vm15, %v3095_v17, %v3097_v23  ;;  %v3102_v26 = vsel %vm3100_vm15, %v3097_v23, %v3099_v20  ;;  %v2491_v17 = vrot.slane %v2482_v12, %v6129_v10 }
 0x313   : > { %v3107_v28 = vsel %vm1632_vm3, %v3101_v25, 0  ;;  %4417 = vmatprep.subr.msk.bf16.mxu0 %vm1632_vm3, %v3102_v26 }
 0x314   : > { %3113 = vmatpush1.bf16.msra.mxu0 %v3107_v28 }
 0x317   : > { %4418 = vmatmul.mubr.msk.bf16.vlgmr.msra.gmra.mrb[16].mxu0 %vm2337_vm14, %v4416_v30 }
 0x318   : > { %3357 = vmatprep.mubr.bf16.mxu0 %v5266_v52 }
 0x352   : > { %v1727_v51 = vpop.f32.mrb[4].mxu0 }
 0x353   : > { %v1729_v53 = vpop.f32.mrb[5].mxu0 }
 0x354   : > { %v1731_v55 = vpop.f32.mrb[6].mxu0 }
 0x355   : > { %v1732_v57 = vpop.f32.mrb[7].mxu0 }
 0x36e   : > { %v1673_v5 = vpop.f32.mrb[4].mxu1 }
 0x36f   : > { %v6031_v21 = vadd.f32 %v1727_v51, %v1673_v5  ;;  %v1675_v22 = vpop.f32.mrb[5].mxu1 }
 0x370   : > { %v6033_v24 = vadd.f32 %v1729_v53, %v1675_v22  ;;  %v1677_v27 = vpop.f32.mrb[6].mxu1 }
 0x371   : > { %v1678_v29 = vpop.f32.mrb[7].mxu1 }
 0x3ba   : > { %v2187_v32 = vpop.f32.mrb[8].mxu0 }
 0x3bb   : > { %v2194_v33 = vpack.c.bf16 %v2187_v32, %v2187_v32  ;;  %v4700_v34 = vpop.f32.mrb[9].mxu0 }
 0x3bc   : > { %v2190_v36 = vpop.f32.mrb[10].mxu0 }
 0x3bd   : > { %v4701_v39 = vpop.f32.mrb[11].mxu0  ;;  %4391 = vmatmul.mubr.msk.bf16.vlgmr.msra.gmra.mrb[8].mxu1 %vm2273_vm0, %v2194_v33  ;;  %vm3209_vm0 = vmor %vm3185_vm1, %vm3208_vm6 }
 0x3be   : > { %2348 = vmatpush1.bf16.msra.mxu1 %v2342_v35  ;;  %2379 = vmatprep.mubr.bf16.mxu1 %v5266_v52  ;;  %v2674_v35 = vld [vmem:[#allocation12 + $0x6] sm:$0x3]  ;;  %vm3211_vm5 = vmor %vm3210_vm2, %vm3209_vm0 }
 0x3bf   : > { %4396 = vmatprep.subr.msk.bf16.mxu1 %vm1632_vm3, %v5992_v41  ;;  %v2531_v41 = vsel %vm1632_vm3, %v5995_v45, 0  ;;  %v2723_v45 = vsel %vm1632_vm3, %v6007_v60, 0 }
 0x3c5   : > { %4394 = vmatmul.mubr.msk.bf16.vlgmr.msra.gmra.mrb[12].mxu1 %vm2337_vm14, %v2327_v40 }
 0x3c6   : > { %2441 = vmatpush1.bf16.msra.mxu1 %v2435_v42  ;;  %2472 = vmatprep.mubr.bf16.mxu1 %v5266_v52 }
 0x3c7   : > { %4399 = vmatprep.subr.msk.bf16.mxu1 %vm1632_vm3, %v5998_v46  ;;  %v4404_v46 = vld [vmem:[%s6448_s1 + $0x8] sm:$0x3] }
 0x3c8   : > { %v6108_v51 = vpop.f32.mrb[12].mxu0 }
 0x3c9   : > { %v6110_v53 = vpop.f32.mrb[13].mxu0 }
 0x3ca   : > { %v2958_v54 = vpop.f32.mrb[14].mxu0 }
 0x3cb   : > { %v2959_v55 = vpop.f32.mrb[15].mxu0 }
 0x3cd   : > { %4397 = vmatmul.mubr.msk.bf16.vlgmr.msra.gmra.mrb[16].mxu1 %vm2337_vm14, %v4395_v37  ;;  %v2683_v37 = vrot.slane %v2674_v35, %v6129_v10 }
 0x3ce   : > { %2537 = vmatpush1.bf16.msra.mxu1 %v2531_v41  ;;  %2568 = vmatprep.mubr.bf16.mxu1 %v5266_v52 }
 0x3cf   : > { %4402 = vmatprep.subr.msk.bf16.mxu1 %vm1632_vm3, %v6004_v56 }
 0x3d5   : > { %4400 = vmatmul.mubr.msk.bf16.vlgmr.msra.gmra.mrb[20].mxu1 %vm2337_vm14, %v4398_v38 }
 0x3d6   : > { %2633 = vmatpush1.bf16.msra.mxu1 %v2627_v43  ;;  %2664 = vmatprep.mubr.bf16.mxu1 %v5266_v52 }
 0x3d7   : > { %4405 = vmatprep.subr.msk.bf16.mxu1 %vm1632_vm3, %v6010_v62 }
 0x3dd   : > { %4403 = vmatmul.mubr.msk.bf16.vlgmr.msra.gmra.mrb[24].mxu1 %vm2337_vm14, %v4401_v44 }
 0x3de   : > { %2729 = vmatpush1.bf16.msra.mxu1 %v2723_v45  ;;  %2760 = vmatprep.mubr.bf16.mxu1 %v5266_v52 }
 0x3df   : > { %4408 = vmatprep.subr.msk.bf16.mxu1 %vm1632_vm3, %v6016_v7  ;;  %v6126_v7 = vsub.s32 0, %v5812_v0 }
 0x3e1   : > { %v2393_v14 = vrot.slane %v2388_v9, %v6126_v7  ;;  %v2487_v15 = vrot.slane %v2482_v12, %v6126_v7  ;;  %v2679_v42 = vrot.slane %v2674_v35, %v6126_v7 }
 0x3e5   : > { %4406 = vmatmul.mubr.msk.bf16.vlgmr.msra.gmra.mrb[28].mxu1 %vm2337_vm14, %v4404_v46  ;;  %v2770_v46 = vld [vmem:[#allocation12 + $0x8] sm:$0x3] }
 0x3e6   : > { %2825 = vmatpush1.bf16.msra.mxu1 %v2819_v47  ;;  %2856 = vmatprep.mubr.bf16.mxu1 %v5266_v52  ;;  %v2779_v54 = vrot.slane %v2770_v46, %v6129_v10 }
 0x3e7   : > { %4414 = vmatprep.subr.msk.bf16.mxu1 %vm1632_vm3, %v3006_v19 }
 0x3ea   : > { %v6112_v56 = vpop.f32.mrb[16].mxu0 }
 0x3eb   : > { %v6114_v57 = vpop.f32.mrb[17].mxu0 }
 0x3ec   : > { %v3150_v58 = vpop.f32.mrb[18].mxu0 }
 0x3ed   : > { %4409 = vmatmul.mubr.msk.bf16.vlgmr.msra.gmra.mrb[32].mxu1 %vm2337_vm14, %v4407_v48  ;;  %v3151_v59 = vpop.f32.mrb[19].mxu0 }
 0x3ee   : > { %3017 = vmatpush1.bf16.msra.mxu1 %v3011_v49  ;;  %3048 = vmatprep.mubr.bf16.mxu1 %v5266_v52 }
 0x3f5   : > { %4415 = vmatmul.mubr.msk.bf16.vlgmr.msra.gmra.mrb[36].mxu1 %vm2337_vm14, %v4413_v50  ;;  %v2775_v50 = vrot.slane %v2770_v46, %v6126_v7 }
 0x3f6   : > { %3265 = vmatprep.mubr.bf16.mxu1 %v5266_v52 }
 0x490   : > { %v2317_v60 = vpop.f32.mrb[8].mxu1 }
 0x491   : > { %v6120_v62 = vadd.f32 %v2317_v60, %v6031_v21  ;;  %v2319_v1 = vpop.f32.mrb[9].mxu1 }
 0x492   : > { %v6123_v63 = vadd.f32 %v2319_v1, %v6033_v24  ;;  %v2321_v2 = vpop.f32.mrb[10].mxu1  ;;  %v2578_v24 = vld [vmem:[#allocation12 + $0x4] sm:$0x3] }
 0x493   : > { %v2322_v3 = vpop.f32.mrb[11].mxu1  ;;  %v2583_v28 = vrot.slane %v2578_v24, %v6126_v7  ;;  %v2587_v29 = vrot.slane %v2578_v24, %v6129_v10  ;;  %v2962_v2 = vld [vmem:[#allocation12 + $0xc] sm:$0x3] }
 0x494   : > { %v2866_v3 = vld [vmem:[#allocation12 + $0xa] sm:$0x3] }
 0x495   : > { %v2871_v12 = vrot.slane %v2866_v3, %v6126_v7 }
 0x498   : > { %v2381_v6 = vpop.f32.mrb[12].mxu1 }
 0x499   : > { %v2383_v8 = vpop.f32.mrb[13].mxu1  ;;  %v2400_v19 = vmul.f32 %v2393_v14, %v2381_v6  ;;  %v2875_v14 = vrot.slane %v2866_v3, %v6129_v10 }
 0x49a   : > { %v2385_v11 = vpop.f32.mrb[14].mxu1  ;;  %v2401_v21 = vmul.f32 %v2397_v16, %v2383_v8 }
 0x49b   : > { %v2386_v13 = vpop.f32.mrb[15].mxu1  ;;  %v2967_v11 = vrot.slane %v2962_v2, %v6126_v7 }
 0x49c   : > { %v2971_v13 = vrot.slane %v2962_v2, %v6129_v10 }
 0x49d   : > { %v2974_v16 = vmul.f32 %v2967_v11, %v6108_v51  ;;  %v3214_v11 = vld [vmem:[%s6450_s15] sm:$0x1] }
 0x4a0   : > { %v2474_v18 = vpop.f32.mrb[16].mxu1 }
 0x4a1   : > { %v2494_v20 = vmul.f32 %v2487_v15, %v2474_v18  ;;  %v2476_v5 = vpop.f32.mrb[17].mxu1 }
 0x4a2   : > { %v2495_v22 = vmul.f32 %v2491_v17, %v2476_v5  ;;  %v2478_v23 = vpop.f32.mrb[18].mxu1 }
 0x4a3   : > { %v2496_v25 = vadd.f32 %v2494_v20, %v2400_v19  ;;  %v2479_v26 = vpop.f32.mrb[19].mxu1  ;;  %v2975_v19 = vmul.f32 %v2971_v13, %v6110_v53 }
 0x4a4   : > { %v2497_v27 = vadd.f32 %v2495_v22, %v2401_v21  ;;  %v3154_v21 = vld [vmem:[#allocation12 + $0x10] sm:$0x3]  ;;  %v3058_v22 = vld [vmem:[#allocation12 + $0xe] sm:$0x3] }
 0x4a5   : > { %v3159_v26 = vrot.slane %v3154_v21, %v6126_v7  ;;  %v3067_v51 = vrot.slane %v3058_v22, %v6129_v10 }
 0x4a7   : > { %v3166_v53 = vmul.f32 %v3159_v26, %v6112_v56 }
 0x4a8   : > { %v2570_v30 = vpop.f32.mrb[20].mxu1 }
 0x4a9   : > { %v2590_v31 = vmul.f32 %v2583_v28, %v2570_v30  ;;  %v2572_v32 = vpop.f32.mrb[21].mxu1  ;;  %v3063_v28 = vrot.slane %v3058_v22, %v6126_v7 }
 0x4aa   : > { %v2591_v33 = vmul.f32 %v2587_v29, %v2572_v32  ;;  %v2574_v34 = vpop.f32.mrb[22].mxu1  ;;  %v3163_v29 = vrot.slane %v3154_v21, %v6129_v10 }
 0x4ab   : > { %v2592_v36 = vadd.f32 %v2590_v31, %v2496_v25  ;;  %v2575_v39 = vpop.f32.mrb[23].mxu1 }
 0x4ac   : > { %v2593_v40 = vadd.f32 %v2591_v33, %v2497_v27  ;;  %v3167_v34 = vmul.f32 %v3163_v29, %v6114_v57 }
 0x4b0   : > { %v2666_v41 = vpop.f32.mrb[24].mxu1 }
 0x4b1   : > { %v2686_v38 = vmul.f32 %v2679_v42, %v2666_v41  ;;  %v2668_v43 = vpop.f32.mrb[25].mxu1 }
 0x4b2   : > { %v2687_v44 = vmul.f32 %v2683_v37, %v2668_v43  ;;  %v2670_v45 = vpop.f32.mrb[26].mxu1 }
 0x4b3   : > { %v2688_v47 = vadd.f32 %v2686_v38, %v2592_v36  ;;  %v2671_v48 = vpop.f32.mrb[27].mxu1  ;;  %v3176_v38 = vpop.permute.xlu0 %3175 }
 0x4b4   : > { %v2689_v49 = vadd.f32 %v2687_v44, %v2593_v40 }
 0x4b8   : > { %v2762_v55 = vpop.f32.mrb[28].mxu1 }
 0x4b9   : > { %v2782_v58 = vmul.f32 %v2775_v50, %v2762_v55  ;;  %v2764_v59 = vpop.f32.mrb[29].mxu1 }
 0x4ba   : > { %v2783_v60 = vmul.f32 %v2779_v54, %v2764_v59  ;;  %v2766_v1 = vpop.f32.mrb[30].mxu1 }
 0x4bb   : > { %v2784_v6 = vadd.f32 %v2782_v58, %v2688_v47  ;;  %v2767_v8 = vpop.f32.mrb[31].mxu1 }
 0x4bc   : > { %v2785_v9 = vadd.f32 %v2783_v60, %v2689_v49 }
 0x4c0   : > { %v2858_v15 = vpop.f32.mrb[32].mxu1 }
 0x4c1   : > { %v2878_v17 = vmul.f32 %v2871_v12, %v2858_v15  ;;  %v2860_v18 = vpop.f32.mrb[33].mxu1 }
 0x4c2   : > { %v2879_v20 = vmul.f32 %v2875_v14, %v2860_v18  ;;  %v2862_v5 = vpop.f32.mrb[34].mxu1 }
 0x4c3   : > { %v2880_v23 = vadd.f32 %v2878_v17, %v2784_v6  ;;  %v2863_v24 = vpop.f32.mrb[35].mxu1 }
 0x4c4   : > { %v2881_v25 = vadd.f32 %v2879_v20, %v2785_v9 }
 0x4c5   : > { %v2976_v27 = vadd.f32 %v2974_v16, %v2880_v23 }
 0x4c6   : > { %v2977_v30 = vadd.f32 %v2975_v19, %v2881_v25 }
 0x4c8   : > { %v3050_v31 = vpop.f32.mrb[36].mxu1 }
 0x4c9   : > { %v3070_v32 = vmul.f32 %v3063_v28, %v3050_v31  ;;  %v3052_v33 = vpop.f32.mrb[37].mxu1 }
 0x4ca   : > { %v3071_v35 = vmul.f32 %v3067_v51, %v3052_v33  ;;  %v3054_v36 = vpop.f32.mrb[38].mxu1 }
 0x4cb   : > { %v3072_v39 = vadd.f32 %v3070_v32, %v2976_v27  ;;  %v3055_v40 = vpop.f32.mrb[39].mxu1 }
 0x4cc   : > { %v3073_v42 = vadd.f32 %v3071_v35, %v2977_v30 }
 0x4cd   : > { %v3168_v37 = vadd.f32 %v3166_v53, %v3072_v39 }
 0x4ce   : > { %v3169_v41 = vadd.f32 %v3167_v34, %v3073_v42  ;;  %v4040_v42 = vld [vmem:[#allocation3] sm:$0x1] }
 0x4cf   : > { %v3170_v43 = vadd.f32 %v3168_v37, %v6120_v62 }
 0x4d0   : > { %v3171_v44 = vadd.f32 %v3169_v41, %v6123_v63 }
 0x4d1   : > { %v3178_v45 = vadd.f32 %v3176_v38, %v3170_v43 }
 0x4d2   : > { %v3179_v46 = vadd.f32 %v3176_v38, %v3171_v44 }
 0x4d4   : > { %v3182_v56 = vcombine.low %v3178_v45, %v3179_v46  ;;  %v4419_v47 = vpack.c.bf16 %v3179_v46, %v3178_v45 }
 0x4d6   : > { %v3201_v48 = vrot.slane %v4419_v47, %v5816_v4  ;;  %3184 = vst [vmem:[%s6158_s19] sm:$0xff] %v3182_v56 }
 0x4d8   : > { %3202 = vrot.lane.b32.xlu1 %v3201_v48, %s5274_s18  ;;  %s4086_s18 = scalar_lea.sflag [#allocation6], %s5592_s11 }
 0x54a   : > { %v3203_v57 = vpop.permute.xlu1 %3202 }
 0x54b   : > { %v3204_v62 = vrot.slane %v3203_v57, 6 }
 0x54d   : > { %v3206_v63 = vsel %vm3205_vm4, %v3204_v62, %v3203_v57 }
 0x54e   : > { %3212 = vst.msk [vmem:[#allocation2] sm:$0x3f] %vm3211_vm5, %v3206_v63  ;;  %v4423_v63 = vld [vmem:[%s6450_s15 + $0x1] sm:$0x1] }
 0x555   : > { %v3382_v49 = vld [vmem:[#allocation2] sm:$0x3f] }
 0x556   : > { %v3288_v50 = vld [vmem:[#allocation2] sm:$0x3f]  ;;  %v3393_v54 = vrot.slane %v3382_v49, %v5816_v4  ;;  %v3386_v5 = vcombine.high %v3382_v49, %v3382_v49 }
 0x557   : > { %v3299_v55 = vrot.slane %v3288_v50, %v5816_v4  ;;  %v4420_v58 = vld.sshfl [vmem:[#allocation2] sm:$0x33 pattern:$0x76325410]  ;;  %v3292_v18 = vcombine.high %v3288_v50, %v3288_v50 }
 0x558   : > { %v3223_v59 = vcombine.high %v4420_v58, %v4420_v58  ;;  %v3570_v60 = vld [vmem:[#allocation2] sm:$0x3f]  ;;  %3402 = vrot.lane.b32.xlu0 %v3393_v54, %s5251_s23  ;;  %v3228_v2 = vsel %vm1632_vm3, %v4420_v58, 0  ;;  %v3400_v21 = vrot.slane %v3386_v5, %v5816_v4  ;;  %v3401_v22 = vcombine.high %v3393_v54, %v3393_v54 }
 0x559   : > { %v3476_v1 = vld [vmem:[#allocation2] sm:$0x3f]  ;;  %3308 = vrot.lane.b32.xlu1 %v3299_v55, %s5250_s5  ;;  %v3581_v3 = vrot.slane %v3570_v60, %v5816_v4  ;;  %v3307_v19 = vcombine.high %v3299_v55, %v3299_v55  ;;  %v3306_v20 = vrot.slane %v3292_v18, %v5816_v4  ;;  %v3574_v26 = vcombine.high %v3570_v60, %v3570_v60 }
 0x55a   : > { %4421 = vmatprep.subr.msk.bf16.mxu1 %vm1632_vm3, %v3223_v59  ;;  %v3487_v6 = vrot.slane %v3476_v1, %v5816_v4  ;;  %v3758_v8 = vld [vmem:[#allocation2] sm:$0x3f]  ;;  %v3480_v23 = vcombine.high %v3476_v1, %v3476_v1 }
 0x55b   : > { %3234 = vmatpush1.bf16.msra.mxu1 %v3228_v2  ;;  %v3664_v9 = vld [vmem:[#allocation2] sm:$0x3f]  ;;  %v3769_v12 = vrot.slane %v3758_v8, %v5816_v4  ;;  %v3588_v27 = vrot.slane %v3574_v26, %v5816_v4  ;;  %v3589_v28 = vcombine.high %v3581_v3, %v3581_v3  ;;  %v3762_v31 = vcombine.high %v3758_v8, %v3758_v8  ;;  %v4438_v26 = vld [vmem:[%s6450_s15 + $0x6] sm:$0x1] }
 0x55c   : > { %3590 = vrot.lane.b32.xlu0 %v3581_v3, %s5269_s30  ;;  %v3675_v13 = vrot.slane %v3664_v9, %v5816_v4  ;;  %v3946_v14 = vld [vmem:[#allocation2] sm:$0x3f]  ;;  %v3495_v24 = vcombine.high %v3487_v6, %v3487_v6  ;;  %v3494_v25 = vrot.slane %v3480_v23, %v5816_v4  ;;  %v3668_v29 = vcombine.high %v3664_v9, %v3664_v9 }
 0x55d   : > { %3496 = vrot.lane.b32.xlu1 %v3487_v6, %s5268_s8  ;;  %v3852_v15 = vld [vmem:[#allocation2] sm:$0x3f]  ;;  %v3957_v16 = vrot.slane %v3946_v14, %v5816_v4  ;;  %v3776_v53 = vrot.slane %v3762_v31, %v5816_v4  ;;  %v3777_v32 = vcombine.high %v3769_v12, %v3769_v12  ;;  %v3950_v36 = vcombine.high %v3946_v14, %v3946_v14  ;;  %v4441_v31 = vld [vmem:[%s6450_s15 + $0x7] sm:$0x1] }
 0x55e   : > { %4422 = vmatmul.mubr.msk.bf16.vlgmr.msra.gmra.mrb[40].mxu1 %vm2337_vm14, %v3214_v11  ;;  %v3863_v17 = vrot.slane %v3852_v15, %v5816_v4  ;;  %v3683_v30 = vcombine.high %v3675_v13, %v3675_v13  ;;  %v3682_v51 = vrot.slane %v3668_v29, %v5816_v4  ;;  %v3856_v33 = vcombine.high %v3852_v15, %v3852_v15  ;;  %v4426_v59 = vld [vmem:[%s6450_s15 + $0x2] sm:$0x1]  ;;  %v4429_v8 = vld [vmem:[%s6450_s15 + $0x3] sm:$0x1]  ;;  %v4432_v15 = vld [vmem:[%s6450_s15 + $0x4] sm:$0x1] }
 0x55f   : > { %3451 = vmatprep.mubr.bf16.mxu1 %v5266_v52  ;;  %v3964_v39 = vrot.slane %v3950_v36, %v5816_v4  ;;  %v3965_v40 = vcombine.high %v3957_v16, %v3957_v16  ;;  %v4435_v5 = vld [vmem:[%s6450_s15 + $0x5] sm:$0x1] }
 0x560   : > { %3778 = vrot.lane.b32.xlu0 %v3769_v12, %s5271_s13  ;;  %v3871_v34 = vcombine.high %v3863_v17, %v3863_v17  ;;  %v3870_v35 = vrot.slane %v3856_v33, %v5816_v4 }
 0x561   : > { %3684 = vrot.lane.b32.xlu1 %v3675_v13, %s6451_s22 }
 0x564   : > { %3966 = vrot.lane.b32.xlu0 %v3957_v16, %s6452_s28 }
 0x565   : > { %3872 = vrot.lane.b32.xlu1 %v3863_v17, %s6453_s10 }
 0x568   : > { %3310 = vrot.lane.b32.xlu0 %v3307_v19, %s5250_s5 }
 0x569   : > { %3312 = vrot.lane.b32.xlu1 %v3306_v20, %s5250_s5 }
 0x56c   : > { %3406 = vrot.lane.b32.xlu0 %v3400_v21, %s5251_s23 }
 0x56d   : > { %3404 = vrot.lane.b32.xlu1 %v3401_v22, %s5251_s23 }
 0x570   : > { %3498 = vrot.lane.b32.xlu0 %v3495_v24, %s5268_s8 }
 0x571   : > { %3500 = vrot.lane.b32.xlu1 %v3494_v25, %s5268_s8  ;;  %s4457_s8 = sshll.u32 %s5387_s14, 7 }
 0x572   : > { %s6286_s29 = scalar_lea.hbm %s6454_s21, %s4457_s8 }
 0x574   : > { %3594 = vrot.lane.b32.xlu0 %v3588_v27, %s5269_s30 }
 0x575   : > { %3592 = vrot.lane.b32.xlu1 %v3589_v28, %s5269_s30 }
 0x578   : > { %3686 = vrot.lane.b32.xlu0 %v3683_v30, %s6451_s22 }
 0x579   : > { %3688 = vrot.lane.b32.xlu1 %v3682_v51, %s6451_s22  ;;  %s5129_s22 = sshll.u32 %s5275_s20, 4  ;;  %s5130_s22 = int_to_ptr.vmem [resolvable:$false] %s5129_s22 }
 0x57a   : > { %p5132_p8 = scmp.lt.s32.totalorder %s4106_s17, %s5130_s22 }
 0x57c   : > { %3782 = vrot.lane.b32.xlu0 %v3776_v53, %s5271_s13 }
 0x57d   : > { %3780 = vrot.lane.b32.xlu1 %v3777_v32, %s5271_s13 }
 0x580   : > { %3874 = vrot.lane.b32.xlu0 %v3871_v34, %s6453_s10 }
 0x581   : > { %3876 = vrot.lane.b32.xlu1 %v3870_v35, %s6453_s10 }
 0x584   : > { %3970 = vrot.lane.b32.xlu0 %v3964_v39, %s6452_s28 }
 0x585   : > { %3968 = vrot.lane.b32.xlu1 %v3965_v40, %s6452_s28  ;;  %s5131_s28 = scalar_lea.vmem %s5130_s22, 256 }
 0x586   : > { %p5133_p6 = scmp.lt.s32.totalorder %s5131_s28, %s5125_s27 }
 0x588   : > { %p5134_p10 = por %p5133_p6, %p5132_p8 }
 0x589   : > { %4043 = vperm.xlu1 %4921, %v4040_v42  }
 0x58a   : > { %p5135_p13 = pnand %p5134_p10, %p5128_p0 }
 0x5ca   : > { %v3403_v37 = vpop.permute.xlu0 %3402 }
 0x5cb   : > { %v3309_v41 = vpop.permute.xlu1 %3308 }
 0x5ce   : > { %v3591_v38 = vpop.permute.xlu0 %3590 }
 0x5cf   : > { %v3497_v43 = vpop.permute.xlu1 %3496 }
 0x5d2   : > { %v3779_v44 = vpop.permute.xlu0 %3778 }
 0x5d3   : > { %v3685_v45 = vpop.permute.xlu1 %3684 }
 0x5d6   : > { %v6209_v46 = vpop.permute.xlu0 %3966 }
 0x5d7   : > { %v3873_v56 = vpop.permute.xlu1 %3872 }
 0x5da   : > { %v3311_v47 = vpop.permute.xlu0 %3310 }
 0x5db   : > { %v3313_v48 = vpop.permute.xlu1 %3312  ;;  %v3314_v4 = vsel %vm2428_vm7, %v3309_v41, %v3311_v47 }
 0x5dc   : > { %v3315_v57 = vsel %vm2428_vm7, %v3311_v47, %v3313_v48  ;;  %v3320_v62 = vsel %vm1632_vm3, %v3314_v4, 0 }
 0x5dd   : > { %4424 = vmatprep.subr.msk.bf16.mxu0 %vm1632_vm3, %v3315_v57 }
 0x5de   : > { %3326 = vmatpush1.bf16.msra.mxu0 %v3320_v62  ;;  %v3407_v49 = vpop.permute.xlu0 %3406 }
 0x5df   : > { %v3405_v50 = vpop.permute.xlu1 %3404 }
 0x5e0   : > { %v3408_v54 = vsel %vm2524_vm8, %v3403_v37, %v3405_v50  ;;  %v3409_v55 = vsel %vm2524_vm8, %v3405_v50, %v3407_v49 }
 0x5e1   : > { %v3414_v58 = vsel %vm1632_vm3, %v3408_v54, 0  ;;  %4425 = vmatmul.mubr.msk.bf16.vlgmr.msra.gmra.mrb[20].mxu0 %vm2337_vm14, %v4423_v63  ;;  %4427 = vmatprep.subr.msk.bf16.mxu1 %vm1632_vm3, %v3409_v55 }
 0x5e2   : > { %3420 = vmatpush1.bf16.msra.mxu1 %v3414_v58  ;;  %3545 = vmatprep.mubr.bf16.mxu0 %v5266_v52  ;;  %v3499_v60 = vpop.permute.xlu0 %3498 }
 0x5e3   : > { %v3501_v1 = vpop.permute.xlu1 %3500  ;;  %v3502_v2 = vsel %vm2620_vm9, %v3497_v43, %v3499_v60 }
 0x5e4   : > { %v3503_v3 = vsel %vm2620_vm9, %v3499_v60, %v3501_v1  ;;  %v3508_v6 = vsel %vm1632_vm3, %v3502_v2, 0 }
 0x5e5   : > { %4428 = vmatmul.mubr.msk.bf16.vlgmr.msra.gmra.mrb[44].mxu1 %vm2337_vm14, %v4426_v59  ;;  %4430 = vmatprep.subr.msk.bf16.mxu0 %vm1632_vm3, %v3503_v3 }
 0x5e6   : > { %3514 = vmatpush1.bf16.msra.mxu0 %v3508_v6  ;;  %3639 = vmatprep.mubr.bf16.mxu1 %v5266_v52  ;;  %v3595_v9 = vpop.permute.xlu0 %3594 }
 0x5e7   : > { %v3593_v11 = vpop.permute.xlu1 %3592 }
 0x5e8   : > { %v3596_v12 = vsel %vm2716_vm10, %v3591_v38, %v3593_v11  ;;  %v3597_v13 = vsel %vm2716_vm10, %v3593_v11, %v3595_v9 }
 0x5e9   : > { %v3602_v14 = vsel %vm1632_vm3, %v3596_v12, 0  ;;  %4431 = vmatmul.mubr.msk.bf16.vlgmr.msra.gmra.mrb[24].mxu0 %vm2337_vm14, %v4429_v8  ;;  %4433 = vmatprep.subr.msk.bf16.mxu1 %vm1632_vm3, %v3597_v13 }
 0x5ea   : > { %3608 = vmatpush1.bf16.msra.mxu1 %v3602_v14  ;;  %3733 = vmatprep.mubr.bf16.mxu0 %v5266_v52  ;;  %v3687_v16 = vpop.permute.xlu0 %3686 }
 0x5eb   : > { %v3689_v17 = vpop.permute.xlu1 %3688  ;;  %v3690_v18 = vsel %vm2812_vm11, %v3685_v45, %v3687_v16 }
 0x5ec   : > { %v3691_v19 = vsel %vm2812_vm11, %v3687_v16, %v3689_v17  ;;  %v3696_v20 = vsel %vm1632_vm3, %v3690_v18, 0 }
 0x5ed   : > { %4434 = vmatmul.mubr.msk.bf16.vlgmr.msra.gmra.mrb[48].mxu1 %vm2337_vm14, %v4432_v15  ;;  %4436 = vmatprep.subr.msk.bf16.mxu0 %vm1632_vm3, %v3691_v19 }
 0x5ee   : > { %3702 = vmatpush1.bf16.msra.mxu0 %v3696_v20  ;;  %3827 = vmatprep.mubr.bf16.mxu1 %v5266_v52  ;;  %v3783_v21 = vpop.permute.xlu0 %3782 }
 0x5ef   : > { %v3781_v22 = vpop.permute.xlu1 %3780 }
 0x5f0   : > { %v3784_v23 = vsel %vm2908_vm12, %v3779_v44, %v3781_v22  ;;  %v3785_v24 = vsel %vm2908_vm12, %v3781_v22, %v3783_v21 }
 0x5f1   : > { %v3790_v25 = vsel %vm1632_vm3, %v3784_v23, 0  ;;  %4437 = vmatmul.mubr.msk.bf16.vlgmr.msra.gmra.mrb[28].mxu0 %vm2337_vm14, %v4435_v5  ;;  %4439 = vmatprep.subr.msk.bf16.mxu1 %vm1632_vm3, %v3785_v24 }
 0x5f2   : > { %3796 = vmatpush1.bf16.msra.mxu1 %v3790_v25  ;;  %3921 = vmatprep.mubr.bf16.mxu0 %v5266_v52  ;;  %v3875_v27 = vpop.permute.xlu0 %3874 }
 0x5f3   : > { %v3877_v28 = vpop.permute.xlu1 %3876  ;;  %v3878_v29 = vsel %vm3004_vm13, %v3873_v56, %v3875_v27 }
 0x5f4   : > { %v3879_v30 = vsel %vm3004_vm13, %v3875_v27, %v3877_v28  ;;  %v3884_v51 = vsel %vm1632_vm3, %v3878_v29, 0 }
 0x5f5   : > { %4440 = vmatmul.mubr.msk.bf16.vlgmr.msra.gmra.mrb[52].mxu1 %vm2337_vm14, %v4438_v26  ;;  %4442 = vmatprep.subr.msk.bf16.mxu0 %vm1632_vm3, %v3879_v30 }
 0x5f6   : > { %3890 = vmatpush1.bf16.msra.mxu0 %v3884_v51  ;;  %4015 = vmatprep.mubr.bf16.mxu1 %v5266_v52  ;;  %v3971_v53 = vpop.permute.xlu0 %3970  ;;  %v4444_v52 = vld [vmem:[%s6450_s15 + $0x8] sm:$0x1] }
 0x5f7   : > { %v3969_v32 = vpop.permute.xlu1 %3968 }
 0x5f8   : > { %v3972_v33 = vsel %vm3100_vm15, %v6209_v46, %v3969_v32  ;;  %v3973_v34 = vsel %vm3100_vm15, %v3969_v32, %v3971_v53 }
 0x5f9   : > { %v3978_v35 = vsel %vm1632_vm3, %v3972_v33, 0  ;;  %4443 = vmatmul.mubr.msk.bf16.vlgmr.msra.gmra.mrb[32].mxu0 %vm2337_vm14, %v4441_v31  ;;  %4445 = vmatprep.subr.msk.bf16.mxu1 %vm1632_vm3, %v3973_v34 }
 0x5fa   : > { %3984 = vmatpush1.bf16.msra.mxu1 %v3978_v35 }
 0x5fd   : > { %4446 = vmatmul.mubr.msk.bf16.vlgmr.msra.gmra.mrb[56].mxu1 %vm2337_vm14, %v4444_v52 }
 0x631   : > { %v3267_v36 = vpop.f32.mrb[40].mxu1 }
 0x632   : > { %v3269_v39 = vpop.f32.mrb[41].mxu1 }
 0x633   : > { %v3271_v40 = vpop.f32.mrb[42].mxu1 }
 0x634   : > { %v3272_v42 = vpop.f32.mrb[43].mxu1 }
 0x635   : > { %5138 = shalt.err (!%p5135_p13)
}
 0x636   : > { %s5139_s19 = scalar_lea.hbm %s6286_s29, 128  ;;  %s5143_s23 = scalar_lea.hbm %s6454_s21, 256 }
 0x637   : > { %p5140_p5 = scmp.ne.s32.totalorder %s6286_s29, %s5139_s19  ;;  %p5144_p3 = scmp.lt.u32.totalorder %s6286_s29, %s6454_s21 }
 0x638   : > { %p5145_p7 = scmp.lt.u32.totalorder %s5143_s23, %s5139_s19  ;;  %p5147_p1 = scmp.lt.u32.totalorder %s5139_s19, %s6286_s29 }
 0x639   : > { %p5141_p11 = pnand %p5140_p5, %p6455_p2 }
 0x63a   : > { %p5146_p12 = por %p5145_p7, %p5144_p3 }
 0x63b   : > { %p5142_p9 = pneg %p5141_p11 }
 0x63c   : > { %p5148_p4 = por %p5147_p1, %p5146_p12 }
 0x63e   : > { %p5149_p0 = pnand %p5148_p4, %p5142_p9 }
 0x640   : > { %5152 = shalt.err (!%p5149_p0)
}
 0x641   : > { %4815 = dma.vmem_to_hbm [thread:$0]  (%p6455_p2), %s4106_s17, 128, %s6286_s29, %s4086_s18   ;;  %v3274_v37 = vld [vmem:[#allocation12] sm:$0x3]  ;;  %v3366_v41 = vld [vmem:[#allocation12 + $0x2] sm:$0x3]  ;;  %vm4082_vm3 = vcmp.lt.s32.totalorder %v2390_v61, 256 }
 0x642   : > { %v3279_v38 = vrot.slane %v3274_v37, %v6126_v7  ;;  %v3371_v43 = vrot.slane %v3366_v41, %v6126_v7  ;;  %v3283_v44 = vrot.slane %v3274_v37, %v6129_v10  ;;  %v3375_v45 = vrot.slane %v3366_v41, %v6129_v10  ;;  %v3460_v46 = vld [vmem:[#allocation12 + $0x4] sm:$0x3]  ;;  %v3554_v54 = vld [vmem:[#allocation12 + $0x6] sm:$0x3]  ;;  %v3648_v11 = vld [vmem:[#allocation12 + $0x8] sm:$0x3] }
 0x643   : > { %v3465_v57 = vrot.slane %v3460_v46, %v6126_v7  ;;  %v3469_v49 = vrot.slane %v3460_v46, %v6129_v10  ;;  %v3559_v3 = vrot.slane %v3554_v54, %v6126_v7  ;;  %v3563_v9 = vrot.slane %v3554_v54, %v6129_v10  ;;  %v3742_v21 = vld [vmem:[#allocation12 + $0xa] sm:$0x3]  ;;  %v3836_v31 = vld [vmem:[#allocation12 + $0xc] sm:$0x3]  ;;  %v3930_v37 = vld [vmem:[#allocation12 + $0xe] sm:$0x3] }
 0x644   : > { %v3286_v47 = vmul.f32 %v3279_v38, %v3267_v36  ;;  %v3287_v62 = vmul.f32 %v3283_v44, %v3269_v39  ;;  %v3653_v18 = vrot.slane %v3648_v11, %v6126_v7  ;;  %v3657_v20 = vrot.slane %v3648_v11, %v6129_v10  ;;  %s4314_s13 = sshll.u32 %s5592_s11, 1  ;;  %s4458_s29 = sshll.u32 %s5387_s14, 5 }
 0x645   : > { %v3747_v28 = vrot.slane %v3742_v21, %v6126_v7  ;;  %v3751_v51 = vrot.slane %v3742_v21, %v6129_v10  ;;  %v3841_v36 = vrot.slane %v3836_v31, %v6126_v7  ;;  %v3845_v40 = vrot.slane %v3836_v31, %v6129_v10  ;;  %s662_s17 = scalar_lea.vmem [#allocation14], %s4314_s13  ;;  %s6456_s22 = sld [smem:[#allocation34_spill]] }
 0x646   : > { %s4119_s18 = sshll.u32 %s662_s17, 4  ;;  %s4091_s19 = scalar_lea.sflag [#allocation15], %s5592_s11  ;;  %s6335_s18 = int_to_ptr.vmem [resolvable:$true] %s4119_s18 }
 0x647   : > { %s5153_s10 = scalar_lea.vmem %s6335_s18, 32  ;;  %s5277_s14 = smov [#allocation14]  }
 0x648   : > { %p5154_p8 = scmp.ne.s32.totalorder %s6335_s18, %s5153_s10  ;;  %s5157_s5 = sshll.u32 %s5277_s14, 4  ;;  %s5158_s5 = int_to_ptr.vmem [resolvable:$false] %s5157_s5 }
 0x649   : > { %s5159_s23 = scalar_lea.vmem %s5158_s5, 64  ;;  %p5160_p13 = scmp.lt.s32.totalorder %s6335_s18, %s5158_s5 }
 0x64a   : > { %p5155_p6 = pnand %p5154_p8, %p6455_p2  ;;  %p5161_p5 = scmp.lt.s32.totalorder %s5159_s23, %s5153_s10 }
 0x64b   : > { %s6333_s28 = scalar_lea.hbm %s6456_s22, %s4458_s29 }
 0x64c   : > { %p5156_p10 = pneg %p5155_p6  ;;  %p5162_p11 = por %p5161_p5, %p5160_p13 }
 0x64e   : > { %p5163_p9 = pnand %p5162_p11, %p5156_p10 }
 0x6b4   : > { %v3359_v56 = vpop.f32.mrb[20].mxu0 }
 0x6b5   : > { %v3378_v48 = vmul.f32 %v3371_v43, %v3359_v56  ;;  %v3361_v4 = vpop.f32.mrb[21].mxu0  ;;  %v3935_v56 = vrot.slane %v3930_v37, %v6126_v7 }
 0x6b6   : > { %v3379_v63 = vmul.f32 %v3375_v45, %v3361_v4  ;;  %v3363_v50 = vpop.f32.mrb[22].mxu0  ;;  %v3939_v4 = vrot.slane %v3930_v37, %v6129_v10 }
 0x6b7   : > { %v3380_v55 = vadd.f32 %v3378_v48, %v3286_v47  ;;  %v3364_v58 = vpop.f32.mrb[23].mxu0 }
 0x6b8   : > { %v3381_v59 = vadd.f32 %v3379_v63, %v3287_v62  ;;  %v3453_v60 = vpop.f32.mrb[44].mxu1 }
 0x6b9   : > { %v3472_v1 = vmul.f32 %v3465_v57, %v3453_v60  ;;  %v3455_v2 = vpop.f32.mrb[45].mxu1  ;;  %v4024_v57 = vld [vmem:[#allocation12 + $0x10] sm:$0x3] }
 0x6ba   : > { %v3473_v6 = vmul.f32 %v3469_v49, %v3455_v2  ;;  %v3457_v8 = vpop.f32.mrb[46].mxu1  ;;  %v4029_v58 = vrot.slane %v4024_v57, %v6126_v7  ;;  %v4033_v60 = vrot.slane %v4024_v57, %v6129_v10  ;;  %v4044_v2 = vpop.permute.xlu1 %4043 }
 0x6bb   : > { %v3474_v12 = vadd.f32 %v3472_v1, %v3380_v55  ;;  %v3458_v13 = vpop.f32.mrb[47].mxu1 }
 0x6bc   : > { %v3475_v14 = vadd.f32 %v3473_v6, %v3381_v59  ;;  %v3547_v15 = vpop.f32.mrb[24].mxu0  ;;  %v4049_v13 = vrot.slane %v4044_v2, %v6126_v7  ;;  %v5276_v7 = vmov 1966171168  }
 0x6bd   : > { %v3566_v16 = vmul.f32 %v3559_v3, %v3547_v15  ;;  %v3549_v17 = vpop.f32.mrb[25].mxu0 }
 0x6be   : > { %v3567_v19 = vmul.f32 %v3563_v9, %v3549_v17  ;;  %v3551_v5 = vpop.f32.mrb[26].mxu0 }
 0x6bf   : > { %v3568_v22 = vadd.f32 %v3566_v16, %v3474_v12  ;;  %v3552_v23 = vpop.f32.mrb[27].mxu0 }
 0x6c0   : > { %v3569_v24 = vadd.f32 %v3567_v19, %v3475_v14  ;;  %v3641_v25 = vpop.f32.mrb[48].mxu1 }
 0x6c1   : > { %v3660_v26 = vmul.f32 %v3653_v18, %v3641_v25  ;;  %v3643_v27 = vpop.f32.mrb[49].mxu1 }
 0x6c2   : > { %v3661_v29 = vmul.f32 %v3657_v20, %v3643_v27  ;;  %v3645_v30 = vpop.f32.mrb[50].mxu1  ;;  %v4066_v27 = vunpack.c.l.s4 %v5276_v7 }
 0x6c3   : > { %v3662_v53 = vadd.f32 %v3660_v26, %v3568_v22  ;;  %v3646_v32 = vpop.f32.mrb[51].mxu1 }
 0x6c4   : > { %v3663_v33 = vadd.f32 %v3661_v29, %v3569_v24  ;;  %v3735_v34 = vpop.f32.mrb[28].mxu0 }
 0x6c5   : > { %v3754_v35 = vmul.f32 %v3747_v28, %v3735_v34  ;;  %v3737_v52 = vpop.f32.mrb[29].mxu0  ;;  %v4067_v28 = vunpack.c.0.s8 %v4066_v27 }
 0x6c6   : > { %v3755_v39 = vmul.f32 %v3751_v51, %v3737_v52  ;;  %v3739_v42 = vpop.f32.mrb[30].mxu0 }
 0x6c7   : > { %v3756_v41 = vadd.f32 %v3754_v35, %v3662_v53  ;;  %v3740_v38 = vpop.f32.mrb[31].mxu0  ;;  %v4070_v30 = vsub.s32 %v4067_v28, %v5812_v0 }
 0x6c8   : > { %v3757_v43 = vadd.f32 %v3755_v39, %v3663_v33  ;;  %v3829_v44 = vpop.f32.mrb[52].mxu1 }
 0x6c9   : > { %v3848_v45 = vmul.f32 %v3841_v36, %v3829_v44  ;;  %v3831_v46 = vpop.f32.mrb[53].mxu1 }
 0x6ca   : > { %v3849_v47 = vmul.f32 %v3845_v40, %v3831_v46  ;;  %v3833_v48 = vpop.f32.mrb[54].mxu1 }
 0x6cb   : > { %v3850_v62 = vadd.f32 %v3848_v45, %v3756_v41  ;;  %v3834_v63 = vpop.f32.mrb[55].mxu1 }
 0x6cc   : > { %v3851_v49 = vadd.f32 %v3849_v47, %v3757_v43  ;;  %v3923_v50 = vpop.f32.mrb[32].mxu0 }
 0x6cd   : > { %v3942_v54 = vmul.f32 %v3935_v56, %v3923_v50  ;;  %v3925_v55 = vpop.f32.mrb[33].mxu0 }
 0x6ce   : > { %v3943_v59 = vmul.f32 %v3939_v4, %v3925_v55  ;;  %v3927_v1 = vpop.f32.mrb[34].mxu0 }
 0x6cf   : > { %v3944_v3 = vadd.f32 %v3942_v54, %v3850_v62  ;;  %v3928_v6 = vpop.f32.mrb[35].mxu0 }
 0x6d0   : > { %v3945_v8 = vadd.f32 %v3943_v59, %v3851_v49  ;;  %v4017_v9 = vpop.f32.mrb[56].mxu1 }
 0x6d1   : > { %v4036_v11 = vmul.f32 %v4029_v58, %v4017_v9  ;;  %v4019_v12 = vpop.f32.mrb[57].mxu1 }
 0x6d2   : > { %v4037_v14 = vmul.f32 %v4033_v60, %v4019_v12  ;;  %v4021_v15 = vpop.f32.mrb[58].mxu1 }
 0x6d3   : > { %v4038_v16 = vadd.f32 %v4036_v11, %v3944_v3  ;;  %v4022_v17 = vpop.f32.mrb[59].mxu1 }
 0x6d4   : > { %v4039_v18 = vadd.f32 %v4037_v14, %v3945_v8 }
 0x6d5   : > { %v4050_v19 = vadd.f32 %v4049_v13, %v4038_v16 }
 0x6d6   : > { %v4051_v20 = vadd.f32 %v4049_v13, %v4039_v18 }
 0x6d7   : > { %v4052_v5 = vsub.f32 0.0, %v4050_v19 }
 0x6d8   : > { %v4053_v10 = vsub.f32 0.0, %v4051_v20 }
 0x6d9   : > { %v4054_v21 = vmul.f32 1.442695, %v4052_v5 }
 0x6da   : > { %v4056_v22 = vmul.f32 1.442695, %v4053_v10 }
 0x6db   : > { %4973 = vpow2.f32 %v4054_v21 }
 0x6dc   : > { %4975 = vpow2.f32 %v4056_v22 }
 0x6e5   : > { %v4974_v23 = vpop.eup %4973 }
 0x6e6   : > { %v4976_v24 = vpop.eup %4975  ;;  %v4058_v25 = vadd.f32 1.0, %v4974_v23 }
 0x6e7   : > { %v4059_v26 = vadd.f32 1.0, %v4976_v24 }
 0x6e8   : > { %4977 = vrcp.f32 %v4058_v25 }
 0x6e9   : > { %4979 = vrcp.f32 %v4059_v26 }
 0x6f2   : > { %v4978_v29 = vpop.eup %4977 }
 0x6f3   : > { %v4980_v51 = vpop.eup %4979 }
 0x6f4   : > { %v4064_v31 = vcombine.low %v4978_v29, %v4980_v51 }
 0x6f6   : > { %v4071_v53 = vrot.slane %v4064_v31, %v4070_v30 }
 0x6f8   : > { %v4078_v32 = vrot.slane %v4071_v53, %v4070_v30 }
 0x6fa   : > { %4084 = vst.msk [vmem:[%s662_s17] sm:$0x3] %vm4082_vm3, %v4078_v32 }
 0x6fb   : > { %5166 = shalt.err (!%p5163_p9)
}
 0x6fc   : > { %s5167_s11 = scalar_lea.hbm %s6333_s28, 32  ;;  %s5171_s13 = scalar_lea.hbm %s6456_s22, 64 }
 0x6fd   : > { %p5168_p3 = scmp.ne.s32.totalorder %s6333_s28, %s5167_s11  ;;  %p5172_p1 = scmp.lt.u32.totalorder %s6333_s28, %s6456_s22 }
 0x6fe   : > { %p5173_p4 = scmp.lt.u32.totalorder %s5171_s13, %s5167_s11  ;;  %p5175_p8 = scmp.lt.u32.totalorder %s5167_s11, %s6333_s28 }
 0x6ff   : > { %p5169_p7 = pnand %p5168_p3, %p6455_p2 }
 0x700   : > { %p5174_p0 = por %p5173_p4, %p5172_p1 }
 0x701   : > { %p5170_p12 = pneg %p5169_p7 }
 0x702   : > { %p5176_p6 = por %p5175_p8, %p5174_p0 }
 0x704   : > { %p5177_p10 = pnand %p5176_p6, %p5170_p12 }
 0x706   : > { %5180 = shalt.err (!%p5177_p10)
}
 0x707   : > { %4816 = dma.vmem_to_hbm [thread:$0]  (%p6455_p2), %s6335_s18, 32, %s6333_s28, %s4091_s19  }
 0x708 PF: > { %s6457_s27 = sld [smem:[#allocation22_spill]]  ;;  %s6458_s20 = sld [smem:[#allocation23_spill]] }
 0x709   : > { %p6460_p5 = scmp.ge.s32.totalorder %s5235_s26, 2 }
 0x70e   : > { %s4131_s10 = sand.u32 1, %s6457_s27   ;;  %p6459_p13 = scmp.ne.s32.totalorder %s6458_s20, 0 }
 0x70f   : > { %s4132_s14 = scalar_lea.sflag [#allocation6], %s4131_s10 }
 0x710   : > { %p4837_p11 = pnand %p6460_p5, %p6459_p13 }
 0x712   : > { %5214 = dma.done.wait (!%p4837_p11), %s4132_s14, 128  }
 0x713   : > { %5216 = vsyncadd (!%p4837_p11), %s4132_s14, 4294967168  ;;  %s4141_s5 = scalar_lea.sflag [#allocation15], %s4131_s10 }
 0x714   : > { %5218 = dma.done.wait (!%p4837_p11), %s4141_s5, 32  }
 0x715   : > { %5220 = vsyncadd (!%p4837_p11), %s4141_s5, 4294967264  ;;  %p39_p2 = scmp.ge.s32.totalorder %s5479_s0, 4   ;;  %s6461_s23 = smov %s5227_s24 }
 0x716   : > { %s6462_s24 = smov %s5231_s25  ;;  %s6463_s25 = smov %s5510_s12 }
 0x717   : > { %s6464_s26 = smov %s5479_s0  ;;  %41 = sbr.rel (!%p39_p2) target bundleno = 22 (0x16), region = 221 }
 0x71e   :  { %4146 = vsyncpa [#allocation5], 1 }
 0x71f   :  { %4148 = vsyncpa [#allocation5 + $0x1], 1 }
 0x720   :  { %4149 = vsyncpa [#allocation8], 1 }
 0x721   :  { %4151 = vsyncpa [#allocation8 + $0x1], 1 }
 0x722   :  { %4152 = vsyncpa [#allocation11], 1 }
 0x723   :  { %4153 = vsyncpa [#allocation6], 1 }
 0x724   :  { %4155 = vsyncpa [#allocation6 + $0x1], 1 }
 0x725   :  { %4156 = vsyncpa [#allocation15], 1 }
 0x726   :  { %4158 = vsyncpa [#allocation15 + $0x1], 1 }

</bundles_post_ra>
